<compile_context>
chip_gen: v5e
topology: v5e:2x2
jax: 0.10.0
libtpu: 0.0.40
codegen_flags: <defaults>
</compile_context>

<pallas_src>
import jax
import jax.numpy as jnp
from jax.experimental import pallas as pl
from jax.experimental.pallas import tpu as pltpu

# ---------------- model hyper-parameters (small, deterministic) -------------
N = 2             # batch
R = 16            # input_resolution
CIN = 1           # input channels (ExportModel probes original with (1,1,R,R))
C = 8             # trunk channels
CPOL = 2          # policy-head conv channels
HW = R * R        # 256
K = HW * C        # 2048 : folded feature width (column order hw*C + c)
JOUT = HW + 128   # 384  : policy columns [0,HW) + value column HW, lane-padded


# ---------------------------- Pallas kernel ---------------------------------
def export_model_kernel(x_ref, wt_ref, wh_ref, bias_ref, policy_ref, value_ref):
    """Whole forward as two lane-dense bf16 matmuls with f32 accumulation.

    x_ref    : (N, HW)      f32   flattened input image
    wt_ref   : (HW, K)      bf16  densified trunk conv weight
    wh_ref   : (K, JOUT)    bf16  folded policy weight + value column at HW
    bias_ref : (2, K)       f32   row 0 = trunk bias, row 1[:JOUT] = head bias
    """
    b_trunk = bias_ref[0:1, :]                                  # (1, K)    f32
    b_heads = bias_ref[1:2, 0:JOUT]                             # (1, JOUT) f32

    # trunk: dense conv-as-matmul, bias + ReLU in f32 (lane-dense output)
    x_bf = x_ref[...].astype(jnp.bfloat16)                      # (N, HW)
    h = jnp.dot(x_bf, wt_ref[...],
                preferred_element_type=jnp.float32) + b_trunk   # (N, K) f32
    h = jnp.maximum(h, 0.0)

    # heads: one merged matmul (policy columns + value column ride together)
    out = jnp.dot(h.astype(jnp.bfloat16), wh_ref[...],
                  preferred_element_type=jnp.float32) + b_heads  # (N, JOUT)

    policy_ref[...] = out[:, 0:HW]                   # (N, HW) full-lane store
    value_ref[...] = jnp.tanh(out[:, HW:HW + 1])     # (N, 1)  f32 tanh (EUP)


# ------------------------------ JAX glue -------------------------------------
def init_params(key):
    """Deterministic synthetic weights, stored in PyTorch-native layouts."""
    ks = jax.random.split(key, 10)
    s = 0.1
    return {
        "w1": jax.random.normal(ks[0], (C, CIN, 3, 3), jnp.float32) * s,   # torch Conv2d
        "b1": jax.random.normal(ks[1], (C,), jnp.float32) * s,
        "wpc": jax.random.normal(ks[2], (CPOL, C, 1, 1), jnp.float32) * s,
        "bpc": jax.random.normal(ks[3], (CPOL,), jnp.float32) * s,
        "wpf": jax.random.normal(ks[4], (HW, CPOL * HW), jnp.float32) * s,  # torch Linear (out, in)
        "bpf": jax.random.normal(ks[5], (HW,), jnp.float32) * s,
        "wvc": jax.random.normal(ks[6], (1, C, 1, 1), jnp.float32) * s,
        "bvc": jax.random.normal(ks[7], (1,), jnp.float32) * s,
        "wvf": jax.random.normal(ks[8], (1, HW), jnp.float32) * s,
        "bvf": jax.random.normal(ks[9], (1,), jnp.float32) * s,
    }


def prepare_params(p):
    """ONE-TIME host prep.

    Returns (w_trunk_bf16, w_heads_bf16, biases):
      w_trunk_bf16 : (HW, K)    bf16  dense 3x3 conv matrix, columns hw*C + c
      w_heads_bf16 : (K, JOUT)  bf16  folded policy head + value column at HW
      biases       : (2, K)     f32   row 0 trunk bias, row 1[:JOUT] head bias
    """
    # --- densify the 3x3 conv by its response to identity basis images -----
    eye = jnp.eye(HW, dtype=jnp.float32).reshape(HW, CIN, R, R)
    resp = jax.lax.conv_general_dilated(
        eye, p["w1"], (1, 1), "SAME",
        dimension_numbers=("NCHW", "OIHW", "NCHW"))          # (HW, C, R, R)
    # W_trunk[p, (i*R+j)*C + c] = resp[p, c, i, j]
    w_trunk = jnp.transpose(resp, (0, 2, 3, 1)).reshape(HW, K)
    b_trunk = jnp.tile(p["b1"], HW)                           # [hw*C + c] = b1[c]

    # --- fold policy head: conv1x1(wpc,bpc) -> torch flatten -> Linear(wpf,bpf)
    # torch flatten of (N, CPOL, H, W) is channel-major: t = cp*HW + hw
    wpf_t = p["wpf"].T.reshape(CPOL, HW, HW)                  # [cp, hw, j] = wpf[j, cp*HW+hw]
    wpc = p["wpc"].reshape(CPOL, C)                           # [cp, c]
    # W_pol[hw*C + c, j] = sum_cp wpc[cp, c] * wpf[j, cp*HW + hw]
    w_pol = jnp.einsum("pc,phj->hcj", wpc, wpf_t).reshape(K, HW)
    b_pol = p["bpf"] + jnp.einsum("p,phj->j", p["bpc"], wpf_t)

    # --- fold value head: conv1x1(wvc,bvc) -> flatten -> Linear(wvf,bvf)
    wvc = p["wvc"].reshape(C)
    wvf = p["wvf"].reshape(HW)
    w_val = (wvf[:, None] * wvc[None, :]).reshape(K)          # [hw*C + c]
    b_val = p["bvf"][0] + p["bvc"][0] * jnp.sum(wvf)

    # --- merge heads: policy in columns [0, HW), value in column HW ---------
    w_heads = jnp.zeros((K, JOUT), jnp.float32)
    w_heads = w_heads.at[:, 0:HW].set(w_pol)
    w_heads = w_heads.at[:, HW].set(w_val)
    b_heads = jnp.zeros((JOUT,), jnp.float32)
    b_heads = b_heads.at[0:HW].set(b_pol)
    b_heads = b_heads.at[HW].set(b_val)

    biases = jnp.zeros((2, K), jnp.float32)
    biases = biases.at[0, :].set(b_trunk)
    biases = biases.at[1, 0:JOUT].set(b_heads)

    return (w_trunk.astype(jnp.bfloat16),
            w_heads.astype(jnp.bfloat16),
            biases)


# advisory cost estimate: two matmuls + a couple of tanh, ~2.6 MB of traffic
_FLOPS = 2 * N * HW * K + 2 * N * K * JOUT
_BYTES = (N * HW * 4) + (HW * K * 2) + (K * JOUT * 2) + (2 * K * 4) \
         + (N * HW * 4) + (N * 1 * 4)


@jax.jit
def export_model_forward(x_nchw, w_trunk_bf16, w_heads_bf16, biases):
    # layout-preserving flatten (bitcast; no extra HBM roundtrip / relayout)
    x_flat = x_nchw.reshape(N, HW)
    vmem = pl.BlockSpec(memory_space=pltpu.MemorySpace.VMEM)
    policy, value = pl.pallas_call(
        export_model_kernel,
        out_shape=(jax.ShapeDtypeStruct((N, HW), jnp.float32),
                   jax.ShapeDtypeStruct((N, 1), jnp.float32)),
        in_specs=[vmem, vmem, vmem, vmem],
        out_specs=(vmem, vmem),
        cost_estimate=pl.CostEstimate(flops=_FLOPS, transcendentals=N,
                                      bytes_accessed=_BYTES),
    )(x_flat, w_trunk_bf16, w_heads_bf16, biases)
    # ExportModel returns tuple(y[k] for k in output_names) == (policy, value)
    return policy, value


# -------------------------- references ---------------------------------------
def kernel_math_reference(x_nchw, w_trunk_bf16, w_heads_bf16, biases):
    """Plain-JAX recomputation with the exact prepared (bf16-rounded) arrays
    the Pallas kernel consumes; differences are accumulation-order only."""
    x_flat = x_nchw.reshape(N, HW).astype(jnp.bfloat16)
    b_trunk = biases[0:1, :]
    b_heads = biases[1:2, 0:JOUT]
    h = jnp.maximum(
        jnp.dot(x_flat, w_trunk_bf16, preferred_element_type=jnp.float32)
        + b_trunk, 0.0)
    out = jnp.dot(h.astype(jnp.bfloat16), w_heads_bf16,
                  preferred_element_type=jnp.float32) + b_heads
    return out[:, 0:HW], jnp.tanh(out[:, HW:HW + 1])


def reference_forward(x_nchw, p):
    """Pure-f32 conv formulation of the original module (validates the folds)."""
    h = jax.lax.conv_general_dilated(
        x_nchw, p["w1"], (1, 1), "SAME",
        dimension_numbers=("NCHW", "OIHW", "NCHW")) + p["b1"].reshape(1, C, 1, 1)
    h = jnp.maximum(h, 0.0)
    pol = jax.lax.conv_general_dilated(
        h, p["wpc"], (1, 1), "SAME",
        dimension_numbers=("NCHW", "OIHW", "NCHW")) + p["bpc"].reshape(1, CPOL, 1, 1)
    pol = pol.reshape(N, CPOL * HW) @ p["wpf"].T + p["bpf"]
    val = jax.lax.conv_general_dilated(
        h, p["wvc"], (1, 1), "SAME",
        dimension_numbers=("NCHW", "OIHW", "NCHW")) + p["bvc"].reshape(1, 1, 1, 1)
    val = jnp.tanh(val.reshape(N, HW) @ p["wvf"].T + p["bvf"])
    return pol, val


# --------------------------------- main --------------------------------------
if __name__ == "__main__":
    key = jax.random.PRNGKey(0)
    x = jax.random.normal(key, (N, CIN, R, R), jnp.float32)   # NCHW, like torch
    params = init_params(jax.random.PRNGKey(42))

    # One-time host-side prep (conv densification + head fold + bf16 cast);
    # NOT re-run per forward call.
    w_trunk_bf16, w_heads_bf16, biases = jax.block_until_ready(
        prepare_params(params))

    policy, value = export_model_forward(x, w_trunk_bf16, w_heads_bf16, biases)
    jax.block_until_ready((policy, value))

    assert policy.shape == (N, HW) and value.shape == (N, 1)

    # Tight check: same bf16-rounded operands, plain-JAX math.
    ref_p, ref_v = kernel_math_reference(x, w_trunk_bf16, w_heads_bf16, biases)
    assert jnp.allclose(policy, ref_p, atol=1e-3, rtol=1e-3)
    assert jnp.allclose(value, ref_v, atol=1e-3, rtol=1e-3)

    # Loose sanity check vs the original f32 conv formulation (validates the
    # conv densification + head folding; tolerance accounts for both matmuls
    # running in bf16).
    conv_p, conv_v = reference_forward(x, params)
    assert jnp.allclose(policy, conv_p, atol=2e-2, rtol=2e-2)
    assert jnp.allclose(value, conv_v, atol=2e-2, rtol=2e-2)

    print("KERNEL_OK")
</pallas_src>

<mosaic_0001>
module attributes {stable_mosaic.version = 11 : i64} {
  func.func @export_model_kernel(%arg0: memref<2x256xf32, #tpu.memory_space<vmem>>, %arg1: memref<256x2048xbf16, #tpu.memory_space<vmem>>, %arg2: memref<2048x384xbf16, #tpu.memory_space<vmem>>, %arg3: memref<2x2048xf32, #tpu.memory_space<vmem>>, %arg4: memref<2x256xf32, #tpu.memory_space<vmem>>, %arg5: memref<2x1xf32, #tpu.memory_space<vmem>>) attributes {dimension_semantics = [], scalar_prefetch = 0 : i64, scratch_operands = 0 : i64, tpu.core_type = #tpu.core_type<tc>} {
    %c0 = arith.constant 0 : index
    %c0_0 = arith.constant 0 : index
    %0 = vector.load %arg3[%c0, %c0_0] : memref<2x2048xf32, #tpu.memory_space<vmem>>, vector<1x2048xf32>
    %c1 = arith.constant 1 : index
    %c0_1 = arith.constant 0 : index
    %1 = vector.load %arg3[%c1, %c0_1] : memref<2x2048xf32, #tpu.memory_space<vmem>>, vector<1x384xf32>
    %c0_2 = arith.constant 0 : index
    %c0_3 = arith.constant 0 : index
    %2 = vector.load %arg0[%c0_2, %c0_3] : memref<2x256xf32, #tpu.memory_space<vmem>>, vector<2x256xf32>
    %3 = arith.truncf %2 : vector<2x256xf32> to vector<2x256xbf16>
    %c0_4 = arith.constant 0 : index
    %c0_5 = arith.constant 0 : index
    %4 = vector.load %arg1[%c0_4, %c0_5] : memref<256x2048xbf16, #tpu.memory_space<vmem>>, vector<256x2048xbf16>
    %cst = arith.constant dense<0.000000e+00> : vector<2x2048xf32>
    %5 = tpu.matmul %3, %4, %cst {dimension_numbers = #tpu.dot_dimension_numbers<[1], [0], [0], [1], [0, 0, 1, 1], [], []>} : vector<2x256xbf16>, vector<256x2048xbf16>, vector<2x2048xf32> -> vector<2x2048xf32>
    %6 = vector.broadcast %0 : vector<1x2048xf32> to vector<2x2048xf32>
    %7 = arith.addf %5, %6 : vector<2x2048xf32>
    %cst_6 = arith.constant 0.000000e+00 : f32
    %8 = vector.broadcast %cst_6 : f32 to vector<2x2048xf32>
    %9 = arith.maximumf %7, %8 : vector<2x2048xf32>
    %10 = arith.truncf %9 : vector<2x2048xf32> to vector<2x2048xbf16>
    %c0_7 = arith.constant 0 : index
    %c0_8 = arith.constant 0 : index
    %11 = vector.load %arg2[%c0_7, %c0_8] : memref<2048x384xbf16, #tpu.memory_space<vmem>>, vector<2048x384xbf16>
    %cst_9 = arith.constant dense<0.000000e+00> : vector<2x384xf32>
    %12 = tpu.matmul %10, %11, %cst_9 {dimension_numbers = #tpu.dot_dimension_numbers<[1], [0], [0], [1], [0, 0, 1, 1], [], []>} : vector<2x2048xbf16>, vector<2048x384xbf16>, vector<2x384xf32> -> vector<2x384xf32>
    %13 = vector.broadcast %1 : vector<1x384xf32> to vector<2x384xf32>
    %14 = arith.addf %12, %13 : vector<2x384xf32>
    %15 = vector.extract_strided_slice %14 {offsets = [0, 0], sizes = [2, 256], strides = [1, 1]} : vector<2x384xf32> to vector<2x256xf32>
    %c0_10 = arith.constant 0 : index
    %c0_11 = arith.constant 0 : index
    %16 = vector.load %arg4[%c0_10, %c0_11] : memref<2x256xf32, #tpu.memory_space<vmem>>, vector<2x256xf32>
    tpu.vector_store %arg4[%c0_10, %c0_11], %15 {strides = array<i32>} : memref<2x256xf32, #tpu.memory_space<vmem>>, vector<2x256xf32>,
    %17 = vector.extract_strided_slice %14 {offsets = [0, 256], sizes = [2, 1], strides = [1, 1]} : vector<2x384xf32> to vector<2x1xf32>
    %18 = math.tanh %17 : vector<2x1xf32>
    %c0_12 = arith.constant 0 : index
    %c0_13 = arith.constant 0 : index
    %19 = vector.load %arg5[%c0_12, %c0_13] : memref<2x1xf32, #tpu.memory_space<vmem>>, vector<2x1xf32>
    tpu.vector_store %arg5[%c0_12, %c0_13], %18 {strides = array<i32>} : memref<2x1xf32, #tpu.memory_space<vmem>>, vector<2x1xf32>,
    return
  }
}

</mosaic_0001>

<bundles_post_ra>
// kernel: export_model_forward.1
= control target key start
LH: loop header
LB: loop body
LE: loop exit
PB: predicated region body
PF: predicated region fallthrough
CT: control target
= control target key end

     0   :  { %11 = vsyncpa [#allocation3], 0  ;;  %s8912_s0 = inlined_call_operand.vmem [shape: f32[2,256], index: 0, kind: input, shape index: {}]   ;;  %s8913_s1 = inlined_call_operand.hbm [shape: bf16[256,2048], index: 1, kind: input, shape index: {}]   ;;  %s8914_s2 = inlined_call_operand.hbm [shape: bf16[2048,384], index: 2, kind: input, shape index: {}]   ;;  %s8915_s3 = inlined_call_operand.hbm [shape: f32[2,2048], index: 3, kind: input, shape index: {}]   ;;  %s8916_s4 = inlined_call_operand.hbm [shape: f32[2,256], index: 4, kind: output, shape index: {0}]   ;;  %s8917_s5 = inlined_call_operand.vmem [shape: f32[2,1], index: 5, kind: output, shape index: {1}]  }
   0x1   :  { %12 = vsyncpa [#allocation6], 0  ;;  %s33_s20 = sshll.u32 %s8914_s2, 4  ;;  %s34_s20 = int_to_ptr.hbm [resolvable:$true] %s33_s20 }
   0x2   :  { %13 = vsyncpa [#allocation4], 0  ;;  %s8634_s21 = smov [#allocation5]   ;;  %s20_s25 = sshll.u32 %s8913_s1, 4  ;;  %s21_s25 = int_to_ptr.hbm [resolvable:$true] %s20_s25 }
   0x3   :  { %s35_s22 = sshll.u32 %s8634_s21, 4  ;;  %s8635_s26 = smov 192   ;;  %s36_s22 = int_to_ptr.vmem [resolvable:$true] %s35_s22 }
   0x4   :  { %s8636_s27 = smov 12   ;;  %s8637_s28 = smov [#allocation2]  }
   0x5   :  { %41 = dma.hbm_to_vmem [thread:$0]  %s34_s20, 49152, %s36_s22, [#allocation6], %s8635_s26, %s8635_s26, %s8636_s27  }
   0x6   :  { %s22_s29 = sshll.u32 %s8637_s28, 4  ;;  %s8638_s30 = smov 1024   ;;  %s23_s29 = int_to_ptr.vmem [resolvable:$true] %s22_s29 }
   0x7   :  { %s8639_s6 = smov 64   ;;  %s47_s8 = sshll.u32 %s8915_s3, 4  ;;  %s48_s8 = int_to_ptr.hbm [resolvable:$true] %s47_s8 }
   0x8   :  { %28 = dma.hbm_to_vmem [thread:$0]  %s21_s25, 32768, %s23_s29, [#allocation3], %s8638_s30, %s8638_s30, %s8639_s6  }
   0x9   :  { %s8640_s9 = smov [#allocation7]  }
   0xa   :  { %s49_s10 = sshll.u32 %s8640_s9, 4  ;;  %s50_s10 = int_to_ptr.vmem [resolvable:$true] %s49_s10 }
   0xb   :  { %52 = dma.hbm_to_vmem [thread:$0]  %s48_s8, 512, %s50_s10, [#allocation6]  }
   0xc   :  { %8628 = dma.done.wait [#allocation3], 32768  }
   0xd   :  { %8629 = vsyncadd [#allocation3], 4294934528 }
   0xe   :  { %8630 = dma.done.wait [#allocation6], 49664  }
   0xf   :  { %8631 = vsyncadd [#allocation6], 4294917632  ;;  %v5770_v0 = vld [vmem:[#allocation2 + $0x380] sm:$0xf]  ;;  %v7992_v5 = vld [vmem:[#allocation2 + $0x384] sm:$0xf] }
  0x10   :  { %v8000_v1 = vld [vmem:[#allocation2 + $0x3bc] sm:$0xf0]  ;;  %v5772_v6 = vld [vmem:[#allocation2 + $0x3c0] sm:$0xf0]  ;;  %s5305_s14 = sshll.u32 %s8916_s4, 4  ;;  %vm5291_vm0 = vcmask 1041408   ;;  %s5306_s14 = int_to_ptr.hbm [resolvable:$true] %s5305_s14 }
  0x11   :  { %v6282_v2 = vld [vmem:[#allocation2 + $0x780] sm:$0xf]  ;;  %v5771_v3 = vor.u32 %v8000_v1, %v5770_v0  ;;  %v5775_v8 = vor.u32 %v7992_v5, %v5772_v6  ;;  %v8120_v9 = vld [vmem:[#allocation2 + $0x784] sm:$0xf]  ;;  %vm5296_vm1 = vcmask 1024  }
  0x12   :  { %v8128_v4 = vld [vmem:[#allocation2 + $0x7bc] sm:$0xf0]  ;;  %v6284_v10 = vld [vmem:[#allocation2 + $0x7c0] sm:$0xf0] }
  0x13   :  { %v6283_v7 = vor.u32 %v8128_v4, %v6282_v2  ;;  %v5706_v11 = vld [vmem:[#allocation2 + $0x300] sm:$0xf]  ;;  %1649 = vmatpush.bf16.msra.mxu0 %v5771_v3  ;;  %v6287_v12 = vor.u32 %v8120_v9, %v6284_v10  ;;  %1675 = vmatpush.bf16.msra.mxu2 %v5775_v8  ;;  %v7976_v18 = vld [vmem:[#allocation2 + $0x304] sm:$0xf] }
  0x14   :  { %v7984_v13 = vld [vmem:[#allocation2 + $0x33c] sm:$0xf0]  ;;  %v5708_v19 = vld [vmem:[#allocation2 + $0x340] sm:$0xf0] }
  0x15   :  { %v6218_v14 = vld [vmem:[#allocation2 + $0x700] sm:$0xf]  ;;  %1662 = vmatpush.bf16.msra.mxu1 %v6283_v7  ;;  %v5707_v16 = vor.u32 %v7984_v13, %v5706_v11  ;;  %v8104_v20 = vld [vmem:[#allocation2 + $0x704] sm:$0xf]  ;;  %1688 = vmatpush.bf16.msra.mxu3 %v6287_v12  ;;  %v5711_v21 = vor.u32 %v7976_v18, %v5708_v19 }
  0x16   :  { %v8112_v15 = vld [vmem:[#allocation2 + $0x73c] sm:$0xf0]  ;;  %v6220_v22 = vld [vmem:[#allocation2 + $0x740] sm:$0xf0] }
  0x17   :  { %v6219_v17 = vor.u32 %v8112_v15, %v6218_v14  ;;  %v5642_v23 = vld [vmem:[#allocation2 + $0x280] sm:$0xf]  ;;  %v6223_v25 = vor.u32 %v8104_v20, %v6220_v22  ;;  %v7960_v28 = vld [vmem:[#allocation2 + $0x284] sm:$0xf]  ;;  %1650 = vmatpush.bf16.msra.mxu0 %v5707_v16  ;;  %1676 = vmatpush.bf16.msra.mxu2 %v5711_v21 }
  0x18   :  { %v7968_v24 = vld [vmem:[#allocation2 + $0x2bc] sm:$0xf0]  ;;  %v5644_v30 = vld [vmem:[#allocation2 + $0x2c0] sm:$0xf0] }
  0x19   :  { %v6154_v26 = vld [vmem:[#allocation2 + $0x680] sm:$0xf]  ;;  %v5643_v29 = vor.u32 %v7968_v24, %v5642_v23  ;;  %v8088_v31 = vld [vmem:[#allocation2 + $0x684] sm:$0xf]  ;;  %1663 = vmatpush.bf16.msra.mxu1 %v6219_v17  ;;  %v5647_v34 = vor.u32 %v7960_v28, %v5644_v30  ;;  %1689 = vmatpush.bf16.msra.mxu3 %v6223_v25  ;;  %v5778_v28 = vld [vmem:[#allocation2 + $0x388] sm:$0xf] }
  0x1a   :  { %v8096_v27 = vld [vmem:[#allocation2 + $0x6bc] sm:$0xf0]  ;;  %v6156_v32 = vld [vmem:[#allocation2 + $0x6c0] sm:$0xf0]  ;;  %v6290_v30 = vld [vmem:[#allocation2 + $0x788] sm:$0xf] }
  0x1b   :  { %v6155_v33 = vor.u32 %v8096_v27, %v6154_v26  ;;  %v5578_v35 = vld [vmem:[#allocation2 + $0x200] sm:$0xf]  ;;  %v6159_v38 = vor.u32 %v8088_v31, %v6156_v32  ;;  %v7944_v40 = vld [vmem:[#allocation2 + $0x204] sm:$0xf]  ;;  %1651 = vmatpush.bf16.msra.mxu0 %v5643_v29  ;;  %1677 = vmatpush.bf16.msra.mxu2 %v5647_v34  ;;  %v8001_v29 = vld [vmem:[#allocation2 + $0x3c4] sm:$0xf0] }
  0x1c   :  { %v7952_v36 = vld [vmem:[#allocation2 + $0x23c] sm:$0xf0]  ;;  %v5580_v41 = vld [vmem:[#allocation2 + $0x240] sm:$0xf0]  ;;  %v8129_v32 = vld [vmem:[#allocation2 + $0x7c4] sm:$0xf0] }
  0x1d   :  { %v6090_v37 = vld [vmem:[#allocation2 + $0x600] sm:$0xf]  ;;  %v8072_v42 = vld [vmem:[#allocation2 + $0x604] sm:$0xf]  ;;  %v5579_v44 = vor.u32 %v7952_v36, %v5578_v35  ;;  %1664 = vmatpush.bf16.msra.mxu1 %v6155_v33  ;;  %v5583_v46 = vor.u32 %v7944_v40, %v5580_v41  ;;  %1690 = vmatpush.bf16.msra.mxu3 %v6159_v38  ;;  %v7993_v33 = vld [vmem:[#allocation2 + $0x38c] sm:$0xf]  ;;  %v5779_v40 = vor.u32 %v8001_v29, %v5778_v28 }
  0x1e   :  { %v8080_v39 = vld [vmem:[#allocation2 + $0x63c] sm:$0xf0]  ;;  %v6092_v43 = vld [vmem:[#allocation2 + $0x640] sm:$0xf0]  ;;  %v5780_v34 = vld [vmem:[#allocation2 + $0x3c8] sm:$0xf0]  ;;  %v6291_v41 = vor.u32 %v8129_v32, %v6290_v30 }
  0x1f   :  { %v6091_v45 = vor.u32 %v8080_v39, %v6090_v37  ;;  %v5514_v47 = vld [vmem:[#allocation2 + $0x180] sm:$0xf]  ;;  %v6095_v50 = vor.u32 %v8072_v42, %v6092_v43  ;;  %v7928_v52 = vld [vmem:[#allocation2 + $0x184] sm:$0xf]  ;;  %1652 = vmatpush.bf16.msra.mxu0 %v5579_v44  ;;  %1678 = vmatpush.bf16.msra.mxu2 %v5583_v46  ;;  %v8121_v37 = vld [vmem:[#allocation2 + $0x78c] sm:$0xf]  ;;  %v5783_v42 = vor.u32 %v7993_v33, %v5780_v34 }
  0x20   :  { %v7936_v48 = vld [vmem:[#allocation2 + $0x1bc] sm:$0xf0]  ;;  %v5516_v53 = vld [vmem:[#allocation2 + $0x1c0] sm:$0xf0]  ;;  %v6292_v38 = vld [vmem:[#allocation2 + $0x7c8] sm:$0xf0] }
  0x21   :  { %v6026_v49 = vld [vmem:[#allocation2 + $0x580] sm:$0xf]  ;;  %v8056_v54 = vld [vmem:[#allocation2 + $0x584] sm:$0xf]  ;;  %v5515_v56 = vor.u32 %v7936_v48, %v5514_v47  ;;  %1665 = vmatpush.bf16.msra.mxu1 %v6091_v45  ;;  %v5519_v58 = vor.u32 %v7928_v52, %v5516_v53  ;;  %1691 = vmatpush.bf16.msra.mxu3 %v6095_v50  ;;  %v5714_v43 = vld [vmem:[#allocation2 + $0x308] sm:$0xf]  ;;  %v6295_v46 = vor.u32 %v8121_v37, %v6292_v38 }
  0x22   :  { %v8064_v51 = vld [vmem:[#allocation2 + $0x5bc] sm:$0xf0]  ;;  %v6028_v55 = vld [vmem:[#allocation2 + $0x5c0] sm:$0xf0]  ;;  %v7985_v44 = vld [vmem:[#allocation2 + $0x344] sm:$0xf0] }
  0x23   :  { %v6027_v57 = vor.u32 %v8064_v51, %v6026_v49  ;;  %v5450_v59 = vld [vmem:[#allocation2 + $0x100] sm:$0xf]  ;;  %v6031_v62 = vor.u32 %v8056_v54, %v6028_v55  ;;  %v7912_v0 = vld [vmem:[#allocation2 + $0x104] sm:$0xf]  ;;  %1653 = vmatpush.bf16.msra.mxu0 %v5515_v56  ;;  %1679 = vmatpush.bf16.msra.mxu2 %v5519_v58  ;;  %v6226_v45 = vld [vmem:[#allocation2 + $0x708] sm:$0xf]  ;;  %v5715_v52 = vor.u32 %v7985_v44, %v5714_v43 }
  0x24   :  { %v7920_v60 = vld [vmem:[#allocation2 + $0x13c] sm:$0xf0]  ;;  %v5452_v1 = vld [vmem:[#allocation2 + $0x140] sm:$0xf0]  ;;  %v8113_v47 = vld [vmem:[#allocation2 + $0x744] sm:$0xf0] }
  0x25   :  { %v5962_v61 = vld [vmem:[#allocation2 + $0x500] sm:$0xf]  ;;  %v8040_v2 = vld [vmem:[#allocation2 + $0x504] sm:$0xf]  ;;  %v5451_v4 = vor.u32 %v7920_v60, %v5450_v59  ;;  %1666 = vmatpush.bf16.msra.mxu1 %v6027_v57  ;;  %v5455_v6 = vor.u32 %v7912_v0, %v5452_v1  ;;  %1692 = vmatpush.bf16.msra.mxu3 %v6031_v62  ;;  %v7977_v48 = vld [vmem:[#allocation2 + $0x30c] sm:$0xf]  ;;  %v6227_v53 = vor.u32 %v8113_v47, %v6226_v45 }
  0x26   :  { %v8048_v63 = vld [vmem:[#allocation2 + $0x53c] sm:$0xf0]  ;;  %v5964_v3 = vld [vmem:[#allocation2 + $0x540] sm:$0xf0]  ;;  %v5716_v49 = vld [vmem:[#allocation2 + $0x348] sm:$0xf0] }
  0x27   :  { %v5963_v5 = vor.u32 %v8048_v63, %v5962_v61  ;;  %v5386_v7 = vld [vmem:[#allocation2 + $0x80] sm:$0xf]  ;;  %v5967_v10 = vor.u32 %v8040_v2, %v5964_v3  ;;  %v7896_v12 = vld [vmem:[#allocation2 + $0x84] sm:$0xf]  ;;  %1654 = vmatpush.bf16.msra.mxu0 %v5451_v4  ;;  %1680 = vmatpush.bf16.msra.mxu2 %v5455_v6  ;;  %v8105_v50 = vld [vmem:[#allocation2 + $0x70c] sm:$0xf]  ;;  %v5719_v54 = vor.u32 %v7977_v48, %v5716_v49 }
  0x28   :  { %v7904_v8 = vld [vmem:[#allocation2 + $0xbc] sm:$0xf0]  ;;  %v5388_v13 = vld [vmem:[#allocation2 + $0xc0] sm:$0xf0]  ;;  %v6228_v51 = vld [vmem:[#allocation2 + $0x748] sm:$0xf0] }
  0x29   :  { %v5898_v9 = vld [vmem:[#allocation2 + $0x480] sm:$0xf]  ;;  %v8024_v14 = vld [vmem:[#allocation2 + $0x484] sm:$0xf]  ;;  %v5387_v16 = vor.u32 %v7904_v8, %v5386_v7  ;;  %1667 = vmatpush.bf16.msra.mxu1 %v5963_v5  ;;  %v5391_v20 = vor.u32 %v7896_v12, %v5388_v13  ;;  %1693 = vmatpush.bf16.msra.mxu3 %v5967_v10  ;;  %v5650_v55 = vld [vmem:[#allocation2 + $0x288] sm:$0xf]  ;;  %v6231_v58 = vor.u32 %v8105_v50, %v6228_v51 }
  0x2a   :  { %v8032_v11 = vld [vmem:[#allocation2 + $0x4bc] sm:$0xf0]  ;;  %v5900_v15 = vld [vmem:[#allocation2 + $0x4c0] sm:$0xf0]  ;;  %v7969_v56 = vld [vmem:[#allocation2 + $0x2c4] sm:$0xf0] }
  0x2b   :  { %v5322_v17 = vld [vmem:[#allocation2] sm:$0xf]  ;;  %v5899_v19 = vor.u32 %v8032_v11, %v5898_v9  ;;  %v7880_v23 = vld [vmem:[#allocation2 + $0x4] sm:$0xf]  ;;  %v5903_v24 = vor.u32 %v8024_v14, %v5900_v15  ;;  %1655 = vmatpush.bf16.msra.mxu0 %v5387_v16  ;;  %1681 = vmatpush.bf16.msra.mxu2 %v5391_v20  ;;  %v6162_v57 = vld [vmem:[#allocation2 + $0x688] sm:$0xf]  ;;  %v5651_v0 = vor.u32 %v7969_v56, %v5650_v55 }
  0x2c   :  { %v7888_v18 = vld [vmem:[#allocation2 + $0x3c] sm:$0xf0]  ;;  %v5324_v25 = vld [vmem:[#allocation2 + $0x40] sm:$0xf0]  ;;  %v8097_v59 = vld [vmem:[#allocation2 + $0x6c4] sm:$0xf0] }
  0x2d   :  { %v5834_v21 = vld [vmem:[#allocation2 + $0x400] sm:$0xf]  ;;  %v8008_v26 = vld [vmem:[#allocation2 + $0x404] sm:$0xf]  ;;  %v5323_v31 = vor.u32 %v7888_v18, %v5322_v17  ;;  %1668 = vmatpush.bf16.msra.mxu1 %v5899_v19  ;;  %v5327_v36 = vor.u32 %v7880_v23, %v5324_v25  ;;  %1694 = vmatpush.bf16.msra.mxu3 %v5903_v24  ;;  %v7961_v60 = vld [vmem:[#allocation2 + $0x28c] sm:$0xf]  ;;  %v6163_v3 = vor.u32 %v8097_v59, %v6162_v57 }
  0x2e   :  { %v8016_v22 = vld [vmem:[#allocation2 + $0x43c] sm:$0xf0]  ;;  %v5836_v27 = vld [vmem:[#allocation2 + $0x440] sm:$0xf0]  ;;  %v5652_v61 = vld [vmem:[#allocation2 + $0x2c8] sm:$0xf0] }
  0x2f   :  { %v5835_v35 = vor.u32 %v8016_v22, %v5834_v21  ;;  %v5839_v39 = vor.u32 %v8008_v26, %v5836_v27  ;;  %1656 = vmatpush.bf16.msra.mxu0 %v5323_v31  ;;  %1682 = vmatpush.bf16.msra.mxu2 %v5327_v36  ;;  %v8089_v62 = vld [vmem:[#allocation2 + $0x68c] sm:$0xf]  ;;  %v5586_v1 = vld [vmem:[#allocation2 + $0x208] sm:$0xf]  ;;  %v70_v2 = vld [vmem:[%s8912_s0] sm:$0xf]  ;;  %v5655_v4 = vor.u32 %v7961_v60, %v5652_v61 }
  0x30   :  { %v6164_v63 = vld [vmem:[#allocation2 + $0x6c8] sm:$0xf0]  ;;  %v7953_v5 = vld [vmem:[#allocation2 + $0x244] sm:$0xf0]  ;;  %72 = vst [vmem:[#allocation1] ss:$4 sm:$0xff] %v70_v2 }
  0x31   :  { %1669 = vmatpush.bf16.msra.mxu1 %v5835_v35  ;;  %1695 = vmatpush.bf16.msra.mxu3 %v5839_v39  ;;  %v6098_v6 = vld [vmem:[#allocation2 + $0x608] sm:$0xf]  ;;  %v6167_v7 = vor.u32 %v8089_v62, %v6164_v63  ;;  %v7945_v9 = vld [vmem:[#allocation2 + $0x20c] sm:$0xf]  ;;  %v5587_v13 = vor.u32 %v7953_v5, %v5586_v1  ;;  %v5786_v1 = vld [vmem:[#allocation2 + $0x390] sm:$0xf] }
  0x32   :  { %v8081_v8 = vld [vmem:[#allocation2 + $0x644] sm:$0xf0]  ;;  %v5588_v10 = vld [vmem:[#allocation2 + $0x248] sm:$0xf0]  ;;  %v8002_v2 = vld [vmem:[#allocation2 + $0x3cc] sm:$0xf0] }
  0x33   :  { %1701 = vmatpush.bf16.msrb.mxu0 %v5779_v40  ;;  %1727 = vmatpush.bf16.msrb.mxu2 %v5783_v42  ;;  %v8073_v11 = vld [vmem:[#allocation2 + $0x60c] sm:$0xf]  ;;  %v5522_v14 = vld [vmem:[#allocation2 + $0x188] sm:$0xf]  ;;  %v6099_v15 = vor.u32 %v8081_v8, %v6098_v6  ;;  %v5591_v16 = vor.u32 %v7945_v9, %v5588_v10  ;;  %v8130_v5 = vld [vmem:[#allocation2 + $0x7cc] sm:$0xf0] }
  0x34   :  { %v6100_v12 = vld [vmem:[#allocation2 + $0x648] sm:$0xf0]  ;;  %v7937_v17 = vld [vmem:[#allocation2 + $0x1c4] sm:$0xf0]  ;;  %v7994_v6 = vld [vmem:[#allocation2 + $0x394] sm:$0xf] }
  0x35   :  { %1714 = vmatpush.bf16.msrb.mxu1 %v6291_v41  ;;  %1740 = vmatpush.bf16.msrb.mxu3 %v6295_v46  ;;  %v6034_v18 = vld [vmem:[#allocation2 + $0x588] sm:$0xf]  ;;  %v6103_v20 = vor.u32 %v8073_v11, %v6100_v12  ;;  %v7929_v21 = vld [vmem:[#allocation2 + $0x18c] sm:$0xf]  ;;  %v5523_v25 = vor.u32 %v7937_v17, %v5522_v14  ;;  %v8122_v10 = vld [vmem:[#allocation2 + $0x794] sm:$0xf] }
  0x36   :  { %v8065_v19 = vld [vmem:[#allocation2 + $0x5c4] sm:$0xf0]  ;;  %v5524_v22 = vld [vmem:[#allocation2 + $0x1c8] sm:$0xf0]  ;;  %v6300_v11 = vld [vmem:[#allocation2 + $0x7d0] sm:$0xf0] }
  0x37   :  { %1702 = vmatpush.bf16.msrb.mxu0 %v5715_v52  ;;  %1728 = vmatpush.bf16.msrb.mxu2 %v5719_v54  ;;  %v8057_v23 = vld [vmem:[#allocation2 + $0x58c] sm:$0xf]  ;;  %v6035_v26 = vor.u32 %v8065_v19, %v6034_v18  ;;  %v73_v27 = vld.sshfl [vmem:[#allocation1] sm:$0xff pattern:$0x73625140]  ;;  %v5527_v29 = vor.u32 %v7929_v21, %v5524_v22  ;;  %v6303_v19 = vor.u32 %v8122_v10, %v6300_v11  ;;  %s8641_s0 = smov [#allocation8]  }
  0x38   :  { %v6036_v24 = vld [vmem:[#allocation2 + $0x5c8] sm:$0xf0]  ;;  %v74_v28 = vld.sshfl [vmem:[#allocation1 + $0x8] sm:$0xff pattern:$0x73625140]  ;;  %v8684_v33 = vpack.c.bf16 %v73_v27, %v73_v27  ;;  %s5303_s11 = sshll.u32 %s8641_s0, 4  ;;  %s5304_s11 = int_to_ptr.vmem [resolvable:$true] %s5303_s11 }
  0x39   :  { %1715 = vmatpush.bf16.msrb.mxu1 %v6227_v53  ;;  %1741 = vmatpush.bf16.msrb.mxu3 %v6231_v58  ;;  %v5458_v30 = vld [vmem:[#allocation2 + $0x108] sm:$0xf]  ;;  %v8686_v34 = vpack.c.bf16 %v74_v28, %v74_v28  ;;  %v6039_v35 = vor.u32 %v8057_v23, %v6036_v24  ;;  %v7913_v37 = vld [vmem:[#allocation2 + $0x10c] sm:$0xf]  ;;  %v7986_v17 = vld [vmem:[#allocation2 + $0x34c] sm:$0xf0] }
  0x3a   :  { %v7921_v31 = vld [vmem:[#allocation2 + $0x144] sm:$0xf0]  ;;  %v5460_v38 = vld [vmem:[#allocation2 + $0x148] sm:$0xf0]  ;;  %1683 = vmatmul.bf16.vlgmr.msra.gmra.mxu2 %v8684_v33  ;;  %1657 = vmatmul.bf16.vlgmr.msra.gmra.mxu0 %v8684_v33  ;;  %v6234_v18 = vld [vmem:[#allocation2 + $0x710] sm:$0xf] }
  0x3b   :  { %1703 = vmatpush.bf16.msrb.mxu0 %v5651_v0  ;;  %1729 = vmatpush.bf16.msrb.mxu2 %v5655_v4  ;;  %v5970_v32 = vld [vmem:[#allocation2 + $0x508] sm:$0xf]  ;;  %v8041_v39 = vld [vmem:[#allocation2 + $0x50c] sm:$0xf]  ;;  %v5459_v41 = vor.u32 %v7921_v31, %v5458_v30  ;;  %v5463_v43 = vor.u32 %v7913_v37, %v5460_v38  ;;  %v7978_v21 = vld [vmem:[#allocation2 + $0x314] sm:$0xf] }
  0x3c   :  { %v8049_v36 = vld [vmem:[#allocation2 + $0x544] sm:$0xf0]  ;;  %v5972_v40 = vld [vmem:[#allocation2 + $0x548] sm:$0xf0]  ;;  %1696 = vmatmul.bf16.vlgmr.msra.gmra.mxu3 %v8686_v34  ;;  %1670 = vmatmul.bf16.vlgmr.msra.gmra.mxu1 %v8686_v34  ;;  %v5724_v22 = vld [vmem:[#allocation2 + $0x350] sm:$0xf0] }
  0x3d   :  { %1716 = vmatpush.bf16.msrb.mxu1 %v6163_v3  ;;  %1742 = vmatpush.bf16.msrb.mxu3 %v6167_v7  ;;  %v5971_v42 = vor.u32 %v8049_v36, %v5970_v32  ;;  %v5394_v44 = vld [vmem:[#allocation2 + $0x88] sm:$0xf]  ;;  %v5975_v47 = vor.u32 %v8041_v39, %v5972_v40  ;;  %v7897_v49 = vld [vmem:[#allocation2 + $0x8c] sm:$0xf]  ;;  %v6298_v3 = vld [vmem:[#allocation2 + $0x790] sm:$0xf]  ;;  %v5727_v27 = vor.u32 %v7978_v21, %v5724_v22 }
  0x3e   :  { %v7905_v45 = vld [vmem:[#allocation2 + $0xc4] sm:$0xf0]  ;;  %v5396_v50 = vld [vmem:[#allocation2 + $0xc8] sm:$0xf0]  ;;  %v5788_v7 = vld [vmem:[#allocation2 + $0x3d0] sm:$0xf0]  ;;  %v6299_v14 = vor.u32 %v8130_v5, %v6298_v3 }
  0x3f   :  { %1704 = vmatpush.bf16.msrb.mxu0 %v5587_v13  ;;  %1730 = vmatpush.bf16.msrb.mxu2 %v5591_v16  ;;  %v5906_v46 = vld [vmem:[#allocation2 + $0x488] sm:$0xf]  ;;  %v8025_v51 = vld [vmem:[#allocation2 + $0x48c] sm:$0xf]  ;;  %v5395_v53 = vor.u32 %v7905_v45, %v5394_v44  ;;  %v5399_v57 = vor.u32 %v7897_v49, %v5396_v50  ;;  %v5787_v13 = vor.u32 %v8002_v2, %v5786_v1  ;;  %v5722_v16 = vld [vmem:[#allocation2 + $0x310] sm:$0xf] }
  0x40   :  { %v8033_v48 = vld [vmem:[#allocation2 + $0x4c4] sm:$0xf0]  ;;  %v5908_v52 = vld [vmem:[#allocation2 + $0x4c8] sm:$0xf0]  ;;  %v8106_v23 = vld [vmem:[#allocation2 + $0x714] sm:$0xf] }
  0x41   :  { %1717 = vmatpush.bf16.msrb.mxu1 %v6099_v15  ;;  %1743 = vmatpush.bf16.msrb.mxu3 %v6103_v20  ;;  %v5330_v54 = vld [vmem:[#allocation2 + $0x8] sm:$0xf]  ;;  %v5907_v56 = vor.u32 %v8033_v48, %v5906_v46  ;;  %v7881_v60 = vld [vmem:[#allocation2 + $0xc] sm:$0xf]  ;;  %v5911_v61 = vor.u32 %v8025_v51, %v5908_v52  ;;  %v5791_v15 = vor.u32 %v7994_v6, %v5788_v7  ;;  %v8114_v20 = vld [vmem:[#allocation2 + $0x74c] sm:$0xf0] }
  0x42   :  { %v7889_v55 = vld [vmem:[#allocation2 + $0x44] sm:$0xf0]  ;;  %v5332_v62 = vld [vmem:[#allocation2 + $0x48] sm:$0xf0]  ;;  %v6236_v24 = vld [vmem:[#allocation2 + $0x750] sm:$0xf0] }
  0x43   :  { %1705 = vmatpush.bf16.msrb.mxu0 %v5523_v25  ;;  %1731 = vmatpush.bf16.msrb.mxu2 %v5527_v29  ;;  %v5842_v58 = vld [vmem:[#allocation2 + $0x408] sm:$0xf]  ;;  %v8009_v63 = vld [vmem:[#allocation2 + $0x40c] sm:$0xf]  ;;  %v5331_v4 = vor.u32 %v7889_v55, %v5330_v54  ;;  %v5335_v9 = vor.u32 %v7881_v60, %v5332_v62  ;;  %v5723_v25 = vor.u32 %v7986_v17, %v5722_v16  ;;  %v5658_v28 = vld [vmem:[#allocation2 + $0x290] sm:$0xf] }
  0x44   :  { %v8017_v59 = vld [vmem:[#allocation2 + $0x444] sm:$0xf0]  ;;  %v5844_v0 = vld [vmem:[#allocation2 + $0x448] sm:$0xf0]  ;;  %v7970_v29 = vld [vmem:[#allocation2 + $0x2cc] sm:$0xf0]  ;;  %v6239_v31 = vor.u32 %v8106_v23, %v6236_v24 }
  0x45   :  { %1718 = vmatpush.bf16.msrb.mxu1 %v6035_v26  ;;  %1744 = vmatpush.bf16.msrb.mxu3 %v6039_v35  ;;  %v5843_v8 = vor.u32 %v8017_v59, %v5842_v58  ;;  %v5847_v12 = vor.u32 %v8009_v63, %v5844_v0  ;;  %v6235_v26 = vor.u32 %v8114_v20, %v6234_v18  ;;  %v6170_v30 = vld [vmem:[#allocation2 + $0x690] sm:$0xf]  ;;  %v7962_v35 = vld [vmem:[#allocation2 + $0x294] sm:$0xf] }
  0x46   :  { %v8098_v32 = vld [vmem:[#allocation2 + $0x6cc] sm:$0xf0]  ;;  %v5660_v36 = vld [vmem:[#allocation2 + $0x2d0] sm:$0xf0]  ;;  %v5659_v39 = vor.u32 %v7970_v29, %v5658_v28 }
  0x47   :  { %1706 = vmatpush.bf16.msrb.mxu0 %v5459_v41  ;;  %1732 = vmatpush.bf16.msrb.mxu2 %v5463_v43  ;;  %v8090_v37 = vld [vmem:[#allocation2 + $0x694] sm:$0xf]  ;;  %v6171_v40 = vor.u32 %v8098_v32, %v6170_v30  ;;  %v5663_v41 = vor.u32 %v7962_v35, %v5660_v36  ;;  %v7954_v43 = vld [vmem:[#allocation2 + $0x24c] sm:$0xf0] }
  0x48   :  { %v6172_v38 = vld [vmem:[#allocation2 + $0x6d0] sm:$0xf0]  ;;  %v6106_v44 = vld [vmem:[#allocation2 + $0x610] sm:$0xf] }
  0x49   :  { %1719 = vmatpush.bf16.msrb.mxu1 %v5971_v42  ;;  %1745 = vmatpush.bf16.msrb.mxu3 %v5975_v47  ;;  %v5594_v42 = vld [vmem:[#allocation2 + $0x210] sm:$0xf]  ;;  %v6175_v45 = vor.u32 %v8090_v37, %v6172_v38  ;;  %v7946_v47 = vld [vmem:[#allocation2 + $0x214] sm:$0xf]  ;;  %v5794_v37 = vld [vmem:[#allocation2 + $0x398] sm:$0xf] }
  0x4a   :  { %v8082_v46 = vld [vmem:[#allocation2 + $0x64c] sm:$0xf0]  ;;  %v5596_v48 = vld [vmem:[#allocation2 + $0x250] sm:$0xf0]  ;;  %v5595_v51 = vor.u32 %v7954_v43, %v5594_v42  ;;  %v8003_v38 = vld [vmem:[#allocation2 + $0x3d4] sm:$0xf0] }
  0x4b   :  { %1707 = vmatpush.bf16.msrb.mxu0 %v5395_v53  ;;  %1733 = vmatpush.bf16.msrb.mxu2 %v5399_v57  ;;  %v8074_v49 = vld [vmem:[#allocation2 + $0x614] sm:$0xf]  ;;  %v6107_v52 = vor.u32 %v8082_v46, %v6106_v44  ;;  %v5599_v53 = vor.u32 %v7946_v47, %v5596_v48  ;;  %v5530_v54 = vld [vmem:[#allocation2 + $0x190] sm:$0xf]  ;;  %v7995_v42 = vld [vmem:[#allocation2 + $0x39c] sm:$0xf] }
  0x4c   :  { %v6108_v50 = vld [vmem:[#allocation2 + $0x650] sm:$0xf0]  ;;  %v7938_v55 = vld [vmem:[#allocation2 + $0x1cc] sm:$0xf0]  ;;  %v5796_v43 = vld [vmem:[#allocation2 + $0x3d8] sm:$0xf0] }
  0x4d   :  { %1720 = vmatpush.bf16.msrb.mxu1 %v5907_v56  ;;  %1746 = vmatpush.bf16.msrb.mxu3 %v5911_v61  ;;  %v6042_v56 = vld [vmem:[#allocation2 + $0x590] sm:$0xf]  ;;  %v6111_v57 = vor.u32 %v8074_v49, %v6108_v50  ;;  %v7930_v59 = vld [vmem:[#allocation2 + $0x194] sm:$0xf]  ;;  %v5531_v63 = vor.u32 %v7938_v55, %v5530_v54  ;;  %v8123_v46 = vld [vmem:[#allocation2 + $0x79c] sm:$0xf]  ;;  %v5795_v49 = vor.u32 %v8003_v38, %v5794_v37 }
  0x4e   :  { %v8066_v58 = vld [vmem:[#allocation2 + $0x5cc] sm:$0xf0]  ;;  %v5532_v60 = vld [vmem:[#allocation2 + $0x1d0] sm:$0xf0]  ;;  %v6308_v47 = vld [vmem:[#allocation2 + $0x7d8] sm:$0xf0] }
  0x4f   :  { %1708 = vmatpush.bf16.msrb.mxu0 %v5331_v4  ;;  %1734 = vmatpush.bf16.msrb.mxu2 %v5335_v9  ;;  %v8058_v61 = vld [vmem:[#allocation2 + $0x594] sm:$0xf]  ;;  %v6043_v0 = vor.u32 %v8066_v58, %v6042_v56  ;;  %v5535_v1 = vor.u32 %v7930_v59, %v5532_v60  ;;  %v5466_v2 = vld [vmem:[#allocation2 + $0x110] sm:$0xf]  ;;  %v6242_v54 = vld [vmem:[#allocation2 + $0x718] sm:$0xf]  ;;  %v6311_v55 = vor.u32 %v8123_v46, %v6308_v47 }
  0x50   :  { %v6044_v62 = vld [vmem:[#allocation2 + $0x5d0] sm:$0xf0]  ;;  %v7922_v3 = vld [vmem:[#allocation2 + $0x14c] sm:$0xf0]  ;;  %v8115_v56 = vld [vmem:[#allocation2 + $0x754] sm:$0xf0] }
  0x51   :  { %1721 = vmatpush.bf16.msrb.mxu1 %v5843_v8  ;;  %1747 = vmatpush.bf16.msrb.mxu3 %v5847_v12  ;;  %v5978_v4 = vld [vmem:[#allocation2 + $0x510] sm:$0xf]  ;;  %v6047_v5 = vor.u32 %v8058_v61, %v6044_v62  ;;  %v7914_v7 = vld [vmem:[#allocation2 + $0x114] sm:$0xf]  ;;  %v5467_v11 = vor.u32 %v7922_v3, %v5466_v2  ;;  %v5732_v58 = vld [vmem:[#allocation2 + $0x358] sm:$0xf0]  ;;  %v6243_v62 = vor.u32 %v8115_v56, %v6242_v54 }
  0x52   :  { %1735 = vmatmul.bf16.vlgmr.msrb.gmra.mxu2 %v8684_v33  ;;  %1709 = vmatmul.bf16.vlgmr.msrb.gmra.mxu0 %v8684_v33  ;;  %v8050_v6 = vld [vmem:[#allocation2 + $0x54c] sm:$0xf0]  ;;  %v5468_v8 = vld [vmem:[#allocation2 + $0x150] sm:$0xf0]  ;;  %v8107_v59 = vld [vmem:[#allocation2 + $0x71c] sm:$0xf] }
  0x53   :  { %1753 = vmatpush.bf16.msra.mxu0 %v5787_v13  ;;  %1779 = vmatpush.bf16.msra.mxu2 %v5791_v15  ;;  %v8042_v9 = vld [vmem:[#allocation2 + $0x514] sm:$0xf]  ;;  %v5979_v12 = vor.u32 %v8050_v6, %v5978_v4  ;;  %v5471_v13 = vor.u32 %v7914_v7, %v5468_v8  ;;  %v7906_v15 = vld [vmem:[#allocation2 + $0xcc] sm:$0xf0]  ;;  %v6244_v60 = vld [vmem:[#allocation2 + $0x758] sm:$0xf0] }
  0x54   :  { %1748 = vmatmul.bf16.vlgmr.msrb.gmra.mxu3 %v8686_v34  ;;  %1722 = vmatmul.bf16.vlgmr.msrb.gmra.mxu1 %v8686_v34  ;;  %v5980_v10 = vld [vmem:[#allocation2 + $0x550] sm:$0xf0]  ;;  %v5914_v16 = vld [vmem:[#allocation2 + $0x490] sm:$0xf]  ;;  %v6178_v2 = vld [vmem:[#allocation2 + $0x698] sm:$0xf]  ;;  %v6247_v3 = vor.u32 %v8107_v59, %v6244_v60 }
  0x55   :  { %1766 = vmatpush.bf16.msra.mxu1 %v6299_v14  ;;  %1792 = vmatpush.bf16.msra.mxu3 %v6303_v19  ;;  %v5402_v14 = vld [vmem:[#allocation2 + $0x90] sm:$0xf]  ;;  %v5983_v17 = vor.u32 %v8042_v9, %v5980_v10  ;;  %v7898_v19 = vld [vmem:[#allocation2 + $0x94] sm:$0xf]  ;;  %v8099_v4 = vld [vmem:[#allocation2 + $0x6d4] sm:$0xf0] }
  0x56   :  { %v8034_v18 = vld [vmem:[#allocation2 + $0x4cc] sm:$0xf0]  ;;  %v5404_v20 = vld [vmem:[#allocation2 + $0xd0] sm:$0xf0]  ;;  %v5403_v23 = vor.u32 %v7906_v15, %v5402_v14  ;;  %v5668_v6 = vld [vmem:[#allocation2 + $0x2d8] sm:$0xf0]  ;;  %v6179_v10 = vor.u32 %v8099_v4, %v6178_v2 }
  0x57   :  { %1754 = vmatpush.bf16.msra.mxu0 %v5723_v25  ;;  %1780 = vmatpush.bf16.msra.mxu2 %v5727_v27  ;;  %v8026_v21 = vld [vmem:[#allocation2 + $0x494] sm:$0xf]  ;;  %v5338_v24 = vld [vmem:[#allocation2 + $0x10] sm:$0xf]  ;;  %v5407_v27 = vor.u32 %v7898_v19, %v5404_v20  ;;  %v8091_v7 = vld [vmem:[#allocation2 + $0x69c] sm:$0xf] }
  0x58   :  { %v5916_v22 = vld [vmem:[#allocation2 + $0x4d0] sm:$0xf0]  ;;  %v7890_v25 = vld [vmem:[#allocation2 + $0x4c] sm:$0xf0]  ;;  %v6180_v8 = vld [vmem:[#allocation2 + $0x6d8] sm:$0xf0] }
  0x59   :  { %1767 = vmatpush.bf16.msra.mxu1 %v6235_v26  ;;  %1793 = vmatpush.bf16.msra.mxu3 %v6239_v31  ;;  %v5915_v26 = vor.u32 %v8034_v18, %v5914_v16  ;;  %v5850_v28 = vld [vmem:[#allocation2 + $0x410] sm:$0xf]  ;;  %v7882_v30 = vld [vmem:[#allocation2 + $0x14] sm:$0xf]  ;;  %v5919_v31 = vor.u32 %v8026_v21, %v5916_v22  ;;  %v6114_v14 = vld [vmem:[#allocation2 + $0x618] sm:$0xf]  ;;  %v6183_v15 = vor.u32 %v8091_v7, %v6180_v8 }
  0x5a   :  { %v8018_v29 = vld [vmem:[#allocation2 + $0x44c] sm:$0xf0]  ;;  %v5340_v32 = vld [vmem:[#allocation2 + $0x50] sm:$0xf0]  ;;  %v8083_v16 = vld [vmem:[#allocation2 + $0x654] sm:$0xf0] }
  0x5b   :  { %1755 = vmatpush.bf16.msra.mxu0 %v5659_v39  ;;  %1781 = vmatpush.bf16.msra.mxu2 %v5663_v41  ;;  %v8010_v35 = vld [vmem:[#allocation2 + $0x414] sm:$0xf]  ;;  %v6306_v39 = vld [vmem:[#allocation2 + $0x798] sm:$0xf]  ;;  %v5851_v44 = vor.u32 %v8018_v29, %v5850_v28  ;;  %v5604_v18 = vld [vmem:[#allocation2 + $0x258] sm:$0xf0]  ;;  %v6115_v22 = vor.u32 %v8083_v16, %v6114_v14 }
  0x5c   :  { %v5852_v36 = vld [vmem:[#allocation2 + $0x450] sm:$0xf0]  ;;  %v8131_v41 = vld [vmem:[#allocation2 + $0x7d4] sm:$0xf0]  ;;  %v8075_v19 = vld [vmem:[#allocation2 + $0x61c] sm:$0xf] }
  0x5d   :  { %1768 = vmatpush.bf16.msra.mxu1 %v6171_v40  ;;  %1794 = vmatpush.bf16.msra.mxu3 %v6175_v45  ;;  %v5339_v40 = vor.u32 %v7890_v25, %v5338_v24  ;;  %v5343_v45 = vor.u32 %v7882_v30, %v5340_v32  ;;  %v5855_v48 = vor.u32 %v8010_v35, %v5852_v36  ;;  %v6116_v20 = vld [vmem:[#allocation2 + $0x658] sm:$0xf0]  ;;  %v5538_v24 = vld [vmem:[#allocation2 + $0x198] sm:$0xf]  ;;  %v5802_v7 = vld [vmem:[#allocation2 + $0x3a0] sm:$0xf] }
  0x5e   :  { %v6307_v50 = vor.u32 %v8131_v41, %v6306_v39  ;;  %v7939_v25 = vld [vmem:[#allocation2 + $0x1d4] sm:$0xf0]  ;;  %v7931_v29 = vld [vmem:[#allocation2 + $0x19c] sm:$0xf]  ;;  %v8004_v8 = vld [vmem:[#allocation2 + $0x3dc] sm:$0xf0] }
  0x5f   :  { %1756 = vmatpush.bf16.msra.mxu0 %v5595_v51  ;;  %1782 = vmatpush.bf16.msra.mxu2 %v5599_v53  ;;  %v5799_v51 = vor.u32 %v7995_v42, %v5796_v43  ;;  %v7987_v53 = vld [vmem:[#allocation2 + $0x354] sm:$0xf0]  ;;  %v5540_v30 = vld [vmem:[#allocation2 + $0x1d8] sm:$0xf0]  ;;  %v5539_v35 = vor.u32 %v7939_v25, %v5538_v24  ;;  %v8124_v16 = vld [vmem:[#allocation2 + $0x7a4] sm:$0xf] }
  0x60   :  { %v8067_v28 = vld [vmem:[#allocation2 + $0x5d4] sm:$0xf0]  ;;  %v6052_v32 = vld [vmem:[#allocation2 + $0x5d8] sm:$0xf0]  ;;  %v5543_v37 = vor.u32 %v7931_v29, %v5540_v30  ;;  %v6250_v24 = vld [vmem:[#allocation2 + $0x720] sm:$0xf] }
  0x61   :  { %1769 = vmatpush.bf16.msra.mxu1 %v6107_v52  ;;  %1795 = vmatpush.bf16.msra.mxu3 %v6111_v57  ;;  %v5730_v52 = vld [vmem:[#allocation2 + $0x318] sm:$0xf]  ;;  %v7979_v57 = vld [vmem:[#allocation2 + $0x31c] sm:$0xf]  ;;  %v8108_v29 = vld [vmem:[#allocation2 + $0x724] sm:$0xf] }
  0x62   :  { %v5731_v61 = vor.u32 %v7987_v53, %v5730_v52  ;;  %v5474_v38 = vld [vmem:[#allocation2 + $0x118] sm:$0xf]  ;;  %v7915_v43 = vld [vmem:[#allocation2 + $0x11c] sm:$0xf]  ;;  %v6252_v30 = vld [vmem:[#allocation2 + $0x760] sm:$0xf0] }
  0x63   :  { %1757 = vmatpush.bf16.msra.mxu0 %v5531_v63  ;;  %1783 = vmatpush.bf16.msra.mxu2 %v5535_v1  ;;  %v5735_v63 = vor.u32 %v7979_v57, %v5732_v58  ;;  %v7971_v1 = vld [vmem:[#allocation2 + $0x2d4] sm:$0xf0]  ;;  %v5988_v46 = vld [vmem:[#allocation2 + $0x558] sm:$0xf0] }
  0x64   :  { %v7923_v39 = vld [vmem:[#allocation2 + $0x154] sm:$0xf0]  ;;  %v5412_v56 = vld [vmem:[#allocation2 + $0xd8] sm:$0xf0] }
  0x65   :  { %1770 = vmatpush.bf16.msra.mxu1 %v6043_v0  ;;  %1796 = vmatpush.bf16.msra.mxu3 %v6047_v5  ;;  %v5666_v0 = vld [vmem:[#allocation2 + $0x298] sm:$0xf]  ;;  %v7963_v5 = vld [vmem:[#allocation2 + $0x29c] sm:$0xf]  ;;  %v5475_v47 = vor.u32 %v7923_v39, %v5474_v38  ;;  %v6186_v38 = vld [vmem:[#allocation2 + $0x6a0] sm:$0xf]  ;;  %v6255_v39 = vor.u32 %v8108_v29, %v6252_v30 }
  0x66   :  { %v5667_v9 = vor.u32 %v7971_v1, %v5666_v0  ;;  %v8051_v42 = vld [vmem:[#allocation2 + $0x554] sm:$0xf0]  ;;  %v8027_v57 = vld [vmem:[#allocation2 + $0x49c] sm:$0xf]  ;;  %v5354_v30 = vld [vmem:[#allocation2 + $0x20] sm:$0xf] }
  0x67   :  { %1758 = vmatpush.bf16.msra.mxu0 %v5467_v11  ;;  %1784 = vmatpush.bf16.msra.mxu2 %v5471_v13  ;;  %v5671_v11 = vor.u32 %v7963_v5, %v5668_v6  ;;  %v7955_v13 = vld [vmem:[#allocation2 + $0x254] sm:$0xf0]  ;;  %v5924_v58 = vld [vmem:[#allocation2 + $0x4d8] sm:$0xf0] }
  0x68   :  { %v5922_v52 = vld [vmem:[#allocation2 + $0x498] sm:$0xf]  ;;  %v7883_v2 = vld [vmem:[#allocation2 + $0x1c] sm:$0xf] }
  0x69   :  { %1771 = vmatpush.bf16.msra.mxu1 %v5979_v12  ;;  %1797 = vmatpush.bf16.msra.mxu3 %v5983_v17  ;;  %v5602_v12 = vld [vmem:[#allocation2 + $0x218] sm:$0xf]  ;;  %v7947_v17 = vld [vmem:[#allocation2 + $0x21c] sm:$0xf] }
  0x6a   :  { %v5603_v21 = vor.u32 %v7955_v13, %v5602_v12  ;;  %v8035_v54 = vld [vmem:[#allocation2 + $0x4d4] sm:$0xf0]  ;;  %v5348_v4 = vld [vmem:[#allocation2 + $0x58] sm:$0xf0]  ;;  %v7996_v12 = vld [vmem:[#allocation2 + $0x3a4] sm:$0xf] }
  0x6b   :  { %1759 = vmatpush.bf16.msra.mxu0 %v5403_v23  ;;  %1785 = vmatpush.bf16.msra.mxu2 %v5407_v27  ;;  %v5607_v23 = vor.u32 %v7947_v17, %v5604_v18  ;;  %v6119_v27 = vor.u32 %v8075_v19, %v6116_v20  ;;  %v5346_v60 = vld [vmem:[#allocation2 + $0x18] sm:$0xf]  ;;  %v8011_v5 = vld [vmem:[#allocation2 + $0x41c] sm:$0xf]  ;;  %v5804_v13 = vld [vmem:[#allocation2 + $0x3e0] sm:$0xf0]  ;;  %v5803_v19 = vor.u32 %v8004_v8, %v5802_v7 }
  0x6c   :  { %v5858_v0 = vld [vmem:[#allocation2 + $0x418] sm:$0xf]  ;;  %v5860_v6 = vld [vmem:[#allocation2 + $0x458] sm:$0xf0]  ;;  %v6316_v17 = vld [vmem:[#allocation2 + $0x7e0] sm:$0xf0] }
  0x6d   :  { %1772 = vmatpush.bf16.msra.mxu1 %v5915_v26  ;;  %1798 = vmatpush.bf16.msra.mxu3 %v5919_v31  ;;  %v6050_v26 = vld [vmem:[#allocation2 + $0x598] sm:$0xf]  ;;  %v8059_v31 = vld [vmem:[#allocation2 + $0x59c] sm:$0xf]  ;;  %v5863_v18 = vor.u32 %v8011_v5, %v5860_v6  ;;  %v6319_v25 = vor.u32 %v8124_v16, %v6316_v17  ;;  %v5482_v8 = vld [vmem:[#allocation2 + $0x120] sm:$0xf] }
  0x6e   :  { %v6051_v36 = vor.u32 %v8067_v28, %v6050_v26  ;;  %v6055_v41 = vor.u32 %v8059_v31, %v6052_v32  ;;  %v8019_v1 = vld [vmem:[#allocation2 + $0x454] sm:$0xf0]  ;;  %v8116_v26 = vld [vmem:[#allocation2 + $0x75c] sm:$0xf0]  ;;  %v5740_v28 = vld [vmem:[#allocation2 + $0x360] sm:$0xf0] }
  0x6f   :  { %1760 = vmatpush.bf16.msra.mxu0 %v5339_v40  ;;  %1786 = vmatpush.bf16.msra.mxu2 %v5343_v45  ;;  %v5986_v40 = vld [vmem:[#allocation2 + $0x518] sm:$0xf]  ;;  %v8043_v45 = vld [vmem:[#allocation2 + $0x51c] sm:$0xf]  ;;  %v5859_v14 = vor.u32 %v8019_v1, %v5858_v0  ;;  %v6251_v32 = vor.u32 %v8116_v26, %v6250_v24  ;;  %v8068_v0 = vld [vmem:[#allocation2 + $0x5dc] sm:$0xf0] }
  0x70   :  { %v5991_v53 = vor.u32 %v8043_v45, %v5988_v46  ;;  %v7932_v1 = vld [vmem:[#allocation2 + $0x1a4] sm:$0xf]  ;;  %v8036_v24 = vld [vmem:[#allocation2 + $0x4dc] sm:$0xf0] }
  0x71   :  { %1773 = vmatpush.bf16.msra.mxu1 %v5851_v44  ;;  %1799 = vmatpush.bf16.msra.mxu3 %v5855_v48  ;;  %v5476_v44 = vld [vmem:[#allocation2 + $0x158] sm:$0xf0]  ;;  %v5987_v48 = vor.u32 %v8051_v42, %v5986_v40  ;;  %v8100_v40 = vld [vmem:[#allocation2 + $0x6dc] sm:$0xf0]  ;;  %v5676_v42 = vld [vmem:[#allocation2 + $0x2e0] sm:$0xf0] }
  0x72   :  { %1787 = vmatmul.bf16.vlgmr.msra.gmra.mxu2 %v8684_v33  ;;  %1761 = vmatmul.bf16.vlgmr.msra.gmra.mxu0 %v8684_v33  ;;  %v6187_v46 = vor.u32 %v8100_v40, %v6186_v38  ;;  %v5996_v16 = vld [vmem:[#allocation2 + $0x560] sm:$0xf0] }
  0x73   :  { %1805 = vmatpush.bf16.msrb.mxu0 %v5795_v49  ;;  %1831 = vmatpush.bf16.msrb.mxu2 %v5799_v51  ;;  %v5479_v49 = vor.u32 %v7915_v43, %v5476_v44  ;;  %v7907_v51 = vld [vmem:[#allocation2 + $0xd4] sm:$0xf0]  ;;  %v8092_v43 = vld [vmem:[#allocation2 + $0x6a4] sm:$0xf] }
  0x74   :  { %1800 = vmatmul.bf16.vlgmr.msra.gmra.mxu3 %v8686_v34  ;;  %1774 = vmatmul.bf16.vlgmr.msra.gmra.mxu1 %v8686_v34  ;;  %v6188_v44 = vld [vmem:[#allocation2 + $0x6e0] sm:$0xf0] }
  0x75   :  { %1818 = vmatpush.bf16.msrb.mxu1 %v6307_v50  ;;  %1844 = vmatpush.bf16.msrb.mxu3 %v6311_v55  ;;  %v5410_v50 = vld [vmem:[#allocation2 + $0x98] sm:$0xf]  ;;  %v7899_v55 = vld [vmem:[#allocation2 + $0x9c] sm:$0xf]  ;;  %v5420_v26 = vld [vmem:[#allocation2 + $0xe0] sm:$0xf0] }
  0x76   :  { %v5411_v59 = vor.u32 %v7907_v51, %v5410_v50  ;;  %v6122_v50 = vld [vmem:[#allocation2 + $0x620] sm:$0xf]  ;;  %v6191_v51 = vor.u32 %v8092_v43, %v6188_v44  ;;  %v7884_v38 = vld [vmem:[#allocation2 + $0x24] sm:$0xf]  ;;  %v5810_v43 = vld [vmem:[#allocation2 + $0x3a8] sm:$0xf] }
  0x77   :  { %1806 = vmatpush.bf16.msrb.mxu0 %v5731_v61  ;;  %1832 = vmatpush.bf16.msrb.mxu2 %v5735_v63  ;;  %v7891_v61 = vld [vmem:[#allocation2 + $0x54] sm:$0xf0]  ;;  %v5415_v63 = vor.u32 %v7899_v55, %v5412_v56  ;;  %v8076_v55 = vld [vmem:[#allocation2 + $0x624] sm:$0xf]  ;;  %v8005_v44 = vld [vmem:[#allocation2 + $0x3e4] sm:$0xf0] }
  0x78   :  { %v6124_v56 = vld [vmem:[#allocation2 + $0x660] sm:$0xf0] }
  0x79   :  { %1819 = vmatpush.bf16.msrb.mxu1 %v6243_v62  ;;  %1845 = vmatpush.bf16.msrb.mxu3 %v6247_v3  ;;  %v5923_v62 = vor.u32 %v8035_v54, %v5922_v52  ;;  %v5927_v3 = vor.u32 %v8027_v57, %v5924_v58  ;;  %v8084_v52 = vld [vmem:[#allocation2 + $0x65c] sm:$0xf0]  ;;  %v5612_v54 = vld [vmem:[#allocation2 + $0x260] sm:$0xf0] }
  0x7a   :  { %v6123_v58 = vor.u32 %v8084_v52, %v6122_v50  ;;  %v5356_v40 = vld [vmem:[#allocation2 + $0x60] sm:$0xf0]  ;;  %v8125_v52 = vld [vmem:[#allocation2 + $0x7ac] sm:$0xf] }
  0x7b   :  { %1807 = vmatpush.bf16.msrb.mxu0 %v5667_v9  ;;  %1833 = vmatpush.bf16.msrb.mxu2 %v5671_v11  ;;  %v6314_v9 = vld [vmem:[#allocation2 + $0x7a0] sm:$0xf] }
  0x7c   :  { %v8132_v11 = vld [vmem:[#allocation2 + $0x7dc] sm:$0xf0] }
  0x7d   :  { %1820 = vmatpush.bf16.msrb.mxu1 %v6179_v10  ;;  %1846 = vmatpush.bf16.msrb.mxu3 %v6183_v15  ;;  %v5347_v10 = vor.u32 %v7891_v61, %v5346_v60  ;;  %v5351_v15 = vor.u32 %v7883_v2, %v5348_v4  ;;  %v6315_v20 = vor.u32 %v8132_v11, %v6314_v9  ;;  %v5546_v60 = vld [vmem:[#allocation2 + $0x1a0] sm:$0xf]  ;;  %v5548_v2 = vld [vmem:[#allocation2 + $0x1e0] sm:$0xf0] }
  0x7e   :  { %v7940_v61 = vld [vmem:[#allocation2 + $0x1dc] sm:$0xf0]  ;;  %v6060_v4 = vld [vmem:[#allocation2 + $0x5e0] sm:$0xf0]  ;;  %v5551_v7 = vor.u32 %v7932_v1, %v5548_v2  ;;  %v8109_v1 = vld [vmem:[#allocation2 + $0x72c] sm:$0xf] }
  0x7f   :  { %1808 = vmatpush.bf16.msrb.mxu0 %v5603_v21  ;;  %1834 = vmatpush.bf16.msrb.mxu2 %v5607_v23  ;;  %v5807_v21 = vor.u32 %v7996_v12, %v5804_v13  ;;  %v7988_v23 = vld [vmem:[#allocation2 + $0x35c] sm:$0xf0]  ;;  %v5547_v5 = vor.u32 %v7940_v61, %v5546_v60  ;;  %v7916_v13 = vld [vmem:[#allocation2 + $0x124] sm:$0xf]  ;;  %v6258_v60 = vld [vmem:[#allocation2 + $0x728] sm:$0xf] }
  0x80   :  { %v7924_v9 = vld [vmem:[#allocation2 + $0x15c] sm:$0xf0]  ;;  %v6260_v2 = vld [vmem:[#allocation2 + $0x768] sm:$0xf0] }
  0x81   :  { %1821 = vmatpush.bf16.msrb.mxu1 %v6115_v22  ;;  %1847 = vmatpush.bf16.msrb.mxu3 %v6119_v27  ;;  %v5738_v22 = vld [vmem:[#allocation2 + $0x320] sm:$0xf]  ;;  %v7980_v27 = vld [vmem:[#allocation2 + $0x324] sm:$0xf]  ;;  %v5483_v17 = vor.u32 %v7924_v9, %v5482_v8  ;;  %v6194_v8 = vld [vmem:[#allocation2 + $0x6a8] sm:$0xf]  ;;  %v6263_v9 = vor.u32 %v8109_v1, %v6260_v2 }
  0x82   :  { %v5739_v31 = vor.u32 %v7988_v23, %v5738_v22  ;;  %v8052_v12 = vld [vmem:[#allocation2 + $0x55c] sm:$0xf0]  ;;  %v8029_v1 = vld [vmem:[#allocation2 + $0x4ac] sm:$0xf] }
  0x83   :  { %1809 = vmatpush.bf16.msrb.mxu0 %v5539_v35  ;;  %1835 = vmatpush.bf16.msrb.mxu2 %v5543_v37  ;;  %v5743_v35 = vor.u32 %v7980_v27, %v5740_v28  ;;  %v7972_v37 = vld [vmem:[#allocation2 + $0x2dc] sm:$0xf0]  ;;  %v8028_v27 = vld [vmem:[#allocation2 + $0x4a4] sm:$0xf]  ;;  %v5940_v2 = vld [vmem:[#allocation2 + $0x4e8] sm:$0xf0] }
  0x84   :  { %v5930_v22 = vld [vmem:[#allocation2 + $0x4a0] sm:$0xf]  ;;  %v5932_v28 = vld [vmem:[#allocation2 + $0x4e0] sm:$0xf0] }
  0x85   :  { %1822 = vmatpush.bf16.msrb.mxu1 %v6051_v36  ;;  %1848 = vmatpush.bf16.msrb.mxu3 %v6055_v41  ;;  %v5674_v36 = vld [vmem:[#allocation2 + $0x2a0] sm:$0xf]  ;;  %v7964_v41 = vld [vmem:[#allocation2 + $0x2a4] sm:$0xf] }
  0x86   :  { %v5675_v45 = vor.u32 %v7972_v37, %v5674_v36  ;;  %v5866_v36 = vld [vmem:[#allocation2 + $0x420] sm:$0xf] }
  0x87   :  { %1810 = vmatpush.bf16.msrb.mxu0 %v5475_v47  ;;  %1836 = vmatpush.bf16.msrb.mxu2 %v5479_v49  ;;  %v5679_v47 = vor.u32 %v7964_v41, %v5676_v42  ;;  %v7956_v49 = vld [vmem:[#allocation2 + $0x25c] sm:$0xf0]  ;;  %v8012_v41 = vld [vmem:[#allocation2 + $0x424] sm:$0xf] }
  0x88   :  { %v8020_v37 = vld [vmem:[#allocation2 + $0x45c] sm:$0xf0]  ;;  %v5868_v42 = vld [vmem:[#allocation2 + $0x460] sm:$0xf0] }
  0x89   :  { %1823 = vmatpush.bf16.msrb.mxu1 %v5987_v48  ;;  %1849 = vmatpush.bf16.msrb.mxu3 %v5991_v53  ;;  %v5610_v48 = vld [vmem:[#allocation2 + $0x220] sm:$0xf]  ;;  %v7948_v53 = vld [vmem:[#allocation2 + $0x224] sm:$0xf]  ;;  %v5867_v50 = vor.u32 %v8020_v37, %v5866_v36  ;;  %v8069_v36 = vld [vmem:[#allocation2 + $0x5e4] sm:$0xf0] }
  0x8a   :  { %v5611_v57 = vor.u32 %v7956_v49, %v5610_v48  ;;  %v7997_v48 = vld [vmem:[#allocation2 + $0x3ac] sm:$0xf] }
  0x8b   :  { %1811 = vmatpush.bf16.msrb.mxu0 %v5411_v59  ;;  %1837 = vmatpush.bf16.msrb.mxu2 %v5415_v63  ;;  %v5615_v59 = vor.u32 %v7948_v53, %v5612_v54  ;;  %v6127_v63 = vor.u32 %v8076_v55, %v6124_v56  ;;  %v5812_v49 = vld [vmem:[#allocation2 + $0x3e8] sm:$0xf0]  ;;  %v5871_v54 = vor.u32 %v8012_v41, %v5868_v42  ;;  %v5490_v42 = vld [vmem:[#allocation2 + $0x128] sm:$0xf] }
  0x8c   :  { %v6324_v53 = vld [vmem:[#allocation2 + $0x7e8] sm:$0xf0]  ;;  %v5811_v55 = vor.u32 %v8005_v44, %v5810_v43 }
  0x8d   :  { %1824 = vmatpush.bf16.msrb.mxu1 %v5923_v62  ;;  %1850 = vmatpush.bf16.msrb.mxu3 %v5927_v3  ;;  %v6058_v62 = vld [vmem:[#allocation2 + $0x5a0] sm:$0xf]  ;;  %v8060_v3 = vld [vmem:[#allocation2 + $0x5a4] sm:$0xf]  ;;  %v6327_v61 = vor.u32 %v8125_v52, %v6324_v53  ;;  %v7933_v37 = vld [vmem:[#allocation2 + $0x1ac] sm:$0xf] }
  0x8e   :  { %v6059_v6 = vor.u32 %v8068_v0, %v6058_v62  ;;  %v6063_v11 = vor.u32 %v8060_v3, %v6060_v4  ;;  %v8117_v62 = vld [vmem:[#allocation2 + $0x764] sm:$0xf0]  ;;  %v5748_v0 = vld [vmem:[#allocation2 + $0x368] sm:$0xf0] }
  0x8f   :  { %1812 = vmatpush.bf16.msrb.mxu0 %v5347_v10  ;;  %1838 = vmatpush.bf16.msrb.mxu2 %v5351_v15  ;;  %v5994_v10 = vld [vmem:[#allocation2 + $0x520] sm:$0xf]  ;;  %v8044_v15 = vld [vmem:[#allocation2 + $0x524] sm:$0xf]  ;;  %v6259_v4 = vor.u32 %v8117_v62, %v6258_v60  ;;  %v8045_v52 = vld [vmem:[#allocation2 + $0x52c] sm:$0xf] }
  0x90   :  { %v5999_v23 = vor.u32 %v8044_v15, %v5996_v16  ;;  %v6004_v53 = vld [vmem:[#allocation2 + $0x568] sm:$0xf0]  ;;  %v8037_v62 = vld [vmem:[#allocation2 + $0x4e4] sm:$0xf0] }
  0x91   :  { %1825 = vmatpush.bf16.msrb.mxu1 %v5859_v14  ;;  %1851 = vmatpush.bf16.msrb.mxu3 %v5863_v18  ;;  %v5484_v14 = vld [vmem:[#allocation2 + $0x160] sm:$0xf0]  ;;  %v5995_v18 = vor.u32 %v8052_v12, %v5994_v10  ;;  %v8101_v10 = vld [vmem:[#allocation2 + $0x6e4] sm:$0xf0]  ;;  %v5684_v12 = vld [vmem:[#allocation2 + $0x2e8] sm:$0xf0] }
  0x92   :  { %1839 = vmatmul.bf16.vlgmr.msrb.gmra.mxu2 %v8684_v33  ;;  %1813 = vmatmul.bf16.vlgmr.msrb.gmra.mxu0 %v8684_v33  ;;  %v6195_v16 = vor.u32 %v8101_v10, %v6194_v8  ;;  %v8021_v10 = vld [vmem:[#allocation2 + $0x464] sm:$0xf0] }
  0x93   :  { %1857 = vmatpush.bf16.msra.mxu0 %v5803_v19  ;;  %1883 = vmatpush.bf16.msra.mxu2 %v5807_v21  ;;  %v5487_v19 = vor.u32 %v7916_v13, %v5484_v14  ;;  %v7908_v21 = vld [vmem:[#allocation2 + $0xdc] sm:$0xf0]  ;;  %v8093_v13 = vld [vmem:[#allocation2 + $0x6ac] sm:$0xf] }
  0x94   :  { %1852 = vmatmul.bf16.vlgmr.msrb.gmra.mxu3 %v8686_v34  ;;  %1826 = vmatmul.bf16.vlgmr.msrb.gmra.mxu1 %v8686_v34  ;;  %v6196_v14 = vld [vmem:[#allocation2 + $0x6e8] sm:$0xf0] }
  0x95   :  { %1870 = vmatpush.bf16.msra.mxu1 %v6315_v20  ;;  %1896 = vmatpush.bf16.msra.mxu3 %v6319_v25  ;;  %v5418_v20 = vld [vmem:[#allocation2 + $0xa0] sm:$0xf]  ;;  %v7900_v25 = vld [vmem:[#allocation2 + $0xa4] sm:$0xf] }
  0x96   :  { %v5419_v29 = vor.u32 %v7908_v21, %v5418_v20  ;;  %v6130_v20 = vld [vmem:[#allocation2 + $0x628] sm:$0xf]  ;;  %v6199_v21 = vor.u32 %v8093_v13, %v6196_v14  ;;  %v5943_v14 = vor.u32 %v8029_v1, %v5940_v2  ;;  %v5626_v2 = vld [vmem:[#allocation2 + $0x230] sm:$0xf] }
  0x97   :  { %1858 = vmatpush.bf16.msra.mxu0 %v5739_v31  ;;  %1884 = vmatpush.bf16.msra.mxu2 %v5743_v35  ;;  %v7892_v31 = vld [vmem:[#allocation2 + $0x5c] sm:$0xf0]  ;;  %v5423_v35 = vor.u32 %v7900_v25, %v5420_v26  ;;  %v8077_v25 = vld [vmem:[#allocation2 + $0x62c] sm:$0xf] }
  0x98   :  { %v6132_v26 = vld [vmem:[#allocation2 + $0x668] sm:$0xf0] }
  0x99   :  { %1871 = vmatpush.bf16.msra.mxu1 %v6251_v32  ;;  %1897 = vmatpush.bf16.msra.mxu3 %v6255_v39  ;;  %v5931_v32 = vor.u32 %v8036_v24, %v5930_v22  ;;  %v5935_v39 = vor.u32 %v8028_v27, %v5932_v28  ;;  %v8085_v22 = vld [vmem:[#allocation2 + $0x664] sm:$0xf0]  ;;  %v5620_v24 = vld [vmem:[#allocation2 + $0x268] sm:$0xf0] }
  0x9a   :  { %v6131_v28 = vor.u32 %v8085_v22, %v6130_v20 }
  0x9b   :  { %1859 = vmatpush.bf16.msra.mxu0 %v5675_v45  ;;  %1885 = vmatpush.bf16.msra.mxu2 %v5679_v47  ;;  %v6322_v45 = vld [vmem:[#allocation2 + $0x7a8] sm:$0xf] }
  0x9c   :  { %v8133_v47 = vld [vmem:[#allocation2 + $0x7e4] sm:$0xf0] }
  0x9d   :  { %1872 = vmatpush.bf16.msra.mxu1 %v6187_v46  ;;  %1898 = vmatpush.bf16.msra.mxu3 %v6191_v51  ;;  %v5355_v46 = vor.u32 %v7892_v31, %v5354_v30  ;;  %v5359_v51 = vor.u32 %v7884_v38, %v5356_v40  ;;  %v6323_v56 = vor.u32 %v8133_v47, %v6322_v45  ;;  %v5554_v30 = vld [vmem:[#allocation2 + $0x1a8] sm:$0xf]  ;;  %v5556_v38 = vld [vmem:[#allocation2 + $0x1e8] sm:$0xf0] }
  0x9e   :  { %v7941_v31 = vld [vmem:[#allocation2 + $0x1e4] sm:$0xf0]  ;;  %v6068_v40 = vld [vmem:[#allocation2 + $0x5e8] sm:$0xf0]  ;;  %v5559_v44 = vor.u32 %v7933_v37, %v5556_v38  ;;  %v5754_v38 = vld [vmem:[#allocation2 + $0x330] sm:$0xf] }
  0x9f   :  { %1860 = vmatpush.bf16.msra.mxu0 %v5611_v57  ;;  %1886 = vmatpush.bf16.msra.mxu2 %v5615_v59  ;;  %v5815_v57 = vor.u32 %v7997_v48, %v5812_v49  ;;  %v7989_v59 = vld [vmem:[#allocation2 + $0x364] sm:$0xf0]  ;;  %v5555_v41 = vor.u32 %v7941_v31, %v5554_v30  ;;  %v7917_v49 = vld [vmem:[#allocation2 + $0x12c] sm:$0xf]  ;;  %v6332_v30 = vld [vmem:[#allocation2 + $0x7f0] sm:$0xf0] }
  0xa0   :  { %v7925_v45 = vld [vmem:[#allocation2 + $0x164] sm:$0xf0] }
  0xa1   :  { %1873 = vmatpush.bf16.msra.mxu1 %v6123_v58  ;;  %1899 = vmatpush.bf16.msra.mxu3 %v6127_v63  ;;  %v5746_v58 = vld [vmem:[#allocation2 + $0x328] sm:$0xf]  ;;  %v7981_v63 = vld [vmem:[#allocation2 + $0x32c] sm:$0xf] }
  0xa2   :  { %v5747_v3 = vor.u32 %v7989_v59, %v5746_v58  ;;  %v8053_v47 = vld [vmem:[#allocation2 + $0x564] sm:$0xf0] }
  0xa3   :  { %1861 = vmatpush.bf16.msra.mxu0 %v5547_v5  ;;  %1887 = vmatpush.bf16.msra.mxu2 %v5551_v7  ;;  %v5751_v5 = vor.u32 %v7981_v63, %v5748_v0  ;;  %v7973_v7 = vld [vmem:[#allocation2 + $0x2e4] sm:$0xf0]  ;;  %v7901_v63 = vld [vmem:[#allocation2 + $0xac] sm:$0xf] }
  0xa4   :  { %v7909_v58 = vld [vmem:[#allocation2 + $0xe4] sm:$0xf0]  ;;  %v5428_v0 = vld [vmem:[#allocation2 + $0xe8] sm:$0xf0] }
  0xa5   :  { %1874 = vmatpush.bf16.msra.mxu1 %v6059_v6  ;;  %1900 = vmatpush.bf16.msra.mxu3 %v6063_v11  ;;  %v5682_v6 = vld [vmem:[#allocation2 + $0x2a8] sm:$0xf]  ;;  %v7965_v11 = vld [vmem:[#allocation2 + $0x2ac] sm:$0xf] }
  0xa6   :  { %v5683_v15 = vor.u32 %v7973_v7, %v5682_v6  ;;  %v5938_v59 = vld [vmem:[#allocation2 + $0x4a8] sm:$0xf] }
  0xa7   :  { %1862 = vmatpush.bf16.msra.mxu0 %v5483_v17  ;;  %1888 = vmatpush.bf16.msra.mxu2 %v5487_v19  ;;  %v5687_v17 = vor.u32 %v7965_v11, %v5684_v12  ;;  %v7957_v19 = vld [vmem:[#allocation2 + $0x264] sm:$0xf0]  ;;  %v5939_v8 = vor.u32 %v8037_v62, %v5938_v59  ;;  %v7885_v11 = vld [vmem:[#allocation2 + $0x2c] sm:$0xf]  ;;  %v5692_v62 = vld [vmem:[#allocation2 + $0x2f0] sm:$0xf0] }
  0xa8   :  { %v5874_v6 = vld [vmem:[#allocation2 + $0x428] sm:$0xf]  ;;  %v5364_v12 = vld [vmem:[#allocation2 + $0x68] sm:$0xf0] }
  0xa9   :  { %1875 = vmatpush.bf16.msra.mxu1 %v5995_v18  ;;  %1901 = vmatpush.bf16.msra.mxu3 %v5999_v23  ;;  %v5618_v18 = vld [vmem:[#allocation2 + $0x228] sm:$0xf]  ;;  %v7949_v23 = vld [vmem:[#allocation2 + $0x22c] sm:$0xf] }
  0xaa   :  { %v5619_v27 = vor.u32 %v7957_v19, %v5618_v18  ;;  %v8006_v18 = vld [vmem:[#allocation2 + $0x3ec] sm:$0xf0] }
  0xab   :  { %1863 = vmatpush.bf16.msra.mxu0 %v5419_v29  ;;  %1889 = vmatpush.bf16.msra.mxu2 %v5423_v35  ;;  %v5623_v29 = vor.u32 %v7949_v23, %v5620_v24  ;;  %v6135_v35 = vor.u32 %v8077_v25, %v6132_v26  ;;  %v6330_v19 = vld [vmem:[#allocation2 + $0x7b0] sm:$0xf]  ;;  %v7998_v24 = vld [vmem:[#allocation2 + $0x3b4] sm:$0xf] }
  0xac   :  { %v8134_v23 = vld [vmem:[#allocation2 + $0x7ec] sm:$0xf0]  ;;  %v5820_v25 = vld [vmem:[#allocation2 + $0x3f0] sm:$0xf0] }
  0xad   :  { %1876 = vmatpush.bf16.msra.mxu1 %v5931_v32  ;;  %1902 = vmatpush.bf16.msra.mxu3 %v5935_v39  ;;  %v6066_v32 = vld [vmem:[#allocation2 + $0x5a8] sm:$0xf]  ;;  %v8061_v39 = vld [vmem:[#allocation2 + $0x5ac] sm:$0xf]  ;;  %v5823_v37 = vor.u32 %v7998_v24, %v5820_v25 }
  0xae   :  { %v6067_v43 = vor.u32 %v8069_v36, %v6066_v32  ;;  %v6071_v48 = vor.u32 %v8061_v39, %v6068_v40  ;;  %v6331_v36 = vor.u32 %v8134_v23, %v6330_v19  ;;  %v7990_v39 = vld [vmem:[#allocation2 + $0x36c] sm:$0xf0] }
  0xaf   :  { %1864 = vmatpush.bf16.msra.mxu0 %v5355_v46  ;;  %1890 = vmatpush.bf16.msra.mxu2 %v5359_v51  ;;  %v6002_v46 = vld [vmem:[#allocation2 + $0x528] sm:$0xf]  ;;  %v6266_v40 = vld [vmem:[#allocation2 + $0x730] sm:$0xf] }
  0xb0   :  { %v8708_v51 = vld [vmem:[#allocation7] ss:$2 sm:$0xff]  ;;  %v8070_v23 = vld [vmem:[#allocation2 + $0x5ec] sm:$0xf0] }
  0xb1   :  { %1877 = vmatpush.bf16.msra.mxu1 %v5867_v50  ;;  %1903 = vmatpush.bf16.msra.mxu3 %v5871_v54  ;;  %v5492_v50 = vld [vmem:[#allocation2 + $0x168] sm:$0xf0]  ;;  %v5491_v54 = vor.u32 %v7925_v45, %v5490_v42  ;;  %v337_v60 = vperm.slane %v8708_v51, 0  ;;  %v7982_v45 = vld [vmem:[#allocation2 + $0x334] sm:$0xf] }
  0xb2   :  { %1891 = vmatmul.bf16.vlgmr.msra.gmra.mxu2 %v8684_v33  ;;  %1865 = vmatmul.bf16.vlgmr.msra.gmra.mxu0 %v8684_v33 }
  0xb3   :  { %1909 = vmatpush.bf16.msrb.mxu0 %v5811_v55  ;;  %1935 = vmatpush.bf16.msrb.mxu2 %v5815_v57  ;;  %v5426_v55 = vld [vmem:[#allocation2 + $0xa8] sm:$0xf]  ;;  %v5495_v57 = vor.u32 %v7917_v49, %v5492_v50  ;;  %v6268_v49 = vld [vmem:[#allocation2 + $0x770] sm:$0xf0] }
  0xb4   :  { %1904 = vmatmul.bf16.vlgmr.msra.gmra.mxu3 %v8686_v34  ;;  %1878 = vmatmul.bf16.vlgmr.msra.gmra.mxu1 %v8686_v34 }
  0xb5   :  { %1922 = vmatpush.bf16.msrb.mxu1 %v6323_v56  ;;  %1948 = vmatpush.bf16.msrb.mxu3 %v6327_v61  ;;  %v6003_v56 = vor.u32 %v8053_v47, %v6002_v46  ;;  %v6007_v61 = vor.u32 %v8045_v52, %v6004_v53  ;;  %v5756_v46 = vld [vmem:[#allocation2 + $0x370] sm:$0xf0]  ;;  %v5755_v52 = vor.u32 %v7990_v39, %v5754_v38  ;;  %v5498_v39 = vld [vmem:[#allocation2 + $0x130] sm:$0xf] }
  0xb7   :  { %1910 = vmatpush.bf16.msrb.mxu0 %v5747_v3  ;;  %1936 = vmatpush.bf16.msrb.mxu2 %v5751_v5  ;;  %v5427_v3 = vor.u32 %v7909_v58, %v5426_v55  ;;  %v7893_v5 = vld [vmem:[#allocation2 + $0x64] sm:$0xf0]  ;;  %v1658_v7 = vpop.f32.mrf.mxu0  ;;  %v5690_v55 = vld [vmem:[#allocation2 + $0x2b0] sm:$0xf] }
  0xb8   :  { %v1659_v13 = vadd.f32 %v1658_v7, %v337_v60  ;;  %v8102_v60 = vld [vmem:[#allocation2 + $0x6ec] sm:$0xf0] }
  0xb9   :  { %1923 = vmatpush.bf16.msrb.mxu1 %v6259_v4  ;;  %1949 = vmatpush.bf16.msrb.mxu3 %v6263_v9  ;;  %v5362_v4 = vld [vmem:[#allocation2 + $0x28] sm:$0xf]  ;;  %v5431_v9 = vor.u32 %v7901_v63, %v5428_v0  ;;  %v1671_v20 = vpop.f32.mrf.mxu1  ;;  %v8094_v63 = vld [vmem:[#allocation2 + $0x6b4] sm:$0xf]  ;;  %v6138_v7 = vld [vmem:[#allocation2 + $0x630] sm:$0xf] }
  0xba   :  { %v5363_v22 = vor.u32 %v7893_v5, %v5362_v4  ;;  %v8712_v26 = vadd.f32 %v1671_v20, %v1659_v13  ;;  %v6204_v0 = vld [vmem:[#allocation2 + $0x6f0] sm:$0xf0] }
  0xbb   :  { %1911 = vmatpush.bf16.msrb.mxu0 %v5683_v15  ;;  %1937 = vmatpush.bf16.msrb.mxu2 %v5687_v17  ;;  %v8013_v15 = vld [vmem:[#allocation2 + $0x42c] sm:$0xf]  ;;  %v5818_v17 = vld [vmem:[#allocation2 + $0x3b0] sm:$0xf]  ;;  %v5628_v13 = vld [vmem:[#allocation2 + $0x270] sm:$0xf0] }
  0xbc   :  { %v5819_v32 = vor.u32 %v8006_v18, %v5818_v17  ;;  %v5562_v17 = vld [vmem:[#allocation2 + $0x1b0] sm:$0xf] }
  0xbd   :  { %1924 = vmatpush.bf16.msrb.mxu1 %v6195_v16  ;;  %1950 = vmatpush.bf16.msrb.mxu3 %v6199_v21  ;;  %v5876_v16 = vld [vmem:[#allocation2 + $0x468] sm:$0xf0]  ;;  %v338_v21 = vperm.slane %v8708_v51, 1 }
  0xbe   :  { %v5879_v31 = vor.u32 %v8013_v15, %v5876_v16  ;;  %v6140_v15 = vld [vmem:[#allocation2 + $0x670] sm:$0xf0] }
  0xbf   :  { %1912 = vmatpush.bf16.msrb.mxu0 %v5619_v27  ;;  %1938 = vmatpush.bf16.msrb.mxu2 %v5623_v29  ;;  %v5875_v27 = vor.u32 %v8021_v10, %v5874_v6  ;;  %v8126_v29 = vld [vmem:[#allocation2 + $0x7b4] sm:$0xf]  ;;  %v1697_v42 = vpop.f32.mrf.mxu3  ;;  %v1660_v47 = vpop.f32.mrf.mxu0  ;;  %v7958_v6 = vld [vmem:[#allocation2 + $0x26c] sm:$0xf0]  ;;  %v6207_v10 = vor.u32 %v8094_v63, %v6204_v0 }
  0xc0   :  { %v5627_v16 = vor.u32 %v7958_v6, %v5626_v2  ;;  %v8038_v63 = vld [vmem:[#allocation2 + $0x4ec] sm:$0xf0]  ;;  %v7902_v0 = vld [vmem:[#allocation2 + $0xb4] sm:$0xf] }
  0xc1   :  { %1925 = vmatpush.bf16.msrb.mxu1 %v6131_v28  ;;  %1951 = vmatpush.bf16.msrb.mxu3 %v6135_v35  ;;  %v5367_v28 = vor.u32 %v7885_v11, %v5364_v12  ;;  %v1684_v35 = vpop.f32.mrf.mxu2  ;;  %v1673_v58 = vpop.f32.mrf.mxu1  ;;  %v8086_v11 = vld [vmem:[#allocation2 + $0x66c] sm:$0xf0]  ;;  %v7950_v12 = vld [vmem:[#allocation2 + $0x234] sm:$0xf] }
  0xc2   :  { %v6139_v19 = vor.u32 %v8086_v11, %v6138_v7  ;;  %v5631_v20 = vor.u32 %v7950_v12, %v5628_v13  ;;  %v5434_v58 = vld [vmem:[#allocation2 + $0xb0] sm:$0xf]  ;;  %v8030_v2 = vld [vmem:[#allocation2 + $0x4b4] sm:$0xf] }
  0xc3   :  { %1913 = vmatpush.bf16.msrb.mxu0 %v5555_v41  ;;  %1939 = vmatpush.bf16.msrb.mxu2 %v5559_v44  ;;  %v1685_v41 = vadd.f32 %v1684_v35, %v338_v21  ;;  %v8118_v44 = vld [vmem:[#allocation2 + $0x76c] sm:$0xf0]  ;;  %v7886_v11 = vld [vmem:[#allocation2 + $0x34] sm:$0xf] }
  0xc4   :  { %v6267_v53 = vor.u32 %v8118_v44, %v6266_v40  ;;  %v7942_v21 = vld [vmem:[#allocation2 + $0x1ec] sm:$0xf0] }
  0xc5   :  { %1926 = vmatpush.bf16.msrb.mxu1 %v6067_v43  ;;  %1952 = vmatpush.bf16.msrb.mxu3 %v6071_v48  ;;  %v6335_v43 = vor.u32 %v8126_v29, %v6332_v30  ;;  %v8110_v48 = vld [vmem:[#allocation2 + $0x734] sm:$0xf]  ;;  %v8714_v50 = vadd.f32 %v1697_v42, %v1685_v41  ;;  %v340_v30 = vperm.slane %v8708_v51, 3  ;;  %v7926_v40 = vld [vmem:[#allocation2 + $0x16c] sm:$0xf0] }
  0xc6   :  { %v6271_v59 = vor.u32 %v8110_v48, %v6268_v49  ;;  %v5564_v29 = vld [vmem:[#allocation2 + $0x1f0] sm:$0xf0]  ;;  %v6010_v41 = vld [vmem:[#allocation2 + $0x530] sm:$0xf] }
  0xc7   :  { %1914 = vmatpush.bf16.msrb.mxu0 %v5491_v54  ;;  %1940 = vmatpush.bf16.msrb.mxu2 %v5495_v57  ;;  %v5759_v54 = vor.u32 %v7982_v45, %v5756_v46  ;;  %v6202_v57 = vld [vmem:[#allocation2 + $0x6b0] sm:$0xf]  ;;  %v7918_v45 = vld [vmem:[#allocation2 + $0x134] sm:$0xf] }
  0xc8   :  { %v6203_v4 = vor.u32 %v8102_v60, %v6202_v57  ;;  %v8054_v44 = vld [vmem:[#allocation2 + $0x56c] sm:$0xf0]  ;;  %v5500_v46 = vld [vmem:[#allocation2 + $0x170] sm:$0xf0] }
  0xc9   :  { %1927 = vmatpush.bf16.msrb.mxu1 %v6003_v56  ;;  %1953 = vmatpush.bf16.msrb.mxu3 %v6007_v61  ;;  %v7974_v56 = vld [vmem:[#allocation2 + $0x2ec] sm:$0xf0]  ;;  %v7966_v61 = vld [vmem:[#allocation2 + $0x2b4] sm:$0xf]  ;;  %v5503_v57 = vor.u32 %v7918_v45, %v5500_v46  ;;  %v6276_v45 = vld [vmem:[#allocation2 + $0x778] sm:$0xf0] }
  0xca   :  { %v5691_v1 = vor.u32 %v7974_v56, %v5690_v55  ;;  %v5695_v5 = vor.u32 %v7966_v61, %v5692_v62  ;;  %v8046_v49 = vld [vmem:[#allocation2 + $0x534] sm:$0xf]  ;;  %v6011_v56 = vor.u32 %v8054_v44, %v6010_v41  ;;  %v5946_v60 = vld [vmem:[#allocation2 + $0x4b0] sm:$0xf]  ;;  %v8119_v41 = vld [vmem:[#allocation2 + $0x774] sm:$0xf0] }
  0xcb   :  { %1915 = vmatpush.bf16.msrb.mxu0 %v5427_v3  ;;  %1941 = vmatpush.bf16.msrb.mxu2 %v5431_v9  ;;  %v1686_v3 = vpop.f32.mrf.mxu2  ;;  %v339_v9 = vperm.slane %v8708_v51, 2  ;;  %v7894_v6 = vld [vmem:[#allocation2 + $0x6c] sm:$0xf0]  ;;  %v5947_v7 = vor.u32 %v8038_v63, %v5946_v60  ;;  %v8111_v44 = vld [vmem:[#allocation2 + $0x73c] sm:$0xf] }
  0xcc   :  { %v5948_v3 = vld [vmem:[#allocation2 + $0x4f0] sm:$0xf0]  ;;  %v6212_v60 = vld [vmem:[#allocation2 + $0x6f8] sm:$0xf0] }
  0xcd   :  { %1928 = vmatpush.bf16.msrb.mxu1 %v5939_v8  ;;  %1954 = vmatpush.bf16.msrb.mxu3 %v5943_v14  ;;  %v1699_v8 = vpop.f32.mrf.mxu3  ;;  %v8078_v14 = vld [vmem:[#allocation2 + $0x634] sm:$0xf]  ;;  %v5951_v13 = vor.u32 %v8030_v2, %v5948_v3  ;;  %v6146_v2 = vld [vmem:[#allocation2 + $0x638] sm:$0xf]  ;;  %v341_v3 = vperm.slane %v8708_v51, 4 }
  0xcf   :  { %1916 = vmatpush.bf16.msrb.mxu0 %v5363_v22  ;;  %1942 = vmatpush.bf16.msrb.mxu2 %v5367_v28  ;;  %v1710_v18 = vpop.f32.mrf.mxu0  ;;  %v6074_v22 = vld [vmem:[#allocation2 + $0x5b0] sm:$0xf]  ;;  %v7934_v28 = vld [vmem:[#allocation2 + $0x1b4] sm:$0xf] }
  0xd0   :  { %v1711_v24 = vadd.f32 %v1710_v18, %v339_v9  ;;  %v5567_v38 = vor.u32 %v7934_v28, %v5564_v29  ;;  %v5882_v9 = vld [vmem:[#allocation2 + $0x430] sm:$0xf]  ;;  %v5826_v18 = vld [vmem:[#allocation2 + $0x3b8] sm:$0xf]  ;;  %v8127_v28 = vld [vmem:[#allocation2 + $0x7bc] sm:$0xf] }
  0xd1   :  { %1929 = vmatpush.bf16.msrb.mxu1 %v5875_v27  ;;  %1955 = vmatpush.bf16.msrb.mxu3 %v5879_v31  ;;  %v1723_v25 = vpop.f32.mrf.mxu1  ;;  %v6143_v27 = vor.u32 %v8078_v14, %v6140_v15  ;;  %v8062_v31 = vld [vmem:[#allocation2 + $0x5b4] sm:$0xf]  ;;  %v6340_v29 = vld [vmem:[#allocation2 + $0x7f8] sm:$0xf0] }
  0xd2   :  { %1943 = vmatmul.bf16.vlgmr.msrb.gmra.mxu2 %v8684_v33  ;;  %1917 = vmatmul.bf16.vlgmr.msrb.gmra.mxu0 %v8684_v33  ;;  %v8722_v35 = vadd.f32 %v1723_v25, %v1711_v24  ;;  %v5372_v14 = vld [vmem:[#allocation2 + $0x70] sm:$0xf0]  ;;  %v5828_v24 = vld [vmem:[#allocation2 + $0x3f8] sm:$0xf0] }
  0xd3   :  { %1961 = vmatpush.bf16.msra.mxu0 %v5819_v32  ;;  %1987 = vmatpush.bf16.msra.mxu2 %v5823_v37  ;;  %v6076_v32 = vld [vmem:[#allocation2 + $0x5f0] sm:$0xf0]  ;;  %v6075_v37 = vor.u32 %v8070_v23, %v6074_v22  ;;  %v8135_v22 = vld [vmem:[#allocation2 + $0x7f4] sm:$0xf0]  ;;  %v7999_v23 = vld [vmem:[#allocation2 + $0x3bc] sm:$0xf] }
  0xd4   :  { %1956 = vmatmul.bf16.vlgmr.msrb.gmra.mxu3 %v8686_v34  ;;  %1930 = vmatmul.bf16.vlgmr.msrb.gmra.mxu1 %v8686_v34  ;;  %v8014_v15 = vld [vmem:[#allocation2 + $0x434] sm:$0xf] }
  0xd5   :  { %1974 = vmatpush.bf16.msra.mxu1 %v6331_v36  ;;  %2000 = vmatpush.bf16.msra.mxu3 %v6335_v43  ;;  %v5563_v36 = vor.u32 %v7942_v21, %v5562_v17  ;;  %v1736_v42 = vpop.f32.mrf.mxu2  ;;  %v6079_v43 = vor.u32 %v8062_v31, %v6076_v32 }
  0xd6   :  { %v1737_v47 = vadd.f32 %v1736_v42, %v340_v30  ;;  %v7983_v42 = vld [vmem:[#allocation2 + $0x33c] sm:$0xf] }
  0xd7   :  { %1962 = vmatpush.bf16.msra.mxu0 %v5755_v52  ;;  %1988 = vmatpush.bf16.msra.mxu2 %v5759_v54  ;;  %v1749_v48 = vpop.f32.mrf.mxu3  ;;  %v6012_v52 = vld [vmem:[#allocation2 + $0x570] sm:$0xf0]  ;;  %v1712_v55 = vpop.f32.mrf.mxu0 }
  0xd8   :  { %v8724_v54 = vadd.f32 %v1749_v48, %v1737_v47  ;;  %v6015_v62 = vor.u32 %v8046_v49, %v6012_v52  ;;  %v5698_v49 = vld [vmem:[#allocation2 + $0x2b8] sm:$0xf]  ;;  %v6279_v55 = vor.u32 %v8111_v44, %v6276_v45  ;;  %v6020_v44 = vld [vmem:[#allocation2 + $0x578] sm:$0xf0] }
  0xd9   :  { %1975 = vmatpush.bf16.msra.mxu1 %v6267_v53  ;;  %2001 = vmatpush.bf16.msra.mxu3 %v6271_v59  ;;  %v5499_v53 = vor.u32 %v7926_v40, %v5498_v39  ;;  %v7910_v59 = vld [vmem:[#allocation2 + $0xec] sm:$0xf0]  ;;  %v1725_v61 = vpop.f32.mrf.mxu1  ;;  %v6274_v39 = vld [vmem:[#allocation2 + $0x738] sm:$0xf]  ;;  %v6343_v40 = vor.u32 %v8127_v28, %v6340_v29 }
  0xda   :  { %v6275_v47 = vor.u32 %v8119_v41, %v6274_v39  ;;  %v7975_v52 = vld [vmem:[#allocation2 + $0x2f4] sm:$0xf0]  ;;  %v5508_v41 = vld [vmem:[#allocation2 + $0x178] sm:$0xf0] }
  0xdb   :  { %1963 = vmatpush.bf16.msra.mxu0 %v5691_v1  ;;  %1989 = vmatpush.bf16.msra.mxu2 %v5695_v5  ;;  %v5436_v1 = vld [vmem:[#allocation2 + $0xf0] sm:$0xf0]  ;;  %v5370_v5 = vld [vmem:[#allocation2 + $0x30] sm:$0xf]  ;;  %v5699_v61 = vor.u32 %v7975_v52, %v5698_v49  ;;  %v8055_v39 = vld [vmem:[#allocation2 + $0x574] sm:$0xf0] }
  0xdc   :  { %v5439_v8 = vor.u32 %v7902_v0, %v5436_v1  ;;  %v5371_v21 = vor.u32 %v7894_v6, %v5370_v5  ;;  %v7959_v1 = vld [vmem:[#allocation2 + $0x274] sm:$0xf0]  ;;  %v7951_v6 = vld [vmem:[#allocation2 + $0x23c] sm:$0xf] }
  0xdd   :  { %1976 = vmatpush.bf16.msra.mxu1 %v6203_v4  ;;  %2002 = vmatpush.bf16.msra.mxu3 %v6207_v10  ;;  %v5435_v4 = vor.u32 %v7910_v59, %v5434_v58  ;;  %v8022_v10 = vld [vmem:[#allocation2 + $0x46c] sm:$0xf0]  ;;  %v1738_v12 = vpop.f32.mrf.mxu2  ;;  %v5700_v58 = vld [vmem:[#allocation2 + $0x2f8] sm:$0xf0]  ;;  %v8087_v5 = vld [vmem:[#allocation2 + $0x674] sm:$0xf0] }
  0xde   :  { %v5883_v25 = vor.u32 %v8022_v10, %v5882_v9  ;;  %v8095_v59 = vld [vmem:[#allocation2 + $0x6bc] sm:$0xf]  ;;  %v5442_v52 = vld [vmem:[#allocation2 + $0xb8] sm:$0xf] }
  0xdf   :  { %1964 = vmatpush.bf16.msra.mxu0 %v5627_v16  ;;  %1990 = vmatpush.bf16.msra.mxu2 %v5631_v20  ;;  %v5884_v16 = vld [vmem:[#allocation2 + $0x470] sm:$0xf0]  ;;  %v1751_v17 = vpop.f32.mrf.mxu3  ;;  %v6338_v20 = vld [vmem:[#allocation2 + $0x7b8] sm:$0xf]  ;;  %v6148_v9 = vld [vmem:[#allocation2 + $0x678] sm:$0xf0] }
  0xe0   :  { %v5887_v30 = vor.u32 %v8014_v15, %v5884_v16  ;;  %v6339_v32 = vor.u32 %v8135_v22, %v6338_v20  ;;  %v7943_v15 = vld [vmem:[#allocation2 + $0x1f4] sm:$0xf0]  ;;  %v5572_v22 = vld [vmem:[#allocation2 + $0x1f8] sm:$0xf0] }
  0xe1   :  { %1977 = vmatpush.bf16.msra.mxu1 %v6139_v19  ;;  %2003 = vmatpush.bf16.msra.mxu3 %v6143_v27  ;;  %v8007_v19 = vld [vmem:[#allocation2 + $0x3f4] sm:$0xf0]  ;;  %v5375_v27 = vor.u32 %v7886_v11, %v5372_v14 }
  0xe2   :  { %v5827_v31 = vor.u32 %v8007_v19, %v5826_v18  ;;  %v5570_v11 = vld [vmem:[#allocation2 + $0x1b8] sm:$0xf] }
  0xe3   :  { %1965 = vmatpush.bf16.msra.mxu0 %v5563_v36  ;;  %1991 = vmatpush.bf16.msra.mxu2 %v5567_v38  ;;  %v5831_v36 = vor.u32 %v7999_v23, %v5828_v24  ;;  %v7991_v38 = vld [vmem:[#allocation2 + $0x374] sm:$0xf0]  ;;  %v342_v23 = vperm.slane %v8708_v51, 5  ;;  %v8063_v24 = vld [vmem:[#allocation2 + $0x5bc] sm:$0xf]  ;;  %v5571_v28 = vor.u32 %v7943_v15, %v5570_v11 }
  0xe4   :  { %v6082_v16 = vld [vmem:[#allocation2 + $0x5b8] sm:$0xf]  ;;  %v5892_v11 = vld [vmem:[#allocation2 + $0x478] sm:$0xf0]  ;;  %v6526_v15 = vld [vmem:[#allocation5 + $0x168] sm:$0xf] }
  0xe5   :  { %1978 = vmatpush.bf16.msra.mxu1 %v6075_v37  ;;  %2004 = vmatpush.bf16.msra.mxu3 %v6079_v43  ;;  %v5762_v37 = vld [vmem:[#allocation2 + $0x338] sm:$0xf]  ;;  %v5764_v43 = vld [vmem:[#allocation2 + $0x378] sm:$0xf0] }
  0xe6   :  { %v5763_v46 = vor.u32 %v7991_v38, %v5762_v37  ;;  %v5767_v48 = vor.u32 %v7983_v42, %v5764_v43  ;;  %v8071_v17 = vld [vmem:[#allocation2 + $0x5f4] sm:$0xf0]  ;;  %v8047_v43 = vld [vmem:[#allocation2 + $0x53c] sm:$0xf] }
  0xe7   :  { %1966 = vmatpush.bf16.msra.mxu0 %v5499_v53  ;;  %1992 = vmatpush.bf16.msra.mxu2 %v5503_v57  ;;  %v6210_v53 = vld [vmem:[#allocation2 + $0x6b8] sm:$0xf]  ;;  %v7967_v57 = vld [vmem:[#allocation2 + $0x2bc] sm:$0xf]  ;;  %v6083_v29 = vor.u32 %v8071_v17, %v6082_v16  ;;  %v8182_v17 = vld [vmem:[#allocation5 + $0x170] sm:$0xf0] }
  0xe8   :  { %v5703_v0 = vor.u32 %v7967_v57, %v5700_v58  ;;  %v6023_v57 = vor.u32 %v8047_v43, %v6020_v44  ;;  %v8039_v58 = vld [vmem:[#allocation2 + $0x4f4] sm:$0xf0] }
  0xe9   :  { %1979 = vmatpush.bf16.msra.mxu1 %v6011_v56  ;;  %2005 = vmatpush.bf16.msra.mxu3 %v6015_v62  ;;  %v8103_v56 = vld [vmem:[#allocation2 + $0x6f4] sm:$0xf0] }
  0xea   :  { %v5634_v62 = vld [vmem:[#allocation2 + $0x238] sm:$0xf]  ;;  %v6211_v63 = vor.u32 %v8103_v56, %v6210_v53 }
  0xeb   :  { %1967 = vmatpush.bf16.msra.mxu0 %v5435_v4  ;;  %1993 = vmatpush.bf16.msra.mxu2 %v5439_v8  ;;  %v6215_v4 = vor.u32 %v8095_v59, %v6212_v60  ;;  %v8079_v8 = vld [vmem:[#allocation2 + $0x63c] sm:$0xf]  ;;  %v5635_v10 = vor.u32 %v7959_v1, %v5634_v62  ;;  %v7911_v53 = vld [vmem:[#allocation2 + $0xf4] sm:$0xf0] }
  0xec   :  { %v6151_v20 = vor.u32 %v8079_v8, %v6148_v9  ;;  %v7903_v59 = vld [vmem:[#allocation2 + $0xbc] sm:$0xf]  ;;  %v7895_v1 = vld [vmem:[#allocation2 + $0x74] sm:$0xf0] }
  0xed   :  { %1980 = vmatpush.bf16.msra.mxu1 %v5947_v7  ;;  %2006 = vmatpush.bf16.msra.mxu3 %v5951_v13  ;;  %v5636_v7 = vld [vmem:[#allocation2 + $0x278] sm:$0xf0]  ;;  %v6147_v13 = vor.u32 %v8087_v5, %v6146_v2  ;;  %v8023_v5 = vld [vmem:[#allocation2 + $0x474] sm:$0xf0] }
  0xee   :  { %v5639_v14 = vor.u32 %v7951_v6, %v5636_v7  ;;  %v5444_v60 = vld [vmem:[#allocation2 + $0xf8] sm:$0xf0]  ;;  %v6406_v44 = vld [vmem:[#allocation5 + $0x78] sm:$0xf] }
  0xef   :  { %1968 = vmatpush.bf16.msra.mxu0 %v5371_v21  ;;  %1994 = vmatpush.bf16.msra.mxu2 %v5375_v27  ;;  %v1762_v12 = vpop.f32.mrf.mxu0  ;;  %v7935_v21 = vld [vmem:[#allocation2 + $0x1bc] sm:$0xf] }
  0xf0   :  { %v1763_v18 = vadd.f32 %v1762_v12, %v341_v3  ;;  %v5956_v62 = vld [vmem:[#allocation2 + $0x4f8] sm:$0xf0]  ;;  %v5447_v3 = vor.u32 %v7903_v59, %v5444_v60  ;;  %v6394_v60 = vld [vmem:[#allocation5 + $0x60] sm:$0xf] }
  0xf1   :  { %1981 = vmatpush.bf16.msra.mxu1 %v5883_v25  ;;  %2007 = vmatpush.bf16.msra.mxu3 %v5887_v30  ;;  %v1775_v19 = vpop.f32.mrf.mxu1  ;;  %v6084_v25 = vld [vmem:[#allocation2 + $0x5f8] sm:$0xf0]  ;;  %v5575_v30 = vor.u32 %v7935_v21, %v5572_v22  ;;  %v6718_v22 = vld [vmem:[#allocation5 + $0x2e8] sm:$0xf] }
  0xf2   :  { %1995 = vmatmul.bf16.vlgmr.msra.gmra.mxu2 %v8684_v33  ;;  %1969 = vmatmul.bf16.vlgmr.msra.gmra.mxu0 %v8684_v33  ;;  %v8732_v27 = vadd.f32 %v1775_v19, %v1763_v18  ;;  %v6087_v38 = vor.u32 %v8063_v24, %v6084_v25  ;;  %v7887_v6 = vld [vmem:[#allocation2 + $0x3c] sm:$0xf]  ;;  %v6622_v18 = vld [vmem:[#allocation5 + $0x228] sm:$0xf]  ;;  %v8206_v19 = vld [vmem:[#allocation5 + $0x230] sm:$0xf0] }
  0xf3   :  { %2013 = vmatpush.bf16.msrb.mxu0 %v5827_v31  ;;  %2039 = vmatpush.bf16.msrb.mxu2 %v5831_v36  ;;  %v5506_v31 = vld [vmem:[#allocation2 + $0x138] sm:$0xf]  ;;  %v5380_v9 = vld [vmem:[#allocation2 + $0x78] sm:$0xf0] }
  0xf4   :  { %2008 = vmatmul.bf16.vlgmr.msra.gmra.mxu3 %v8686_v34  ;;  %1982 = vmatmul.bf16.vlgmr.msra.gmra.mxu1 %v8686_v34  ;;  %v6018_v36 = vld [vmem:[#allocation2 + $0x538] sm:$0xf]  ;;  %v5383_v21 = vor.u32 %v7887_v6, %v5380_v9  ;;  %v6478_v9 = vld [vmem:[#allocation5 + $0x108] sm:$0xf] }
  0xf5   :  { %2026 = vmatpush.bf16.msrb.mxu1 %v6339_v32  ;;  %2052 = vmatpush.bf16.msrb.mxu3 %v6343_v40  ;;  %v7927_v32 = vld [vmem:[#allocation2 + $0x174] sm:$0xf0]  ;;  %v1788_v37 = vpop.f32.mrf.mxu2  ;;  %v7919_v40 = vld [vmem:[#allocation2 + $0x13c] sm:$0xf] }
  0xf6   :  { %v1789_v51 = vadd.f32 %v1788_v37, %v342_v23  ;;  %v5507_v45 = vor.u32 %v7927_v32, %v5506_v31  ;;  %v5511_v49 = vor.u32 %v7919_v40, %v5508_v41  ;;  %v8230_v23 = vld [vmem:[#allocation5 + $0x2f0] sm:$0xf0]  ;;  %v8155_v31 = vld [vmem:[#allocation5 + $0x98] sm:$0xf0]  ;;  %v6514_v32 = vld [vmem:[#allocation5 + $0x150] sm:$0xf] }
  0xf7   :  { %2014 = vmatpush.bf16.msrb.mxu0 %v5763_v46  ;;  %2040 = vmatpush.bf16.msrb.mxu2 %v5767_v48  ;;  %v1801_v42 = vpop.f32.mrf.mxu3  ;;  %v6019_v48 = vor.u32 %v8055_v39, %v6018_v36  ;;  %v6719_v36 = vor.u32 %v8230_v23, %v6718_v22  ;;  %v8179_v37 = vld [vmem:[#allocation5 + $0x158] sm:$0xf0]  ;;  %v6706_v40 = vld [vmem:[#allocation5 + $0x2d0] sm:$0xf] }
  0xf8   :  { %v8734_v46 = vadd.f32 %v1801_v42, %v1789_v51  ;;  %v8203_v39 = vld [vmem:[#allocation5 + $0x218] sm:$0xf0]  ;;  %v6515_v42 = vor.u32 %v8179_v37, %v6514_v32  ;;  %v6466_v22 = vld [vmem:[#allocation5 + $0xf0] sm:$0xf] }
  0xf9   :  { %2027 = vmatpush.bf16.msrb.mxu1 %v6275_v47  ;;  %2053 = vmatpush.bf16.msrb.mxu3 %v6279_v55  ;;  %v1764_v47 = vpop.f32.mrf.mxu0  ;;  %v5954_v55 = vld [vmem:[#allocation2 + $0x4b8] sm:$0xf]  ;;  %v1777_v56 = vpop.f32.mrf.mxu1  ;;  %v8227_v41 = vld [vmem:[#allocation5 + $0x2d8] sm:$0xf0] }
  0xfa   :  { %v5955_v2 = vor.u32 %v8039_v58, %v5954_v55  ;;  %v6502_v47 = vld [vmem:[#allocation5 + $0x138] sm:$0xf]  ;;  %v8224_v56 = vld [vmem:[#allocation5 + $0x2c0] sm:$0xf0]  ;;  %v8215_v32 = vld [vmem:[#allocation5 + $0x278] sm:$0xf0] }
  0xfb   :  { %2015 = vmatpush.bf16.msrb.mxu0 %v5699_v61  ;;  %2041 = vmatpush.bf16.msrb.mxu2 %v5703_v0  ;;  %v8031_v61 = vld [vmem:[#allocation2 + $0x4bc] sm:$0xf]  ;;  %v5378_v0 = vld [vmem:[#allocation2 + $0x38] sm:$0xf] }
  0xfc   :  { %v5959_v8 = vor.u32 %v8031_v61, %v5956_v62  ;;  %v5379_v16 = vor.u32 %v7895_v1, %v5378_v0  ;;  %v6694_v55 = vld [vmem:[#allocation5 + $0x2b8] sm:$0xf]  ;;  %v8149_v61 = vld [vmem:[#allocation5 + $0x68] sm:$0xf0]  ;;  %v6490_v62 = vld [vmem:[#allocation5 + $0x120] sm:$0xf] }
  0xfd   :  { %2028 = vmatpush.bf16.msrb.mxu1 %v6211_v63  ;;  %2054 = vmatpush.bf16.msrb.mxu3 %v6215_v4  ;;  %v5443_v63 = vor.u32 %v7911_v53, %v5442_v52  ;;  %v5890_v4 = vld [vmem:[#allocation2 + $0x438] sm:$0xf]  ;;  %v1790_v7 = vpop.f32.mrf.mxu2  ;;  %v8200_v53 = vld [vmem:[#allocation5 + $0x200] sm:$0xf0]  ;;  %v8173_v0 = vld [vmem:[#allocation5 + $0x128] sm:$0xf0] }
  0xfe   :  { %v6598_v52 = vld [vmem:[#allocation5 + $0x1f8] sm:$0xf]  ;;  %v6586_v1 = vld [vmem:[#allocation5 + $0x1e0] sm:$0xf]  ;;  %v6382_v7 = vld [vmem:[#allocation5 + $0x48] sm:$0xf] }
  0xff   :  { %2016 = vmatpush.bf16.msrb.mxu0 %v5635_v10  ;;  %2042 = vmatpush.bf16.msrb.mxu2 %v5639_v14  ;;  %v8015_v10 = vld [vmem:[#allocation2 + $0x43c] sm:$0xf]  ;;  %v1803_v12 = vpop.f32.mrf.mxu3  ;;  %v8158_v14 = vld [vmem:[#allocation5 + $0xb0] sm:$0xf0]  ;;  %v6599_v59 = vor.u32 %v8200_v53, %v6598_v52  ;;  %v6346_v53 = vld [vmem:[#allocation5] sm:$0xf] }
 0x100   :  { %v5895_v24 = vor.u32 %v8015_v10, %v5892_v11  ;;  %v8170_v12 = vld [vmem:[#allocation5 + $0x110] sm:$0xf0] }
 0x101   :  { %2029 = vmatpush.bf16.msrb.mxu1 %v6147_v13  ;;  %2055 = vmatpush.bf16.msrb.mxu3 %v6151_v20  ;;  %v6430_v13 = vld [vmem:[#allocation5 + $0xa8] sm:$0xf]  ;;  %v5891_v20 = vor.u32 %v8023_v5, %v5890_v4  ;;  %v6395_v4 = vor.u32 %v8149_v61, %v6394_v60  ;;  %v6538_v60 = vld [vmem:[#allocation5 + $0x180] sm:$0xf] }
 0x102   :  { %v6431_v25 = vor.u32 %v8158_v14, %v6430_v13  ;;  %v6574_v13 = vld [vmem:[#allocation5 + $0x1c8] sm:$0xf]  ;;  %v8194_v14 = vld [vmem:[#allocation5 + $0x1d0] sm:$0xf0] }
 0x103   :  { %2017 = vmatpush.bf16.msrb.mxu0 %v5571_v28  ;;  %2043 = vmatpush.bf16.msrb.mxu2 %v5575_v30  ;;  %v6527_v28 = vor.u32 %v8182_v17, %v6526_v15  ;;  %v6418_v30 = vld [vmem:[#allocation5 + $0x90] sm:$0xf]  ;;  %v6670_v15 = vld [vmem:[#allocation5 + $0x288] sm:$0xf] }
 0x104   :  { %v6419_v51 = vor.u32 %v8155_v31, %v6418_v30  ;;  %v6658_v31 = vld [vmem:[#allocation5 + $0x270] sm:$0xf] }
 0x105   :  { %2030 = vmatpush.bf16.msrb.mxu1 %v6083_v29  ;;  %2056 = vmatpush.bf16.msrb.mxu3 %v6087_v38  ;;  %v6623_v29 = vor.u32 %v8206_v19, %v6622_v18  ;;  %v6610_v38 = vld [vmem:[#allocation5 + $0x210] sm:$0xf]  ;;  %v6479_v18 = vor.u32 %v8170_v12, %v6478_v9  ;;  %v6575_v19 = vor.u32 %v8194_v14, %v6574_v13  ;;  %v2065_v9 = vmax.f32 %v8712_v26, 0.0  ;;  %v7102_v14 = vld [vmem:[#allocation5 + $0x5e8] sm:$0xf] }
 0x106   :  { %v6611_v43 = vor.u32 %v8203_v39, %v6610_v38  ;;  %v6898_v26 = vld [vmem:[#allocation5 + $0x450] sm:$0xf] }
 0x107   :  { %2018 = vmatpush.bf16.msrb.mxu0 %v5507_v45  ;;  %2044 = vmatpush.bf16.msrb.mxu2 %v5511_v49  ;;  %v8152_v45 = vld [vmem:[#allocation5 + $0x80] sm:$0xf0] }
 0x108   :  { %v8176_v49 = vld [vmem:[#allocation5 + $0x140] sm:$0xf0] }
 0x109   :  { %2031 = vmatpush.bf16.msrb.mxu1 %v6019_v48  ;;  %2057 = vmatpush.bf16.msrb.mxu3 %v6023_v57  ;;  %v6707_v48 = vor.u32 %v8227_v41, %v6706_v40  ;;  %v6407_v57 = vor.u32 %v8152_v45, %v6406_v44  ;;  %v6503_v58 = vor.u32 %v8176_v49, %v6502_v47  ;;  %v6358_v40 = vld [vmem:[#allocation5 + $0x18] sm:$0xf]  ;;  %v8140_v41 = vld [vmem:[#allocation5 + $0x20] sm:$0xf0] }
 0x10a   :  { %v8164_v44 = vld [vmem:[#allocation5 + $0xe0] sm:$0xf0]  ;;  %v6550_v45 = vld [vmem:[#allocation5 + $0x198] sm:$0xf]  ;;  %v6359_v52 = vor.u32 %v8140_v41, %v6358_v40 }
 0x10b   :  { %2019 = vmatpush.bf16.msrb.mxu0 %v5443_v63  ;;  %2045 = vmatpush.bf16.msrb.mxu2 %v5447_v3  ;;  %v6695_v63 = vor.u32 %v8224_v56, %v6694_v55  ;;  %v8221_v3 = vld [vmem:[#allocation5 + $0x2a8] sm:$0xf0]  ;;  %v8188_v47 = vld [vmem:[#allocation5 + $0x1a0] sm:$0xf0]  ;;  %v6790_v40 = vld [vmem:[#allocation5 + $0x378] sm:$0xf] }
 0x10c   :  { %v8212_v49 = vld [vmem:[#allocation5 + $0x260] sm:$0xf0]  ;;  %v8137_v55 = vld [vmem:[#allocation5 + $0x8] sm:$0xf0] }
 0x10d   :  { %2032 = vmatpush.bf16.msrb.mxu1 %v5955_v2  ;;  %2058 = vmatpush.bf16.msrb.mxu3 %v5959_v8  ;;  %v6682_v2 = vld [vmem:[#allocation5 + $0x2a0] sm:$0xf]  ;;  %v8146_v8 = vld [vmem:[#allocation5 + $0x50] sm:$0xf0]  ;;  %v8248_v41 = vld [vmem:[#allocation5 + $0x380] sm:$0xf0] }
 0x10e   :  { %v6683_v11 = vor.u32 %v8221_v3, %v6682_v2  ;;  %v6383_v17 = vor.u32 %v8146_v8, %v6382_v7  ;;  %v6814_v2 = vld [vmem:[#allocation5 + $0x3a8] sm:$0xf]  ;;  %v8254_v3 = vld [vmem:[#allocation5 + $0x3b0] sm:$0xf0] }
 0x10f   :  { %2020 = vmatpush.bf16.msrb.mxu0 %v5379_v16  ;;  %2046 = vmatpush.bf16.msrb.mxu2 %v5383_v21  ;;  %v8740_v5 = vpop.f32.mrf.mxu0  ;;  %v8218_v16 = vld [vmem:[#allocation5 + $0x290] sm:$0xf0]  ;;  %v8143_v21 = vld [vmem:[#allocation5 + $0x38] sm:$0xf0]  ;;  %v7006_v7 = vld [vmem:[#allocation5 + $0x528] sm:$0xf] }
 0x110   :  { %v8302_v8 = vld [vmem:[#allocation5 + $0x530] sm:$0xf0] }
 0x111   :  { %2033 = vmatpush.bf16.msrb.mxu1 %v5891_v20  ;;  %2059 = vmatpush.bf16.msrb.mxu3 %v5895_v24  ;;  %v8742_v10 = vpop.f32.mrf.mxu1  ;;  %v6370_v20 = vld [vmem:[#allocation5 + $0x30] sm:$0xf]  ;;  %v6671_v24 = vor.u32 %v8218_v16, %v6670_v15  ;;  %v8326_v15 = vld [vmem:[#allocation5 + $0x5f0] sm:$0xf0]  ;;  %v2067_v16 = vmax.f32 %v8722_v35, 0.0  ;;  %v8752_v35 = vpack.c.bf16 %v2065_v9, %v2065_v9 }
 0x112   :  { %2021 = vmatmul.bf16.vlgmr.msrb.gmra.mxu0 %v8684_v33  ;;  %2047 = vmatmul.bf16.vlgmr.msrb.gmra.mxu2 %v8684_v33  ;;  %v8197_v33 = vld [vmem:[#allocation5 + $0x1e8] sm:$0xf0]  ;;  %v8266_v9 = vld [vmem:[#allocation5 + $0x410] sm:$0xf0] }
 0x113   :  { %4664 = vmatpush.bf16.msra.mxu0 %v6431_v25  ;;  %4690 = vmatpush.bf16.msra.mxu2 %v6623_v29  ;;  %v6587_v6 = vor.u32 %v8197_v33, %v6586_v1  ;;  %v8167_v25 = vld [vmem:[#allocation5 + $0xf8] sm:$0xf0]  ;;  %v8209_v1 = vld [vmem:[#allocation5 + $0x248] sm:$0xf0] }
 0x114   :  { %2060 = vmatmul.bf16.vlgmr.msrb.gmra.mxu3 %v8686_v34  ;;  %2034 = vmatmul.bf16.vlgmr.msrb.gmra.mxu1 %v8686_v34  ;;  %v6491_v34 = vor.u32 %v8173_v0, %v6490_v62  ;;  %v8191_v29 = vld [vmem:[#allocation5 + $0x1b8] sm:$0xf0]  ;;  %v6467_v38 = vor.u32 %v8167_v25, %v6466_v22  ;;  %v6634_v0 = vld [vmem:[#allocation5 + $0x240] sm:$0xf]  ;;  %v6802_v22 = vld [vmem:[#allocation5 + $0x390] sm:$0xf] }
 0x115   :  { %4677 = vmatpush.bf16.msra.mxu1 %v6527_v28  ;;  %4703 = vmatpush.bf16.msra.mxu3 %v6719_v36  ;;  %v8744_v23 = vpop.f32.mrf.mxu2  ;;  %v6562_v28 = vld [vmem:[#allocation5 + $0x1b0] sm:$0xf]  ;;  %v6371_v36 = vor.u32 %v8143_v21, %v6370_v20  ;;  %v7007_v21 = vor.u32 %v8302_v8, %v7006_v7  ;;  %v8275_v25 = vld [vmem:[#allocation5 + $0x458] sm:$0xf0] }
 0x116   :  { %v6563_v39 = vor.u32 %v8191_v29, %v6562_v28  ;;  %v6994_v28 = vld [vmem:[#allocation5 + $0x510] sm:$0xf]  ;;  %v8299_v29 = vld [vmem:[#allocation5 + $0x518] sm:$0xf0] }
 0x117   :  { %4665 = vmatpush.bf16.msra.mxu0 %v6419_v51  ;;  %4691 = vmatpush.bf16.msra.mxu2 %v6611_v43  ;;  %v8746_v30 = vpop.f32.mrf.mxu3  ;;  %v1816_v37 = vpop.f32.mrf.mxu0  ;;  %v6454_v51 = vld [vmem:[#allocation5 + $0xd8] sm:$0xf]  ;;  %v6659_v43 = vor.u32 %v8215_v32, %v6658_v31  ;;  %v7090_v31 = vld [vmem:[#allocation5 + $0x5d0] sm:$0xf]  ;;  %v8323_v32 = vld [vmem:[#allocation5 + $0x5d8] sm:$0xf0] }
 0x118   :  { %v6455_v56 = vor.u32 %v8164_v44, %v6454_v51  ;;  %v8756_v37 = vpack.c.bf16 %v2067_v16, %v2067_v16  ;;  %v6886_v51 = vld [vmem:[#allocation5 + $0x438] sm:$0xf]  ;;  %v8272_v44 = vld [vmem:[#allocation5 + $0x440] sm:$0xf0] }
 0x119   :  { %4678 = vmatpush.bf16.msra.mxu1 %v6515_v42  ;;  %4704 = vmatpush.bf16.msra.mxu3 %v6707_v48  ;;  %v1829_v42 = vpop.f32.mrf.mxu1  ;;  %v6646_v48 = vld [vmem:[#allocation5 + $0x258] sm:$0xf] }
 0x11a   :  { %v6647_v62 = vor.u32 %v8212_v49, %v6646_v48  ;;  %v7078_v48 = vld [vmem:[#allocation5 + $0x5b8] sm:$0xf]  ;;  %v8320_v49 = vld [vmem:[#allocation5 + $0x5c0] sm:$0xf0] }
 0x11b   :  { %4666 = vmatpush.bf16.msra.mxu0 %v6407_v57  ;;  %4692 = vmatpush.bf16.msra.mxu2 %v6599_v59  ;;  %v6551_v57 = vor.u32 %v8188_v47, %v6550_v45  ;;  %v8161_v59 = vld [vmem:[#allocation5 + $0xc8] sm:$0xf0]  ;;  %v6982_v45 = vld [vmem:[#allocation5 + $0x4f8] sm:$0xf]  ;;  %v8296_v47 = vld [vmem:[#allocation5 + $0x500] sm:$0xf0] }
 0x11d   :  { %4679 = vmatpush.bf16.msra.mxu1 %v6503_v58  ;;  %4705 = vmatpush.bf16.msra.mxu3 %v6695_v63  ;;  %v6442_v58 = vld [vmem:[#allocation5 + $0xc0] sm:$0xf]  ;;  %v1842_v61 = vpop.f32.mrf.mxu2  ;;  %v8185_v63 = vld [vmem:[#allocation5 + $0x188] sm:$0xf0] }
 0x11e   :  { %v6443_v12 = vor.u32 %v8161_v59, %v6442_v58  ;;  %v6539_v13 = vor.u32 %v8185_v63, %v6538_v60  ;;  %v6874_v58 = vld [vmem:[#allocation5 + $0x420] sm:$0xf]  ;;  %v7079_v59 = vor.u32 %v8320_v49, %v7078_v48  ;;  %v8269_v60 = vld [vmem:[#allocation5 + $0x428] sm:$0xf0] }
 0x11f   :  { %4667 = vmatpush.bf16.msra.mxu0 %v6395_v4  ;;  %4693 = vmatpush.bf16.msra.mxu2 %v6587_v6  ;;  %v1855_v33 = vpop.f32.mrf.mxu3  ;;  %v6910_v4 = vld [vmem:[#allocation5 + $0x468] sm:$0xf]  ;;  %v8278_v6 = vld [vmem:[#allocation5 + $0x470] sm:$0xf0]  ;;  %v6970_v61 = vld [vmem:[#allocation5 + $0x4e0] sm:$0xf] }
 0x120   :  { %v6911_v20 = vor.u32 %v8278_v6, %v6910_v4  ;;  %v7066_v63 = vld [vmem:[#allocation5 + $0x5a0] sm:$0xf]  ;;  %v6766_v4 = vld [vmem:[#allocation5 + $0x348] sm:$0xf] }
 0x121   :  { %4680 = vmatpush.bf16.msra.mxu1 %v6491_v34  ;;  %4706 = vmatpush.bf16.msra.mxu3 %v6683_v11  ;;  %v6347_v34 = vor.u32 %v8137_v55, %v6346_v53  ;;  %v2066_v11 = vmax.f32 %v8714_v50, 0.0  ;;  %v7103_v50 = vor.u32 %v8326_v15, %v7102_v14  ;;  %v6887_v53 = vor.u32 %v8272_v44, %v6886_v51  ;;  %v6862_v6 = vld [vmem:[#allocation5 + $0x408] sm:$0xf]  ;;  %v8314_v14 = vld [vmem:[#allocation5 + $0x590] sm:$0xf0] }
 0x122   :  { %v6983_v55 = vor.u32 %v8296_v47, %v6982_v45  ;;  %v8530_v15 = vld [vmem:[#allocation7] ss:$2 sm:$0xff]  ;;  %v6742_v51 = vld [vmem:[#allocation5 + $0x318] sm:$0xf] }
 0x123   :  { %4668 = vmatpush.bf16.msra.mxu0 %v6383_v17  ;;  %4694 = vmatpush.bf16.msra.mxu2 %v6575_v19  ;;  %v2068_v17 = vmax.f32 %v8724_v54, 0.0  ;;  %v6815_v19 = vor.u32 %v8254_v3, %v6814_v2  ;;  %v8754_v54 = vpack.c.bf16 %v2066_v11, %v2066_v11  ;;  %v6875_v2 = vor.u32 %v8269_v60, %v6874_v58  ;;  %v6958_v11 = vld [vmem:[#allocation5 + $0x4c8] sm:$0xf]  ;;  %v6838_v44 = vld [vmem:[#allocation5 + $0x3d8] sm:$0xf] }
 0x124   :  { %v343_v16 = vperm.slane %v8530_v15, 6  ;;  %v8233_v60 = vld [vmem:[#allocation5 + $0x308] sm:$0xf0] }
 0x125   :  { %4681 = vmatpush.bf16.msra.mxu1 %v6479_v18  ;;  %4707 = vmatpush.bf16.msra.mxu3 %v6671_v24  ;;  %v6635_v18 = vor.u32 %v8209_v1, %v6634_v0  ;;  %v8251_v24 = vld [vmem:[#allocation5 + $0x398] sm:$0xf0]  ;;  %v8758_v42 = vpack.c.bf16 %v2068_v17, %v2068_v17  ;;  %v8317_v0 = vld [vmem:[#allocation5 + $0x5a8] sm:$0xf0]  ;;  %v344_v17 = vperm.slane %v8530_v15, 7 }
 0x126   :  { %v7067_v8 = vor.u32 %v8317_v0, %v7066_v63  ;;  %v1815_v47 = vadd.f32 %v8740_v5, %v343_v16  ;;  %v6826_v63 = vld [vmem:[#allocation5 + $0x3c0] sm:$0xf]  ;;  %v8257_v0 = vld [vmem:[#allocation5 + $0x3c8] sm:$0xf0]  ;;  %v7390_v15 = vld [vmem:[#allocation5 + $0x828] sm:$0xf] }
 0x127   :  { %4669 = vmatpush.bf16.msra.mxu0 %v6371_v36  ;;  %4695 = vmatpush.bf16.msra.mxu2 %v6563_v39  ;;  %v6803_v36 = vor.u32 %v8251_v24, %v6802_v22  ;;  %v6995_v39 = vor.u32 %v8299_v29, %v6994_v28  ;;  %v8239_v22 = vld [vmem:[#allocation5 + $0x338] sm:$0xf0]  ;;  %v6850_v24 = vld [vmem:[#allocation5 + $0x3f0] sm:$0xf]  ;;  %v1841_v48 = vadd.f32 %v8744_v23, %v344_v17  ;;  %v6922_v5 = vld [vmem:[#allocation5 + $0x480] sm:$0xf] }
 0x128   :  { %v6946_v28 = vld [vmem:[#allocation5 + $0x4b0] sm:$0xf]  ;;  %v8287_v29 = vld [vmem:[#allocation5 + $0x4b8] sm:$0xf0]  ;;  %v1828_v23 = vadd.f32 %v8742_v10, %v1815_v47  ;;  %v8398_v16 = vld [vmem:[#allocation5 + $0x830] sm:$0xf0] }
 0x129   :  { %4682 = vmatpush.bf16.msra.mxu1 %v6467_v38  ;;  %4708 = vmatpush.bf16.msra.mxu3 %v6659_v43  ;;  %v6899_v38 = vor.u32 %v8275_v25, %v6898_v26  ;;  %v7091_v43 = vor.u32 %v8323_v32, %v7090_v31  ;;  %v8263_v25 = vld [vmem:[#allocation5 + $0x3f8] sm:$0xf0]  ;;  %v7042_v32 = vld [vmem:[#allocation5 + $0x570] sm:$0xf]  ;;  %v2069_v17 = vmax.f32 %v8732_v27, 0.0  ;;  %v2070_v10 = vmax.f32 %v8734_v46, 0.0 }
 0x12a   :  { %v7378_v46 = vld [vmem:[#allocation5 + $0x810] sm:$0xf] }
 0x12b   :  { %4670 = vmatpush.bf16.msra.mxu0 %v6359_v52  ;;  %4696 = vmatpush.bf16.msra.mxu2 %v6551_v57  ;;  %v6791_v52 = vor.u32 %v8248_v41, %v6790_v40  ;;  %v8245_v57 = vld [vmem:[#allocation5 + $0x368] sm:$0xf0]  ;;  %v6851_v40 = vor.u32 %v8263_v25, %v6850_v24  ;;  %v6947_v41 = vor.u32 %v8287_v29, %v6946_v28  ;;  %v7186_v29 = vld [vmem:[#allocation5 + $0x690] sm:$0xf] }
 0x12c   :  { %v7391_v28 = vor.u32 %v8398_v16, %v7390_v15  ;;  %v7150_v15 = vld [vmem:[#allocation5 + $0x648] sm:$0xf]  ;;  %v8338_v16 = vld [vmem:[#allocation5 + $0x650] sm:$0xf0] }
 0x12d   :  { %4683 = vmatpush.bf16.msra.mxu1 %v6455_v56  ;;  %4709 = vmatpush.bf16.msra.mxu3 %v6647_v62  ;;  %v6778_v56 = vld [vmem:[#allocation5 + $0x360] sm:$0xf]  ;;  %v8293_v62 = vld [vmem:[#allocation5 + $0x4e8] sm:$0xf0] }
 0x12e   :  { %v6779_v1 = vor.u32 %v8245_v57, %v6778_v56  ;;  %v6971_v3 = vor.u32 %v8293_v62, %v6970_v61  ;;  %v7030_v56 = vld [vmem:[#allocation5 + $0x558] sm:$0xf]  ;;  %v8308_v57 = vld [vmem:[#allocation5 + $0x560] sm:$0xf0] }
 0x12f   :  { %4671 = vmatpush.bf16.msra.mxu0 %v6347_v34  ;;  %4697 = vmatpush.bf16.msra.mxu2 %v6539_v13  ;;  %v8764_v33 = vpop.f32.mrf.mxu0  ;;  %v8242_v34 = vld [vmem:[#allocation5 + $0x350] sm:$0xf0]  ;;  %v7054_v13 = vld [vmem:[#allocation5 + $0x588] sm:$0xf] }
 0x131   :  { %4684 = vmatpush.bf16.msra.mxu1 %v6443_v12  ;;  %4710 = vmatpush.bf16.msra.mxu3 %v6635_v18  ;;  %v8766_v7 = vpop.f32.mrf.mxu1  ;;  %v8290_v12 = vld [vmem:[#allocation5 + $0x4d0] sm:$0xf0]  ;;  %v6767_v18 = vor.u32 %v8242_v34, %v6766_v4  ;;  %v8281_v4 = vld [vmem:[#allocation5 + $0x488] sm:$0xf0]  ;;  %v7018_v34 = vld [vmem:[#allocation5 + $0x540] sm:$0xf] }
 0x132   :  { %4672 = vmatmul.bf16.vlgmr.msra.gmra.mxu0 %v8752_v35  ;;  %4698 = vmatmul.bf16.vlgmr.msra.gmra.mxu2 %v8756_v37 }
 0x133   :  { %4716 = vmatpush.bf16.msrb.mxu0 %v6815_v19  ;;  %4742 = vmatpush.bf16.msrb.mxu2 %v7007_v21  ;;  %v6863_v19 = vor.u32 %v8266_v9, %v6862_v6  ;;  %v6754_v21 = vld [vmem:[#allocation5 + $0x330] sm:$0xf]  ;;  %v8305_v6 = vld [vmem:[#allocation5 + $0x548] sm:$0xf0]  ;;  %v7198_v9 = vld [vmem:[#allocation5 + $0x6a8] sm:$0xf] }
 0x134   :  { %4685 = vmatmul.bf16.vlgmr.msra.gmra.mxu1 %v8754_v54  ;;  %4711 = vmatmul.bf16.vlgmr.msra.gmra.mxu3 %v8758_v42  ;;  %v7019_v24 = vor.u32 %v8305_v6, %v7018_v34  ;;  %v8389_v34 = vld [vmem:[#allocation5 + $0x7e8] sm:$0xf0]  ;;  %v7450_v6 = vld [vmem:[#allocation5 + $0x8a0] sm:$0xf] }
 0x135   :  { %4729 = vmatpush.bf16.msrb.mxu1 %v6911_v20  ;;  %4755 = vmatpush.bf16.msrb.mxu3 %v7103_v50  ;;  %v6959_v20 = vor.u32 %v8290_v12, %v6958_v11  ;;  %v8768_v26 = vpop.f32.mrf.mxu2  ;;  %v7055_v50 = vor.u32 %v8314_v14, %v7054_v13  ;;  %v8350_v11 = vld [vmem:[#allocation5 + $0x6b0] sm:$0xf0]  ;;  %v7294_v12 = vld [vmem:[#allocation5 + $0x768] sm:$0xf] }
 0x136   :  { %v8374_v14 = vld [vmem:[#allocation5 + $0x770] sm:$0xf0] }
 0x137   :  { %4717 = vmatpush.bf16.msrb.mxu0 %v6803_v36  ;;  %4743 = vmatpush.bf16.msrb.mxu2 %v6995_v39  ;;  %v8770_v31 = vpop.f32.mrf.mxu3  ;;  %v8311_v36 = vld [vmem:[#allocation5 + $0x578] sm:$0xf0]  ;;  %v1868_v39 = vpop.f32.mrf.mxu0  ;;  %v7295_v25 = vor.u32 %v8374_v14, %v7294_v12 }
 0x138   :  { %v7043_v49 = vor.u32 %v8311_v36, %v7042_v32  ;;  %v8347_v32 = vld [vmem:[#allocation5 + $0x698] sm:$0xf0]  ;;  %v7282_v36 = vld [vmem:[#allocation5 + $0x750] sm:$0xf] }
 0x139   :  { %4730 = vmatpush.bf16.msrb.mxu1 %v6899_v38  ;;  %4756 = vmatpush.bf16.msrb.mxu3 %v7091_v43  ;;  %v6755_v38 = vor.u32 %v8239_v22, %v6754_v21  ;;  %v8236_v43 = vld [vmem:[#allocation5 + $0x320] sm:$0xf0]  ;;  %v1881_v45 = vpop.f32.mrf.mxu1  ;;  %v2071_v21 = vmax.f32 %v1828_v23, 0.0  ;;  %v8395_v39 = vld [vmem:[#allocation5 + $0x818] sm:$0xf0] }
 0x13a   :  { %v6743_v58 = vor.u32 %v8236_v43, %v6742_v51  ;;  %v8778_v51 = vpack.c.bf16 %v2069_v17, %v2069_v17  ;;  %v8780_v43 = vpack.c.bf16 %v2070_v10, %v2070_v10  ;;  %v7258_v23 = vld [vmem:[#allocation5 + $0x720] sm:$0xf]  ;;  %v7246_v17 = vld [vmem:[#allocation5 + $0x708] sm:$0xf] }
 0x13b   :  { %4718 = vmatpush.bf16.msrb.mxu0 %v6791_v52  ;;  %4744 = vmatpush.bf16.msrb.mxu2 %v6983_v55  ;;  %v8260_v52 = vld [vmem:[#allocation5 + $0x3e0] sm:$0xf0]  ;;  %v8782_v45 = vpack.c.bf16 %v2071_v21, %v2071_v21  ;;  %v7438_v21 = vld [vmem:[#allocation5 + $0x888] sm:$0xf] }
 0x13c   :  { %v8284_v55 = vld [vmem:[#allocation5 + $0x4a0] sm:$0xf0]  ;;  %v6839_v61 = vor.u32 %v8260_v52, %v6838_v44  ;;  %v7187_v44 = vor.u32 %v8347_v32, %v7186_v29 }
 0x13d   :  { %4731 = vmatpush.bf16.msrb.mxu1 %v6887_v53  ;;  %4757 = vmatpush.bf16.msrb.mxu3 %v7079_v59  ;;  %v6934_v53 = vld [vmem:[#allocation5 + $0x498] sm:$0xf]  ;;  %v6730_v59 = vld [vmem:[#allocation5 + $0x300] sm:$0xf]  ;;  %v8344_v52 = vld [vmem:[#allocation5 + $0x680] sm:$0xf0] }
 0x13e   :  { %v6935_v62 = vor.u32 %v8284_v55, %v6934_v53  ;;  %v6731_v13 = vor.u32 %v8233_v60, %v6730_v59  ;;  %v7270_v53 = vld [vmem:[#allocation5 + $0x738] sm:$0xf]  ;;  %v8392_v59 = vld [vmem:[#allocation5 + $0x800] sm:$0xf0] }
 0x13f   :  { %4719 = vmatpush.bf16.msrb.mxu0 %v6779_v1  ;;  %4745 = vmatpush.bf16.msrb.mxu2 %v6971_v3  ;;  %v1894_v1 = vpop.f32.mrf.mxu2  ;;  %v7031_v3 = vor.u32 %v8308_v57, %v7030_v56  ;;  %v8368_v57 = vld [vmem:[#allocation5 + $0x740] sm:$0xf0]  ;;  %v7462_v60 = vld [vmem:[#allocation5 + $0x8b8] sm:$0xf] }
 0x140   :  { %v8341_v1 = vld [vmem:[#allocation5 + $0x668] sm:$0xf0] }
 0x141   :  { %4732 = vmatpush.bf16.msrb.mxu1 %v6875_v2  ;;  %4758 = vmatpush.bf16.msrb.mxu3 %v7067_v8  ;;  %v1854_v2 = vadd.f32 %v8746_v30, %v1841_v48  ;;  %v1907_v8 = vpop.f32.mrf.mxu3  ;;  %v6827_v30 = vor.u32 %v8257_v0, %v6826_v63  ;;  %v7379_v48 = vor.u32 %v8395_v39, %v7378_v46 }
 0x142   :  { %v7271_v63 = vor.u32 %v8368_v57, %v7270_v53  ;;  %v8413_v8 = vld [vmem:[#allocation5 + $0x8a8] sm:$0xf0] }
 0x143   :  { %4720 = vmatpush.bf16.msrb.mxu0 %v6767_v18  ;;  %4746 = vmatpush.bf16.msrb.mxu2 %v6959_v20  ;;  %v6923_v18 = vor.u32 %v8281_v4, %v6922_v5  ;;  %v8422_v20 = vld [vmem:[#allocation5 + $0x8f0] sm:$0xf0]  ;;  %v2072_v22 = vmax.f32 %v1854_v2, 0.0  ;;  %v7162_v5 = vld [vmem:[#allocation5 + $0x660] sm:$0xf] }
 0x144   :  { %v7354_v4 = vld [vmem:[#allocation5 + $0x7e0] sm:$0xf] }
 0x145   :  { %4733 = vmatpush.bf16.msrb.mxu1 %v6863_v19  ;;  %4759 = vmatpush.bf16.msrb.mxu3 %v7055_v50  ;;  %v7486_v19 = vld [vmem:[#allocation5 + $0x8e8] sm:$0xf]  ;;  %v7199_v50 = vor.u32 %v8350_v11, %v7198_v9  ;;  %v8784_v55 = vpack.c.bf16 %v2072_v22, %v2072_v22  ;;  %v8790_v9 = vld [vmem:[#allocation7 + $0x10] ss:$2 sm:$0xff]  ;;  %v7163_v11 = vor.u32 %v8341_v1, %v7162_v5 }
 0x146   :  { %v7487_v27 = vor.u32 %v8422_v20, %v7486_v19  ;;  %v7355_v14 = vor.u32 %v8389_v34, %v7354_v4  ;;  %v7342_v19 = vld [vmem:[#allocation5 + $0x7c8] sm:$0xf]  ;;  %v8386_v20 = vld [vmem:[#allocation5 + $0x7d0] sm:$0xf0]  ;;  %v346_v39 = vperm.slane %v8790_v9, 1 }
 0x147   :  { %4721 = vmatpush.bf16.msrb.mxu0 %v6755_v38  ;;  %4747 = vmatpush.bf16.msrb.mxu2 %v6947_v41  ;;  %v8371_v38 = vld [vmem:[#allocation5 + $0x758] sm:$0xf0]  ;;  %v8410_v22 = vld [vmem:[#allocation5 + $0x890] sm:$0xf0]  ;;  %v7343_v32 = vor.u32 %v8386_v20, %v7342_v19  ;;  %v7414_v4 = vld [vmem:[#allocation5 + $0x858] sm:$0xf] }
 0x148   :  { %v8419_v41 = vld [vmem:[#allocation5 + $0x8d8] sm:$0xf0]  ;;  %v7283_v47 = vor.u32 %v8371_v38, %v7282_v36  ;;  %v7234_v36 = vld [vmem:[#allocation5 + $0x6f0] sm:$0xf]  ;;  %v347_v38 = vperm.slane %v8790_v9, 2  ;;  %v1893_v5 = vadd.f32 %v8768_v26, %v346_v39 }
 0x149   :  { %4734 = vmatpush.bf16.msrb.mxu1 %v6851_v40  ;;  %4760 = vmatpush.bf16.msrb.mxu3 %v7043_v49  ;;  %v7474_v40 = vld [vmem:[#allocation5 + $0x8d0] sm:$0xf]  ;;  %v7174_v49 = vld [vmem:[#allocation5 + $0x678] sm:$0xf]  ;;  %v8404_v34 = vld [vmem:[#allocation5 + $0x860] sm:$0xf0] }
 0x14a   :  { %v7475_v56 = vor.u32 %v8419_v41, %v7474_v40  ;;  %v7439_v40 = vor.u32 %v8410_v22, %v7438_v21  ;;  %v7330_v41 = vld [vmem:[#allocation5 + $0x7b0] sm:$0xf]  ;;  %v7210_v26 = vld [vmem:[#allocation5 + $0x6c0] sm:$0xf]  ;;  %v7415_v19 = vor.u32 %v8404_v34, %v7414_v4  ;;  %v8377_v21 = vld [vmem:[#allocation5 + $0x788] sm:$0xf0] }
 0x14b   :  { %4722 = vmatpush.bf16.msrb.mxu0 %v6743_v58  ;;  %4748 = vmatpush.bf16.msrb.mxu2 %v6935_v62  ;;  %v7366_v58 = vld [vmem:[#allocation5 + $0x7f8] sm:$0xf]  ;;  %v7175_v62 = vor.u32 %v8344_v52, %v7174_v49  ;;  %v7426_v49 = vld [vmem:[#allocation5 + $0x870] sm:$0xf]  ;;  %v8407_v52 = vld [vmem:[#allocation5 + $0x878] sm:$0xf0] }
 0x14c   :  { %v7367_v0 = vor.u32 %v8392_v59, %v7366_v58  ;;  %v7427_v1 = vor.u32 %v8407_v52, %v7426_v49  ;;  %v8401_v22 = vld [vmem:[#allocation5 + $0x848] sm:$0xf0]  ;;  %v7870_v39 = vld [vmem:[#allocation5 + $0xbe8] sm:$0xf]  ;;  %v7558_v4 = vld [vmem:[#allocation5 + $0x978] sm:$0xf] }
 0x14d   :  { %4735 = vmatpush.bf16.msrb.mxu1 %v6839_v61  ;;  %4761 = vmatpush.bf16.msrb.mxu3 %v7031_v3  ;;  %v8416_v61 = vld [vmem:[#allocation5 + $0x8c0] sm:$0xf0]  ;;  %v8365_v3 = vld [vmem:[#allocation5 + $0x728] sm:$0xf0] }
 0x14e   :  { %v7463_v2 = vor.u32 %v8416_v61, %v7462_v60  ;;  %v7126_v61 = vld [vmem:[#allocation5 + $0x618] sm:$0xf]  ;;  %v8440_v34 = vld [vmem:[#allocation5 + $0x980] sm:$0xf0] }
 0x14f   :  { %4723 = vmatpush.bf16.msrb.mxu0 %v6731_v13  ;;  %4749 = vmatpush.bf16.msrb.mxu2 %v6923_v18  ;;  %v1918_v12 = vpop.f32.mrf.mxu0  ;;  %v7259_v13 = vor.u32 %v8365_v3, %v7258_v23  ;;  %v8362_v18 = vld [vmem:[#allocation5 + $0x710] sm:$0xf0]  ;;  %v7318_v3 = vld [vmem:[#allocation5 + $0x798] sm:$0xf] }
 0x150   :  { %v7247_v29 = vor.u32 %v8362_v18, %v7246_v17  ;;  %v1919_v60 = vadd.f32 %v1918_v12, %v347_v38  ;;  %v8329_v12 = vld [vmem:[#allocation5 + $0x608] sm:$0xf0]  ;;  %v7306_v17 = vld [vmem:[#allocation5 + $0x780] sm:$0xf]  ;;  %v1906_v18 = vadd.f32 %v8770_v31, %v1893_v5 }
 0x151   :  { %4736 = vmatpush.bf16.msrb.mxu1 %v6827_v30  ;;  %4762 = vmatpush.bf16.msrb.mxu3 %v7019_v24  ;;  %v1931_v10 = vpop.f32.mrf.mxu1  ;;  %v7451_v30 = vor.u32 %v8413_v8, %v7450_v6  ;;  %v345_v24 = vperm.slane %v8790_v9, 0 }
 0x152   :  { %4724 = vmatmul.bf16.vlgmr.msrb.gmra.mxu0 %v8778_v51  ;;  %4750 = vmatmul.bf16.vlgmr.msrb.gmra.mxu2 %v8782_v45 }
 0x153   :  { %4768 = vmatpush.bf16.msra.mxu0 %v7199_v50  ;;  %4794 = vmatpush.bf16.msra.mxu2 %v7391_v28  ;;  %v7151_v50 = vor.u32 %v8338_v16, %v7150_v15  ;;  %v8335_v28 = vld [vmem:[#allocation5 + $0x638] sm:$0xf0]  ;;  %v1867_v53 = vadd.f32 %v8764_v33, %v345_v24  ;;  %v8380_v33 = vld [vmem:[#allocation5 + $0x7a0] sm:$0xf0]  ;;  %v8353_v16 = vld [vmem:[#allocation5 + $0x6c8] sm:$0xf0] }
 0x154   :  { %4737 = vmatmul.bf16.vlgmr.msrb.gmra.mxu1 %v8780_v43  ;;  %4763 = vmatmul.bf16.vlgmr.msrb.gmra.mxu3 %v8784_v55  ;;  %v7319_v15 = vor.u32 %v8380_v33, %v7318_v3  ;;  %v7211_v31 = vor.u32 %v8353_v16, %v7210_v26  ;;  %v7559_v26 = vor.u32 %v8440_v34, %v7558_v4 }
 0x155   :  { %4781 = vmatpush.bf16.msra.mxu1 %v7295_v25  ;;  %4807 = vmatpush.bf16.msra.mxu3 %v7487_v27  ;;  %v7138_v25 = vld [vmem:[#allocation5 + $0x630] sm:$0xf]  ;;  %v8359_v27 = vld [vmem:[#allocation5 + $0x6f8] sm:$0xf0]  ;;  %v1944_v46 = vpop.f32.mrf.mxu2  ;;  %v1880_v6 = vadd.f32 %v8766_v7, %v1867_v53  ;;  %v7402_v7 = vld [vmem:[#allocation5 + $0x840] sm:$0xf] }
 0x156   :  { %v7235_v58 = vor.u32 %v8359_v27, %v7234_v36  ;;  %v8494_v36 = vld [vmem:[#allocation5 + $0xb30] sm:$0xf0]  ;;  %v7570_v53 = vld [vmem:[#allocation5 + $0x990] sm:$0xf] }
 0x157   :  { %4769 = vmatpush.bf16.msra.mxu0 %v7187_v44  ;;  %4795 = vmatpush.bf16.msra.mxu2 %v7379_v48  ;;  %v8383_v44 = vld [vmem:[#allocation5 + $0x7b8] sm:$0xf0]  ;;  %v1957_v48 = vpop.f32.mrf.mxu3  ;;  %v1920_v57 = vpop.f32.mrf.mxu0  ;;  %v2073_v27 = vmax.f32 %v1880_v6, 0.0  ;;  %v7654_v6 = vld [vmem:[#allocation5 + $0xa38] sm:$0xf] }
 0x158   :  { %v7331_v59 = vor.u32 %v8383_v44, %v7330_v41  ;;  %v2074_v41 = vmax.f32 %v1906_v18, 0.0  ;;  %v7666_v57 = vld [vmem:[#allocation5 + $0xa50] sm:$0xf]  ;;  %v8437_v18 = vld [vmem:[#allocation5 + $0x968] sm:$0xf0] }
 0x159   :  { %4782 = vmatpush.bf16.msra.mxu1 %v7283_v47  ;;  %4808 = vmatpush.bf16.msra.mxu3 %v7475_v56  ;;  %v348_v47 = vperm.slane %v8790_v9, 3  ;;  %v7139_v56 = vor.u32 %v8335_v28, %v7138_v25  ;;  %v8446_v25 = vld [vmem:[#allocation5 + $0x9b0] sm:$0xf0]  ;;  %v7678_v28 = vld [vmem:[#allocation5 + $0xa68] sm:$0xf]  ;;  %v8802_v5 = vpack.c.bf16 %v2073_v27, %v2073_v27 }
 0x15a   :  { %v7630_v27 = vld [vmem:[#allocation5 + $0xa08] sm:$0xf] }
 0x15b   :  { %4770 = vmatpush.bf16.msra.mxu0 %v7175_v62  ;;  %4796 = vmatpush.bf16.msra.mxu2 %v7367_v0  ;;  %v8332_v62 = vld [vmem:[#allocation5 + $0x620] sm:$0xf0]  ;;  %v1933_v0 = vpop.f32.mrf.mxu1  ;;  %v1945_v23 = vadd.f32 %v1944_v46, %v348_v47  ;;  %v7307_v46 = vor.u32 %v8377_v21, %v7306_v17  ;;  %v7403_v47 = vor.u32 %v8401_v22, %v7402_v7  ;;  %v8461_v21 = vld [vmem:[#allocation5 + $0xa28] sm:$0xf0]  ;;  %v7738_v7 = vld [vmem:[#allocation5 + $0xae0] sm:$0xf] }
 0x15c   :  { %v7127_v8 = vor.u32 %v8332_v62, %v7126_v61  ;;  %v8491_v61 = vld [vmem:[#allocation5 + $0xb18] sm:$0xf0]  ;;  %v8485_v22 = vld [vmem:[#allocation5 + $0xae8] sm:$0xf0] }
 0x15d   :  { %4783 = vmatpush.bf16.msra.mxu1 %v7271_v63  ;;  %4809 = vmatpush.bf16.msra.mxu3 %v7463_v2  ;;  %v7222_v63 = vld [vmem:[#allocation5 + $0x6d8] sm:$0xf]  ;;  %v8356_v2 = vld [vmem:[#allocation5 + $0x6e0] sm:$0xf0]  ;;  %v1958_v20 = vadd.f32 %v1957_v48, %v1945_v23  ;;  %v8515_v0 = vld [vmem:[#allocation5 + $0xbd8] sm:$0xf0] }
 0x15f   :  { %4771 = vmatpush.bf16.msra.mxu0 %v7163_v11  ;;  %4797 = vmatpush.bf16.msra.mxu2 %v7355_v14  ;;  %v7114_v11 = vld [vmem:[#allocation5 + $0x600] sm:$0xf]  ;;  %v7223_v14 = vor.u32 %v8356_v2, %v7222_v63  ;;  %v1959_v24 = vpop.f32.mrf.mxu3  ;;  %v2076_v44 = vmax.f32 %v1958_v20, 0.0  ;;  %v7858_v63 = vld [vmem:[#allocation5 + $0xbd0] sm:$0xf]  ;;  %v8806_v2 = vpack.c.bf16 %v2074_v41, %v2074_v41 }
 0x160   :  { %v7834_v24 = vld [vmem:[#allocation5 + $0xba0] sm:$0xf]  ;;  %v7822_v41 = vld [vmem:[#allocation5 + $0xb88] sm:$0xf] }
 0x161   :  { %4784 = vmatpush.bf16.msra.mxu1 %v7259_v13  ;;  %4810 = vmatpush.bf16.msra.mxu3 %v7451_v30  ;;  %v1932_v13 = vadd.f32 %v1931_v10, %v1919_v60  ;;  %v1946_v30 = vpop.f32.mrf.mxu2  ;;  %v7115_v10 = vor.u32 %v8329_v12, %v7114_v11  ;;  %v7762_v60 = vld [vmem:[#allocation5 + $0xb10] sm:$0xf]  ;;  %v8464_v11 = vld [vmem:[#allocation5 + $0xa40] sm:$0xf0]  ;;  %v7750_v12 = vld [vmem:[#allocation5 + $0xaf8] sm:$0xf] }
 0x162   :  { %v7763_v33 = vor.u32 %v8491_v61, %v7762_v60  ;;  %v7655_v16 = vor.u32 %v8464_v11, %v7654_v6  ;;  %v7546_v30 = vld [vmem:[#allocation5 + $0x960] sm:$0xf]  ;;  %v8455_v61 = vld [vmem:[#allocation5 + $0x9f8] sm:$0xf0] }
 0x163   :  { %4772 = vmatpush.bf16.msra.mxu0 %v7151_v50  ;;  %4798 = vmatpush.bf16.msra.mxu2 %v7343_v32  ;;  %v7582_v50 = vld [vmem:[#allocation5 + $0x9a8] sm:$0xf]  ;;  %v2075_v38 = vmax.f32 %v1932_v13, 0.0  ;;  %v8488_v13 = vld [vmem:[#allocation5 + $0xb00] sm:$0xf0] }
 0x164   :  { %v7774_v32 = vld [vmem:[#allocation5 + $0xb28] sm:$0xf]  ;;  %v7583_v48 = vor.u32 %v8446_v25, %v7582_v50  ;;  %v7751_v17 = vor.u32 %v8488_v13, %v7750_v12  ;;  %v8509_v50 = vld [vmem:[#allocation5 + $0xba8] sm:$0xf0]  ;;  %v7547_v25 = vor.u32 %v8437_v18, %v7546_v30  ;;  %v7510_v13 = vld [vmem:[#allocation5 + $0x918] sm:$0xf] }
 0x165   :  { %4785 = vmatpush.bf16.msra.mxu1 %v7247_v29  ;;  %4811 = vmatpush.bf16.msra.mxu3 %v7439_v40  ;;  %v8470_v29 = vld [vmem:[#allocation5 + $0xa70] sm:$0xf0]  ;;  %v7775_v52 = vor.u32 %v8494_v36, %v7774_v32  ;;  %v8800_v62 = vpack.c.bf16 %v2075_v38, %v2075_v38  ;;  %v7534_v32 = vld [vmem:[#allocation5 + $0x948] sm:$0xf]  ;;  %v7702_v30 = vld [vmem:[#allocation5 + $0xa98] sm:$0xf] }
 0x166   :  { %v8518_v40 = vld [vmem:[#allocation5 + $0xbf0] sm:$0xf0]  ;;  %v7679_v49 = vor.u32 %v8470_v29, %v7678_v28  ;;  %v7739_v29 = vor.u32 %v8485_v22, %v7738_v7  ;;  %v8476_v18 = vld [vmem:[#allocation5 + $0xaa0] sm:$0xf0]  ;;  %v7498_v22 = vld [vmem:[#allocation5 + $0x900] sm:$0xf] }
 0x167   :  { %4773 = vmatpush.bf16.msra.mxu0 %v7139_v56  ;;  %4799 = vmatpush.bf16.msra.mxu2 %v7331_v59  ;;  %v8443_v56 = vld [vmem:[#allocation5 + $0x998] sm:$0xf0]  ;;  %v8434_v36 = vld [vmem:[#allocation5 + $0x950] sm:$0xf0] }
 0x168   :  { %v8467_v59 = vld [vmem:[#allocation5 + $0xa58] sm:$0xf0]  ;;  %v7571_v23 = vor.u32 %v8443_v56, %v7570_v53 }
 0x169   :  { %4786 = vmatpush.bf16.msra.mxu1 %v7235_v58  ;;  %4812 = vmatpush.bf16.msra.mxu3 %v7427_v1  ;;  %v7871_v58 = vor.u32 %v8518_v40, %v7870_v39  ;;  %v8804_v1 = vpack.c.bf16 %v2076_v44, %v2076_v44  ;;  %v7667_v3 = vor.u32 %v8467_v59, %v7666_v57  ;;  %v7726_v39 = vld [vmem:[#allocation5 + $0xac8] sm:$0xf]  ;;  %v8482_v40 = vld [vmem:[#allocation5 + $0xad0] sm:$0xf0]  ;;  %v8431_v56 = vld [vmem:[#allocation5 + $0x938] sm:$0xf0] }
 0x16a   :  { %v8506_v44 = vld [vmem:[#allocation5 + $0xb90] sm:$0xf0]  ;;  %v7727_v53 = vor.u32 %v8482_v40, %v7726_v39  ;;  %v7618_v57 = vld [vmem:[#allocation5 + $0x9f0] sm:$0xf]  ;;  %v8497_v39 = vld [vmem:[#allocation5 + $0xb48] sm:$0xf0] }
 0x16b   :  { %4774 = vmatpush.bf16.msra.mxu0 %v7127_v8  ;;  %4800 = vmatpush.bf16.msra.mxu2 %v7319_v15  ;;  %v7859_v8 = vor.u32 %v8515_v0, %v7858_v63  ;;  %v8512_v15 = vld [vmem:[#allocation5 + $0xbc0] sm:$0xf0]  ;;  %v7823_v60 = vor.u32 %v8506_v44, %v7822_v41  ;;  %v7714_v63 = vld [vmem:[#allocation5 + $0xab0] sm:$0xf]  ;;  %v8479_v0 = vld [vmem:[#allocation5 + $0xab8] sm:$0xf0] }
 0x16c   :  { %v7715_v11 = vor.u32 %v8479_v0, %v7714_v63  ;;  %v8157_v40 = vld [vmem:[#allocation5 + $0xac] sm:$0xf] }
 0x16d   :  { %4787 = vmatpush.bf16.msra.mxu1 %v7223_v14  ;;  %4813 = vmatpush.bf16.msra.mxu3 %v7415_v19  ;;  %v7846_v14 = vld [vmem:[#allocation5 + $0xbb8] sm:$0xf]  ;;  %v7642_v19 = vld [vmem:[#allocation5 + $0xa20] sm:$0xf]  ;;  %v8181_v44 = vld [vmem:[#allocation5 + $0x16c] sm:$0xf] }
 0x16e   :  { %v7847_v20 = vor.u32 %v8512_v15, %v7846_v14  ;;  %v8428_v14 = vld [vmem:[#allocation5 + $0x920] sm:$0xf0]  ;;  %v7606_v15 = vld [vmem:[#allocation5 + $0x9d8] sm:$0xf] }
 0x16f   :  { %4775 = vmatpush.bf16.msra.mxu0 %v7115_v10  ;;  %4801 = vmatpush.bf16.msra.mxu2 %v7307_v46  ;;  %v1970_v28 = vpop.f32.mrf.mxu0  ;;  %v7643_v10 = vor.u32 %v8461_v21, %v7642_v19  ;;  %v8458_v46 = vld [vmem:[#allocation5 + $0xa10] sm:$0xf0]  ;;  %v7798_v19 = vld [vmem:[#allocation5 + $0xb58] sm:$0xf]  ;;  %v7511_v7 = vor.u32 %v8428_v14, %v7510_v13 }
 0x170   :  { %v8226_v14 = vld [vmem:[#allocation5 + $0x2d4] sm:$0xf] }
 0x171   :  { %4788 = vmatpush.bf16.msra.mxu1 %v7211_v31  ;;  %4814 = vmatpush.bf16.msra.mxu3 %v7403_v47  ;;  %v1983_v38 = vpop.f32.mrf.mxu1  ;;  %v7835_v31 = vor.u32 %v8509_v50, %v7834_v24  ;;  %v7535_v47 = vor.u32 %v8434_v36, %v7534_v32  ;;  %v8425_v24 = vld [vmem:[#allocation5 + $0x908] sm:$0xf0]  ;;  %v7594_v50 = vld [vmem:[#allocation5 + $0x9c0] sm:$0xf] }
 0x172   :  { %4776 = vmatmul.bf16.vlgmr.msra.gmra.mxu0 %v8802_v5  ;;  %4802 = vmatmul.bf16.vlgmr.msra.gmra.mxu2 %v8800_v62  ;;  %v7690_v32 = vld [vmem:[#allocation5 + $0xa80] sm:$0xf]  ;;  %v8473_v36 = vld [vmem:[#allocation5 + $0xa88] sm:$0xf0] }
 0x173   :  { %4820 = vmatpush.bf16.msrb.mxu0 %v7583_v48  ;;  %4846 = vmatpush.bf16.msrb.mxu2 %v7775_v52  ;;  %v7522_v48 = vld [vmem:[#allocation5 + $0x930] sm:$0xf]  ;;  %v7631_v52 = vor.u32 %v8458_v46, %v7630_v27  ;;  %v7786_v46 = vld [vmem:[#allocation5 + $0xb40] sm:$0xf] }
 0x174   :  { %4789 = vmatmul.bf16.vlgmr.msra.gmra.mxu1 %v8806_v2  ;;  %4815 = vmatmul.bf16.vlgmr.msra.gmra.mxu3 %v8804_v1  ;;  %v7523_v4 = vor.u32 %v8431_v56, %v7522_v48 }
 0x175   :  { %4833 = vmatpush.bf16.msrb.mxu1 %v7679_v49  ;;  %4859 = vmatpush.bf16.msrb.mxu3 %v7871_v58  ;;  %v349_v49 = vperm.slane %v8790_v9, 4  ;;  %v350_v58 = vperm.slane %v8790_v9, 5  ;;  %v1996_v59 = vpop.f32.mrf.mxu2 }
 0x177   :  { %4821 = vmatpush.bf16.msrb.mxu0 %v7571_v23  ;;  %4847 = vmatpush.bf16.msrb.mxu2 %v7763_v33  ;;  %v2009_v23 = vpop.f32.mrf.mxu3  ;;  %v8503_v33 = vld [vmem:[#allocation5 + $0xb78] sm:$0xf0]  ;;  %v1971_v34 = vadd.f32 %v1970_v28, %v349_v49  ;;  %v1972_v6 = vpop.f32.mrf.mxu0  ;;  %v1997_v12 = vadd.f32 %v1996_v59, %v350_v58  ;;  %v7703_v28 = vor.u32 %v8476_v18, %v7702_v30  ;;  %v8229_v59 = vld [vmem:[#allocation5 + $0x2ec] sm:$0xf]  ;;  %v6408_v18 = vld [vmem:[#allocation5 + $0x84] sm:$0xf0] }
 0x178   :  { %v7499_v49 = vor.u32 %v8425_v24, %v7498_v22  ;;  %v7691_v58 = vor.u32 %v8473_v36, %v7690_v32  ;;  %v8151_v30 = vld [vmem:[#allocation5 + $0x7c] sm:$0xf]  ;;  %v6600_v22 = vld [vmem:[#allocation5 + $0x204] sm:$0xf0]  ;;  %v8148_v32 = vld [vmem:[#allocation5 + $0x64] sm:$0xf] }
 0x179   :  { %4834 = vmatpush.bf16.msrb.mxu1 %v7667_v3  ;;  %4860 = vmatpush.bf16.msrb.mxu3 %v7859_v8  ;;  %v7810_v3 = vld [vmem:[#allocation5 + $0xb70] sm:$0xf]  ;;  %v7619_v8 = vor.u32 %v8455_v61, %v7618_v57  ;;  %v1984_v21 = vadd.f32 %v1983_v38, %v1971_v34  ;;  %v6432_v38 = vld [vmem:[#allocation5 + $0xb4] sm:$0xf0]  ;;  %v7787_v61 = vor.u32 %v8497_v39, %v7786_v46  ;;  %v8223_v24 = vld [vmem:[#allocation5 + $0x2bc] sm:$0xf] }
 0x17a   :  { %v6435_v63 = vor.u32 %v8157_v40, %v6432_v38  ;;  %v6396_v36 = vld [vmem:[#allocation5 + $0x6c] sm:$0xf0]  ;;  %v8196_v39 = vld [vmem:[#allocation5 + $0x1e4] sm:$0xf] }
 0x17b   :  { %4822 = vmatpush.bf16.msrb.mxu0 %v7559_v26  ;;  %4848 = vmatpush.bf16.msrb.mxu2 %v7751_v17  ;;  %v1985_v26 = vpop.f32.mrf.mxu1  ;;  %v8452_v17 = vld [vmem:[#allocation5 + $0x9e0] sm:$0xf0]  ;;  %v2077_v48 = vmax.f32 %v1984_v21, 0.0  ;;  %v6504_v21 = vld [vmem:[#allocation5 + $0x144] sm:$0xf0] }
 0x17c   :  { %v6492_v46 = vld [vmem:[#allocation5 + $0x12c] sm:$0xf0]  ;;  %v8220_v38 = vld [vmem:[#allocation5 + $0x2a4] sm:$0xf] }
 0x17d   :  { %4835 = vmatpush.bf16.msrb.mxu1 %v7655_v16  ;;  %4861 = vmatpush.bf16.msrb.mxu3 %v7847_v20  ;;  %v7811_v16 = vor.u32 %v8503_v33, %v7810_v3  ;;  %v8500_v20 = vld [vmem:[#allocation5 + $0xb60] sm:$0xf0]  ;;  %v1998_v27 = vpop.f32.mrf.mxu2  ;;  %v8154_v3 = vld [vmem:[#allocation5 + $0x94] sm:$0xf]  ;;  %v6420_v33 = vld [vmem:[#allocation5 + $0x9c] sm:$0xf0]  ;;  %v8814_v34 = vpack.c.bf16 %v2077_v48, %v2077_v48  ;;  %v6399_v48 = vor.u32 %v8148_v32, %v6396_v36 }
 0x17e   :  { %v6423_v26 = vor.u32 %v8154_v3, %v6420_v33  ;;  %v8172_v27 = vld [vmem:[#allocation5 + $0x124] sm:$0xf]  ;;  %v6588_v40 = vld [vmem:[#allocation5 + $0x1ec] sm:$0xf0]  ;;  %v6672_v3 = vld [vmem:[#allocation5 + $0x294] sm:$0xf0] }
 0x17f   :  { %4823 = vmatpush.bf16.msrb.mxu0 %v7547_v25  ;;  %4849 = vmatpush.bf16.msrb.mxu2 %v7739_v29  ;;  %v7607_v25 = vor.u32 %v8452_v17, %v7606_v15  ;;  %v8449_v29 = vld [vmem:[#allocation5 + $0x9c8] sm:$0xf0]  ;;  %v2011_v41 = vpop.f32.mrf.mxu3  ;;  %v6708_v15 = vld [vmem:[#allocation5 + $0x2dc] sm:$0xf0]  ;;  %v352_v33 = vperm.slane %v8790_v9, 7 }
 0x180   :  { %v7595_v57 = vor.u32 %v8449_v29, %v7594_v50  ;;  %v6696_v50 = vld [vmem:[#allocation5 + $0x2c4] sm:$0xf0]  ;;  %v8163_v36 = vld [vmem:[#allocation5 + $0xdc] sm:$0xf] }
 0x181   :  { %4836 = vmatpush.bf16.msrb.mxu1 %v7643_v10  ;;  %4862 = vmatpush.bf16.msrb.mxu3 %v7835_v31  ;;  %v2010_v10 = vadd.f32 %v2009_v23, %v1997_v12  ;;  %v7799_v31 = vor.u32 %v8500_v20, %v7798_v19  ;;  %v6612_v12 = vld [vmem:[#allocation5 + $0x21c] sm:$0xf0]  ;;  %v8175_v19 = vld [vmem:[#allocation5 + $0x13c] sm:$0xf]  ;;  %v6711_v20 = vor.u32 %v8226_v14, %v6708_v15  ;;  %v8166_v15 = vld [vmem:[#allocation5 + $0xf4] sm:$0xf] }
 0x182   :  { %v6372_v14 = vld [vmem:[#allocation5 + $0x3c] sm:$0xf0]  ;;  %v6360_v32 = vld [vmem:[#allocation5 + $0x24] sm:$0xf0] }
 0x183   :  { %4824 = vmatpush.bf16.msrb.mxu0 %v7535_v47  ;;  %4850 = vmatpush.bf16.msrb.mxu2 %v7727_v53  ;;  %v6528_v47 = vld [vmem:[#allocation5 + $0x174] sm:$0xf0]  ;;  %v2078_v56 = vmax.f32 %v2010_v10, 0.0  ;;  %v6507_v10 = vor.u32 %v8175_v19, %v6504_v21  ;;  %v8190_v19 = vld [vmem:[#allocation5 + $0x1b4] sm:$0xf] }
 0x184   :  { %v6624_v53 = vld [vmem:[#allocation5 + $0x234] sm:$0xf0]  ;;  %v6531_v0 = vor.u32 %v8181_v44, %v6528_v47  ;;  %v6684_v44 = vld [vmem:[#allocation5 + $0x2ac] sm:$0xf0] }
 0x185   :  { %4837 = vmatpush.bf16.msrb.mxu1 %v7631_v52  ;;  %4863 = vmatpush.bf16.msrb.mxu3 %v7823_v60  ;;  %v8205_v52 = vld [vmem:[#allocation5 + $0x22c] sm:$0xf]  ;;  %v6720_v60 = vld [vmem:[#allocation5 + $0x2f4] sm:$0xf0]  ;;  %v8816_v13 = vpack.c.bf16 %v2078_v56, %v2078_v56 }
 0x186   :  { %v6627_v23 = vor.u32 %v8205_v52, %v6624_v53  ;;  %v6723_v6 = vor.u32 %v8229_v59, %v6720_v60  ;;  %v6591_v52 = vor.u32 %v8196_v39, %v6588_v40  ;;  %v8145_v56 = vld [vmem:[#allocation5 + $0x4c] sm:$0xf]  ;;  %v6687_v59 = vor.u32 %v8220_v38, %v6684_v44  ;;  %v6552_v39 = vld [vmem:[#allocation5 + $0x1a4] sm:$0xf0] }
 0x187   :  { %4825 = vmatpush.bf16.msrb.mxu0 %v7523_v4  ;;  %4851 = vmatpush.bf16.msrb.mxu2 %v7715_v11  ;;  %v8178_v4 = vld [vmem:[#allocation5 + $0x154] sm:$0xf]  ;;  %v6648_v38 = vld [vmem:[#allocation5 + $0x264] sm:$0xf0] }
 0x188   :  { %v8202_v11 = vld [vmem:[#allocation5 + $0x214] sm:$0xf] }
 0x189   :  { %4838 = vmatpush.bf16.msrb.mxu1 %v7619_v8  ;;  %4864 = vmatpush.bf16.msrb.mxu3 %v7811_v16  ;;  %v6516_v8 = vld [vmem:[#allocation5 + $0x15c] sm:$0xf0]  ;;  %v6615_v17 = vor.u32 %v8202_v11, %v6612_v12  ;;  %v8142_v12 = vld [vmem:[#allocation5 + $0x34] sm:$0xf] }
 0x18a   :  { %v6519_v16 = vor.u32 %v8178_v4, %v6516_v8 }
 0x18b   :  { %4826 = vmatpush.bf16.msrb.mxu0 %v7511_v7  ;;  %4852 = vmatpush.bf16.msrb.mxu2 %v7703_v28  ;;  %v8199_v7 = vld [vmem:[#allocation5 + $0x1fc] sm:$0xf]  ;;  %v351_v28 = vperm.slane %v8790_v9, 6 }
 0x18c   :  { %v6603_v29 = vor.u32 %v8199_v7, %v6600_v22  ;;  %v8214_v7 = vld [vmem:[#allocation5 + $0x274] sm:$0xf]  ;;  %v6660_v22 = vld [vmem:[#allocation5 + $0x27c] sm:$0xf0] }
 0x18d   :  { %4839 = vmatpush.bf16.msrb.mxu1 %v7607_v25  ;;  %4865 = vmatpush.bf16.msrb.mxu3 %v7799_v31  ;;  %v6411_v25 = vor.u32 %v8151_v30, %v6408_v18  ;;  %v6699_v31 = vor.u32 %v8223_v24, %v6696_v50  ;;  %v6468_v18 = vld [vmem:[#allocation5 + $0xfc] sm:$0xf0]  ;;  %v6375_v24 = vor.u32 %v8142_v12, %v6372_v14  ;;  %v7008_v12 = vld [vmem:[#allocation5 + $0x534] sm:$0xf0] }
 0x18f   :  { %4827 = vmatpush.bf16.msrb.mxu0 %v7499_v49  ;;  %4853 = vmatpush.bf16.msrb.mxu2 %v7691_v58  ;;  %v2022_v41 = vpop.f32.mrf.mxu0  ;;  %v6495_v49 = vor.u32 %v8172_v27, %v6492_v46  ;;  %v8169_v58 = vld [vmem:[#allocation5 + $0x10c] sm:$0xf]  ;;  %v6663_v27 = vor.u32 %v8214_v7, %v6660_v22  ;;  %v8187_v46 = vld [vmem:[#allocation5 + $0x19c] sm:$0xf]  ;;  %v8274_v7 = vld [vmem:[#allocation5 + $0x454] sm:$0xf] }
 0x190   :  { %v2023_v47 = vadd.f32 %v2022_v41, %v351_v28  ;;  %v8211_v41 = vld [vmem:[#allocation5 + $0x25c] sm:$0xf] }
 0x191   :  { %4840 = vmatpush.bf16.msrb.mxu1 %v7595_v57  ;;  %4866 = vmatpush.bf16.msrb.mxu3 %v7787_v61  ;;  %v2035_v53 = vpop.f32.mrf.mxu1  ;;  %v6384_v57 = vld [vmem:[#allocation5 + $0x54] sm:$0xf0] }
 0x192   :  { %4828 = vmatmul.bf16.vlgmr.msrb.gmra.mxu0 %v8814_v34  ;;  %v2036_v60 = vadd.f32 %v2035_v53, %v2023_v47  ;;  %v6480_v61 = vld [vmem:[#allocation5 + $0x114] sm:$0xf0]  ;;  %v8136_v47 = vld [vmem:[#allocation5 + $0x4] sm:$0xf]  ;;  %v6555_v53 = vor.u32 %v8187_v46, %v6552_v39  ;;  %v8271_v46 = vld [vmem:[#allocation5 + $0x43c] sm:$0xf] }
 0x193   :  { %4872 = vmatpush.bf16.msra.mxu0 %v6435_v63  ;;  %4898 = vmatpush.bf16.msra.mxu2 %v6627_v23  ;;  %v8193_v63 = vld [vmem:[#allocation5 + $0x1cc] sm:$0xf]  ;;  %v6483_v8 = vor.u32 %v8169_v58, %v6480_v61  ;;  %v8184_v58 = vld [vmem:[#allocation5 + $0x184] sm:$0xf] }
 0x194   :  { %4841 = vmatmul.bf16.vlgmr.msrb.gmra.mxu1 %v8816_v13  ;;  %v8217_v23 = vld [vmem:[#allocation5 + $0x28c] sm:$0xf]  ;;  %v2079_v4 = vmax.f32 %v2036_v60, 0.0  ;;  %v69_v39 = vld [vmem:[#allocation7 + $0x1] ss:$2 sm:$0x7] }
 0x195   :  { %4885 = vmatpush.bf16.msra.mxu1 %v6531_v0  ;;  %4911 = vmatpush.bf16.msra.mxu3 %v6723_v6  ;;  %v6576_v0 = vld [vmem:[#allocation5 + $0x1d4] sm:$0xf0]  ;;  %v6387_v6 = vor.u32 %v8145_v56, %v6384_v57  ;;  %v8160_v56 = vld [vmem:[#allocation5 + $0xc4] sm:$0xf]  ;;  %v6444_v57 = vld [vmem:[#allocation5 + $0xcc] sm:$0xf0] }
 0x196   :  { %v6579_v11 = vor.u32 %v8193_v63, %v6576_v0  ;;  %v6540_v63 = vld [vmem:[#allocation5 + $0x18c] sm:$0xf0]  ;;  %v8208_v0 = vld [vmem:[#allocation5 + $0x244] sm:$0xf]  ;;  %v6447_v14 = vor.u32 %v8160_v56, %v6444_v57 }
 0x197   :  { %4873 = vmatpush.bf16.msra.mxu0 %v6423_v26  ;;  %4899 = vmatpush.bf16.msra.mxu2 %v6615_v17  ;;  %v8822_v26 = vpack.c.bf16 %v2079_v4, %v2079_v4  ;;  %v2048_v17 = vpop.f32.mrf.mxu2  ;;  %v2061_v30 = vpop.f32.mrf.mxu3  ;;  %v8277_v4 = vld [vmem:[#allocation5 + $0x46c] sm:$0xf] }
 0x198   :  { %v2049_v9 = vadd.f32 %v2048_v17, %v352_v33  ;;  %v2024_v21 = vpop.f32.mrf.mxu0  ;;  %v6816_v33 = vld [vmem:[#allocation5 + $0x3b4] sm:$0xf0] }
 0x199   :  { %4886 = vmatpush.bf16.msra.mxu1 %v6519_v16  ;;  %4912 = vmatpush.bf16.msra.mxu3 %v6711_v20  ;;  %v6675_v16 = vor.u32 %v8217_v23, %v6672_v3  ;;  %v6564_v20 = vld [vmem:[#allocation5 + $0x1bc] sm:$0xf0]  ;;  %v6636_v23 = vld [vmem:[#allocation5 + $0x24c] sm:$0xf0]  ;;  %v8253_v3 = vld [vmem:[#allocation5 + $0x3ac] sm:$0xf] }
 0x19a   :  { %4854 = vmatmul.bf16.vlgmr.msrb.gmra.mxu2 %v8822_v26  ;;  %v2062_v50 = vadd.f32 %v2061_v30, %v2049_v9  ;;  %v6567_v28 = vor.u32 %v8190_v19, %v6564_v20  ;;  %v7104_v17 = vld [vmem:[#allocation5 + $0x5f4] sm:$0xf0]  ;;  %v6639_v30 = vor.u32 %v8208_v0, %v6636_v23  ;;  %v8250_v9 = vld [vmem:[#allocation5 + $0x394] sm:$0xf]  ;;  %v6804_v21 = vld [vmem:[#allocation5 + $0x39c] sm:$0xf0] }
 0x19b   :  { %4874 = vmatpush.bf16.msra.mxu0 %v6411_v25  ;;  %4900 = vmatpush.bf16.msra.mxu2 %v6603_v29  ;;  %v6471_v25 = vor.u32 %v8166_v15, %v6468_v18  ;;  %v8139_v29 = vld [vmem:[#allocation5 + $0x1c] sm:$0xf]  ;;  %v6543_v15 = vor.u32 %v8184_v58, %v6540_v63  ;;  %v6819_v18 = vor.u32 %v8253_v3, %v6816_v33  ;;  %v8244_v58 = vld [vmem:[#allocation5 + $0x364] sm:$0xf]  ;;  %v6876_v63 = vld [vmem:[#allocation5 + $0x42c] sm:$0xf0] }
 0x19c   :  { %v2080_v40 = vmax.f32 %v2062_v50, 0.0  ;;  %v6363_v44 = vor.u32 %v8139_v29, %v6360_v32  ;;  %v8298_v50 = vld [vmem:[#allocation5 + $0x514] sm:$0xf]  ;;  %v6807_v29 = vor.u32 %v8250_v9, %v6804_v21  ;;  %v8247_v32 = vld [vmem:[#allocation5 + $0x37c] sm:$0xf] }
 0x19d   :  { %4887 = vmatpush.bf16.msra.mxu1 %v6507_v10  ;;  %4913 = vmatpush.bf16.msra.mxu3 %v6699_v31  ;;  %v2037_v10 = vpop.f32.mrf.mxu1  ;;  %v6456_v31 = vld [vmem:[#allocation5 + $0xe4] sm:$0xf0]  ;;  %v8292_v0 = vld [vmem:[#allocation5 + $0x4e4] sm:$0xf]  ;;  %v6972_v23 = vld [vmem:[#allocation5 + $0x4ec] sm:$0xf0] }
 0x19e   :  { %v7092_v10 = vld [vmem:[#allocation5 + $0x5dc] sm:$0xf0]  ;;  %v8316_v33 = vld [vmem:[#allocation5 + $0x5a4] sm:$0xf]  ;;  %v6960_v9 = vld [vmem:[#allocation5 + $0x4d4] sm:$0xf0] }
 0x19f   :  { %4875 = vmatpush.bf16.msra.mxu0 %v6399_v48  ;;  %4901 = vmatpush.bf16.msra.mxu2 %v6591_v52  ;;  %v6348_v48 = vld [vmem:[#allocation5 + $0xc] sm:$0xf0]  ;;  %v6459_v52 = vor.u32 %v8163_v36, %v6456_v31  ;;  %v2050_v60 = vpop.f32.mrf.mxu2  ;;  %v2063_v61 = vpop.f32.mrf.mxu3  ;;  %v6792_v36 = vld [vmem:[#allocation5 + $0x384] sm:$0xf0]  ;;  %v8313_v21 = vld [vmem:[#allocation5 + $0x58c] sm:$0xf] }
 0x1a0   :  { %v8268_v60 = vld [vmem:[#allocation5 + $0x424] sm:$0xf] }
 0x1a1   :  { %4888 = vmatpush.bf16.msra.mxu1 %v6495_v49  ;;  %4914 = vmatpush.bf16.msra.mxu3 %v6687_v59  ;;  %v8825_v49 = vpack.c.bf16 %v2080_v40, %v2080_v40  ;;  %v6651_v59 = vor.u32 %v8211_v41, %v6648_v38  ;;  %v6888_v41 = vld [vmem:[#allocation5 + $0x444] sm:$0xf0]  ;;  %v8295_v38 = vld [vmem:[#allocation5 + $0x4fc] sm:$0xf] }
 0x1a2   :  { %v6891_v56 = vor.u32 %v8271_v46, %v6888_v41  ;;  %v8310_v41 = vld [vmem:[#allocation5 + $0x574] sm:$0xf] }
 0x1a3   :  { %4876 = vmatpush.bf16.msra.mxu0 %v6387_v6  ;;  %4902 = vmatpush.bf16.msra.mxu2 %v6579_v11  ;;  %v6351_v6 = vor.u32 %v8136_v47, %v6348_v48  ;;  %v8301_v11 = vld [vmem:[#allocation5 + $0x52c] sm:$0xf]  ;;  %v8319_v47 = vld [vmem:[#allocation5 + $0x5bc] sm:$0xf]  ;;  %v7080_v48 = vld [vmem:[#allocation5 + $0x5c4] sm:$0xf0] }
 0x1a4   :  { %4867 = vmatmul.bf16.vlgmr.msrb.gmra.mxu3 %v8825_v49  ;;  %v7011_v20 = vor.u32 %v8301_v11, %v7008_v12  ;;  %v7083_v61 = vor.u32 %v8319_v47, %v7080_v48  ;;  %v6879_v12 = vor.u32 %v8268_v60, %v6876_v63  ;;  %v6840_v60 = vld [vmem:[#allocation5 + $0x3e4] sm:$0xf0] }
 0x1a5   :  { %4889 = vmatpush.bf16.msra.mxu1 %v6483_v8  ;;  %4915 = vmatpush.bf16.msra.mxu3 %v6675_v16  ;;  %v6912_v8 = vld [vmem:[#allocation5 + $0x474] sm:$0xf0]  ;;  %v8325_v16 = vld [vmem:[#allocation5 + $0x5ec] sm:$0xf]  ;;  %v6936_v63 = vld [vmem:[#allocation5 + $0x4a4] sm:$0xf0] }
 0x1a6   :  { %v6915_v19 = vor.u32 %v8277_v4, %v6912_v8  ;;  %v7107_v22 = vor.u32 %v8325_v16, %v7104_v17  ;;  %v7068_v4 = vld [vmem:[#allocation5 + $0x5ac] sm:$0xf0]  ;;  %v6768_v16 = vld [vmem:[#allocation5 + $0x354] sm:$0xf0]  ;;  %v8265_v17 = vld [vmem:[#allocation5 + $0x40c] sm:$0xf] }
 0x1a7   :  { %4877 = vmatpush.bf16.msra.mxu0 %v6375_v24  ;;  %4903 = vmatpush.bf16.msra.mxu2 %v6567_v28  ;;  %v6900_v24 = vld [vmem:[#allocation5 + $0x45c] sm:$0xf0]  ;;  %v8322_v28 = vld [vmem:[#allocation5 + $0x5d4] sm:$0xf] }
 0x1a8   :  { %v7095_v40 = vor.u32 %v8322_v28, %v7092_v10  ;;  %v6756_v28 = vld [vmem:[#allocation5 + $0x33c] sm:$0xf0]  ;;  %v8262_v10 = vld [vmem:[#allocation5 + $0x3f4] sm:$0xf] }
 0x1a9   :  { %4890 = vmatpush.bf16.msra.mxu1 %v6471_v25  ;;  %4916 = vmatpush.bf16.msra.mxu3 %v6663_v27  ;;  %v6996_v25 = vld [vmem:[#allocation5 + $0x51c] sm:$0xf0]  ;;  %v6903_v27 = vor.u32 %v8274_v7, %v6900_v24  ;;  %v7056_v7 = vld [vmem:[#allocation5 + $0x594] sm:$0xf0] }
 0x1aa   :  { %v6999_v31 = vor.u32 %v8298_v50, %v6996_v25  ;;  %v8238_v25 = vld [vmem:[#allocation5 + $0x334] sm:$0xf] }
 0x1ab   :  { %4878 = vmatpush.bf16.msra.mxu0 %v6363_v44  ;;  %4904 = vmatpush.bf16.msra.mxu2 %v6555_v53  ;;  %v6984_v44 = vld [vmem:[#allocation5 + $0x504] sm:$0xf0]  ;;  %v2610_v53 = vperm.slane %v69_v39, 0  ;;  %v6759_v47 = vor.u32 %v8238_v25, %v6756_v28 }
 0x1ac   :  { %v6987_v57 = vor.u32 %v8295_v38, %v6984_v44  ;;  %v7044_v38 = vld [vmem:[#allocation5 + $0x57c] sm:$0xf0] }
 0x1ad   :  { %4891 = vmatpush.bf16.msra.mxu1 %v6459_v52  ;;  %4917 = vmatpush.bf16.msra.mxu3 %v6651_v59  ;;  %v6795_v52 = vor.u32 %v8247_v32, %v6792_v36  ;;  %v6780_v59 = vld [vmem:[#allocation5 + $0x36c] sm:$0xf0]  ;;  %v6852_v36 = vld [vmem:[#allocation5 + $0x3fc] sm:$0xf0] }
 0x1ae   :  { %v6783_v11 = vor.u32 %v8244_v58, %v6780_v59  ;;  %v8259_v58 = vld [vmem:[#allocation5 + $0x3dc] sm:$0xf]  ;;  %v7047_v59 = vor.u32 %v8310_v41, %v7044_v38  ;;  %v7284_v38 = vld [vmem:[#allocation5 + $0x75c] sm:$0xf0] }
 0x1af   :  { %4879 = vmatpush.bf16.msra.mxu0 %v6351_v6  ;;  %4905 = vmatpush.bf16.msra.mxu2 %v6543_v15  ;;  %v4673_v3 = vpop.f32.mrf.mxu0  ;;  %v8241_v15 = vld [vmem:[#allocation5 + $0x34c] sm:$0xf] }
 0x1b0   :  { %v4674_v6 = vadd.f32 %v4673_v3, %v2610_v53 }
 0x1b1   :  { %4892 = vmatpush.bf16.msra.mxu1 %v6447_v14  ;;  %4918 = vmatpush.bf16.msra.mxu3 %v6639_v30  ;;  %v4686_v8 = vpop.f32.mrf.mxu1  ;;  %v6975_v14 = vor.u32 %v8292_v0, %v6972_v23  ;;  %v8307_v0 = vld [vmem:[#allocation5 + $0x55c] sm:$0xf]  ;;  %v7032_v23 = vld [vmem:[#allocation5 + $0x564] sm:$0xf0] }
 0x1b2   :  { %4880 = vmatmul.bf16.vlgmr.msra.gmra.mxu0 %v8752_v35  ;;  %4906 = vmatmul.bf16.vlgmr.msra.gmra.mxu2 %v8756_v37  ;;  %v4687_v30 = vadd.f32 %v4686_v8, %v4674_v6  ;;  %v6843_v6 = vor.u32 %v8259_v58, %v6840_v60  ;;  %v7176_v60 = vld [vmem:[#allocation5 + $0x684] sm:$0xf0] }
 0x1b3   :  { %4924 = vmatpush.bf16.msrb.mxu0 %v6819_v18  ;;  %4950 = vmatpush.bf16.msrb.mxu2 %v7011_v20  ;;  %v7071_v18 = vor.u32 %v8316_v33, %v7068_v4  ;;  %v8289_v20 = vld [vmem:[#allocation5 + $0x4cc] sm:$0xf]  ;;  %v8232_v33 = vld [vmem:[#allocation5 + $0x304] sm:$0xf]  ;;  %v6732_v4 = vld [vmem:[#allocation5 + $0x30c] sm:$0xf0] }
 0x1b4   :  { %4893 = vmatmul.bf16.vlgmr.msra.gmra.mxu1 %v8754_v54  ;;  %4919 = vmatmul.bf16.vlgmr.msra.gmra.mxu3 %v8758_v42  ;;  %v6963_v50 = vor.u32 %v8289_v20, %v6960_v9  ;;  %v8349_v20 = vld [vmem:[#allocation5 + $0x6ac] sm:$0xf]  ;;  %v7200_v9 = vld [vmem:[#allocation5 + $0x6b4] sm:$0xf0] }
 0x1b5   :  { %4937 = vmatpush.bf16.msrb.mxu1 %v6915_v19  ;;  %4963 = vmatpush.bf16.msrb.mxu3 %v7107_v22  ;;  %v6864_v19 = vld [vmem:[#allocation5 + $0x414] sm:$0xf0]  ;;  %v6771_v22 = vor.u32 %v8241_v15, %v6768_v16  ;;  %v4699_v32 = vpop.f32.mrf.mxu2  ;;  %v7035_v15 = vor.u32 %v8307_v0, %v7032_v23  ;;  %v7272_v0 = vld [vmem:[#allocation5 + $0x744] sm:$0xf0]  ;;  %v8391_v23 = vld [vmem:[#allocation5 + $0x7fc] sm:$0xf] }
 0x1b6   :  { %v6867_v24 = vor.u32 %v8265_v17, %v6864_v19  ;;  %v4700_v46 = vadd.f32 %v4699_v32, %v4687_v30  ;;  %v6924_v17 = vld [vmem:[#allocation5 + $0x48c] sm:$0xf0]  ;;  %v8304_v30 = vld [vmem:[#allocation5 + $0x544] sm:$0xf] }
 0x1b7   :  { %4925 = vmatpush.bf16.msrb.mxu0 %v6807_v29  ;;  %4951 = vmatpush.bf16.msrb.mxu2 %v6999_v31  ;;  %v7059_v29 = vor.u32 %v8313_v21, %v7056_v7  ;;  %v6948_v31 = vld [vmem:[#allocation5 + $0x4bc] sm:$0xf0]  ;;  %v4712_v39 = vpop.f32.mrf.mxu3  ;;  %v8373_v21 = vld [vmem:[#allocation5 + $0x76c] sm:$0xf]  ;;  %v6735_v7 = vor.u32 %v8232_v33, %v6732_v4  ;;  %v8415_v33 = vld [vmem:[#allocation5 + $0x8bc] sm:$0xf] }
 0x1b8   :  { %v8832_v48 = vadd.f32 %v4712_v39, %v4700_v46  ;;  %v8346_v46 = vld [vmem:[#allocation5 + $0x694] sm:$0xf]  ;;  %v7188_v39 = vld [vmem:[#allocation5 + $0x69c] sm:$0xf0]  ;;  %v7464_v4 = vld [vmem:[#allocation5 + $0x8c4] sm:$0xf0] }
 0x1b9   :  { %4938 = vmatpush.bf16.msrb.mxu1 %v6903_v27  ;;  %4964 = vmatpush.bf16.msrb.mxu3 %v7095_v40  ;;  %v8286_v27 = vld [vmem:[#allocation5 + $0x4b4] sm:$0xf]  ;;  %v4675_v40 = vpop.f32.mrf.mxu0  ;;  %v4688_v44 = vpop.f32.mrf.mxu1 }
 0x1ba   :  { %v6951_v53 = vor.u32 %v8286_v27, %v6948_v31  ;;  %v8370_v40 = vld [vmem:[#allocation5 + $0x754] sm:$0xf] }
 0x1bb   :  { %4926 = vmatpush.bf16.msrb.mxu0 %v6795_v52  ;;  %4952 = vmatpush.bf16.msrb.mxu2 %v6987_v57  ;;  %v6855_v52 = vor.u32 %v8262_v10, %v6852_v36  ;;  %v6744_v57 = vld [vmem:[#allocation5 + $0x324] sm:$0xf0]  ;;  %v8421_v10 = vld [vmem:[#allocation5 + $0x8ec] sm:$0xf]  ;;  %v7203_v36 = vor.u32 %v8349_v20, %v7200_v9  ;;  %v8394_v44 = vld [vmem:[#allocation5 + $0x814] sm:$0xf] }
 0x1bc   :  { %v8412_v20 = vld [vmem:[#allocation5 + $0x8a4] sm:$0xf]  ;;  %v7452_v9 = vld [vmem:[#allocation5 + $0x8ac] sm:$0xf0] }
 0x1bd   :  { %4939 = vmatpush.bf16.msrb.mxu1 %v6891_v56  ;;  %4965 = vmatpush.bf16.msrb.mxu3 %v7083_v61  ;;  %v8235_v56 = vld [vmem:[#allocation5 + $0x31c] sm:$0xf]  ;;  %v4701_v16 = vpop.f32.mrf.mxu2 }
 0x1be   :  { %v8283_v61 = vld [vmem:[#allocation5 + $0x49c] sm:$0xf]  ;;  %v6747_v3 = vor.u32 %v8235_v56, %v6744_v57  ;;  %v7191_v56 = vor.u32 %v8346_v46, %v7188_v39  ;;  %v7287_v57 = vor.u32 %v8370_v40, %v7284_v38  ;;  %v7467_v16 = vor.u32 %v8415_v33, %v7464_v4  ;;  %v8409_v46 = vld [vmem:[#allocation5 + $0x88c] sm:$0xf]  ;;  %v7440_v39 = vld [vmem:[#allocation5 + $0x894] sm:$0xf0] }
 0x1bf   :  { %4927 = vmatpush.bf16.msrb.mxu0 %v6783_v11  ;;  %4953 = vmatpush.bf16.msrb.mxu2 %v6975_v14  ;;  %v6939_v8 = vor.u32 %v8283_v61, %v6936_v63  ;;  %v8256_v11 = vld [vmem:[#allocation5 + $0x3c4] sm:$0xf]  ;;  %v4714_v19 = vpop.f32.mrf.mxu3  ;;  %v8367_v61 = vld [vmem:[#allocation5 + $0x73c] sm:$0xf]  ;;  %v8334_v38 = vld [vmem:[#allocation5 + $0x634] sm:$0xf] }
 0x1c0   :  { %v8280_v14 = vld [vmem:[#allocation5 + $0x484] sm:$0xf] }
 0x1c1   :  { %4940 = vmatpush.bf16.msrb.mxu1 %v6879_v12  ;;  %4966 = vmatpush.bf16.msrb.mxu3 %v7071_v18  ;;  %v6828_v12 = vld [vmem:[#allocation5 + $0x3cc] sm:$0xf0]  ;;  %v6927_v28 = vor.u32 %v8280_v14, %v6924_v17 }
 0x1c2   :  { %v7020_v18 = vld [vmem:[#allocation5 + $0x54c] sm:$0xf0]  ;;  %v6831_v25 = vor.u32 %v8256_v11, %v6828_v12  ;;  %v8340_v12 = vld [vmem:[#allocation5 + $0x664] sm:$0xf] }
 0x1c3   :  { %4928 = vmatpush.bf16.msrb.mxu0 %v6771_v22  ;;  %4954 = vmatpush.bf16.msrb.mxu2 %v6963_v50  ;;  %v7296_v22 = vld [vmem:[#allocation5 + $0x774] sm:$0xf0]  ;;  %v7023_v32 = vor.u32 %v8304_v30, %v7020_v18  ;;  %v7164_v14 = vld [vmem:[#allocation5 + $0x66c] sm:$0xf0]  ;;  %v8388_v30 = vld [vmem:[#allocation5 + $0x7e4] sm:$0xf] }
 0x1c4   :  { %v7392_v50 = vld [vmem:[#allocation5 + $0x834] sm:$0xf0]  ;;  %v7299_v27 = vor.u32 %v8373_v21, %v7296_v22  ;;  %v7260_v17 = vld [vmem:[#allocation5 + $0x72c] sm:$0xf0]  ;;  %v7167_v22 = vor.u32 %v8340_v12, %v7164_v14  ;;  %v8355_v12 = vld [vmem:[#allocation5 + $0x6dc] sm:$0xf] }
 0x1c5   :  { %4941 = vmatpush.bf16.msrb.mxu1 %v6867_v24  ;;  %4967 = vmatpush.bf16.msrb.mxu3 %v7059_v29  ;;  %v8397_v24 = vld [vmem:[#allocation5 + $0x82c] sm:$0xf]  ;;  %v7488_v29 = vld [vmem:[#allocation5 + $0x8f4] sm:$0xf0]  ;;  %v7356_v18 = vld [vmem:[#allocation5 + $0x7ec] sm:$0xf0] }
 0x1c6   :  { %v7395_v31 = vor.u32 %v8397_v24, %v7392_v50  ;;  %v7491_v41 = vor.u32 %v8421_v10, %v7488_v29  ;;  %v7359_v50 = vor.u32 %v8388_v30, %v7356_v18  ;;  %v8361_v10 = vld [vmem:[#allocation5 + $0x70c] sm:$0xf]  ;;  %v8403_v30 = vld [vmem:[#allocation5 + $0x85c] sm:$0xf]  ;;  %v7416_v18 = vld [vmem:[#allocation5 + $0x864] sm:$0xf0] }
 0x1c7   :  { %4929 = vmatpush.bf16.msrb.mxu0 %v6759_v47  ;;  %4955 = vmatpush.bf16.msrb.mxu2 %v6951_v53  ;;  %v7380_v47 = vld [vmem:[#allocation5 + $0x81c] sm:$0xf0] }
 0x1c8   :  { %v7476_v53 = vld [vmem:[#allocation5 + $0x8dc] sm:$0xf0]  ;;  %v7383_v58 = vor.u32 %v8394_v44, %v7380_v47  ;;  %v8358_v47 = vld [vmem:[#allocation5 + $0x6f4] sm:$0xf] }
 0x1c9   :  { %4942 = vmatpush.bf16.msrb.mxu1 %v6855_v52  ;;  %4968 = vmatpush.bf16.msrb.mxu3 %v7047_v59  ;;  %v8418_v52 = vld [vmem:[#allocation5 + $0x8d4] sm:$0xf]  ;;  %v8343_v59 = vld [vmem:[#allocation5 + $0x67c] sm:$0xf]  ;;  %v7140_v44 = vld [vmem:[#allocation5 + $0x63c] sm:$0xf0] }
 0x1ca   :  { %v7479_v63 = vor.u32 %v8418_v52, %v7476_v53  ;;  %v7443_v52 = vor.u32 %v8409_v46, %v7440_v39  ;;  %v8469_v46 = vld [vmem:[#allocation5 + $0xa6c] sm:$0xf] }
 0x1cb   :  { %4930 = vmatpush.bf16.msrb.mxu0 %v6747_v3  ;;  %4956 = vmatpush.bf16.msrb.mxu2 %v6939_v8  ;;  %v7368_v3 = vld [vmem:[#allocation5 + $0x804] sm:$0xf0]  ;;  %v7275_v8 = vor.u32 %v8367_v61, %v7272_v0  ;;  %v7428_v0 = vld [vmem:[#allocation5 + $0x87c] sm:$0xf0] }
 0x1cc   :  { %v7371_v11 = vor.u32 %v8391_v23, %v7368_v3  ;;  %v7143_v3 = vor.u32 %v8334_v38, %v7140_v44 }
 0x1cd   :  { %4943 = vmatpush.bf16.msrb.mxu1 %v6843_v6  ;;  %4969 = vmatpush.bf16.msrb.mxu3 %v7035_v15  ;;  %v7179_v6 = vor.u32 %v8343_v59, %v7176_v60  ;;  %v8364_v15 = vld [vmem:[#allocation5 + $0x724] sm:$0xf] }
 0x1ce   :  { %v7263_v24 = vor.u32 %v8364_v15, %v7260_v17  ;;  %v7224_v15 = vld [vmem:[#allocation5 + $0x6e4] sm:$0xf0] }
 0x1cf   :  { %4931 = vmatpush.bf16.msrb.mxu0 %v6735_v7  ;;  %4957 = vmatpush.bf16.msrb.mxu2 %v6927_v28  ;;  %v4725_v19 = vpop.f32.mrf.mxu0  ;;  %v7152_v28 = vld [vmem:[#allocation5 + $0x654] sm:$0xf0]  ;;  %v7320_v17 = vld [vmem:[#allocation5 + $0x7a4] sm:$0xf0] }
 0x1d0   :  { %v4726_v21 = vadd.f32 %v4725_v19, %v8832_v48 }
 0x1d1   :  { %4944 = vmatpush.bf16.msrb.mxu1 %v6831_v25  ;;  %4970 = vmatpush.bf16.msrb.mxu3 %v7023_v32  ;;  %v4738_v7 = vpop.f32.mrf.mxu1  ;;  %v8337_v25 = vld [vmem:[#allocation5 + $0x64c] sm:$0xf]  ;;  %v7455_v32 = vor.u32 %v8412_v20, %v7452_v9  ;;  %v8328_v20 = vld [vmem:[#allocation5 + $0x604] sm:$0xf]  ;;  %v7116_v9 = vld [vmem:[#allocation5 + $0x60c] sm:$0xf0] }
 0x1d2   :  { %4932 = vmatmul.bf16.vlgmr.msrb.gmra.mxu0 %v8778_v51  ;;  %4958 = vmatmul.bf16.vlgmr.msrb.gmra.mxu2 %v8782_v45  ;;  %v4739_v29 = vadd.f32 %v4738_v7, %v4726_v21  ;;  %v7155_v40 = vor.u32 %v8337_v25, %v7152_v28  ;;  %v7227_v21 = vor.u32 %v8355_v12, %v7224_v15  ;;  %v7560_v15 = vld [vmem:[#allocation5 + $0x984] sm:$0xf0] }
 0x1d3   :  { %4976 = vmatpush.bf16.msra.mxu0 %v7203_v36  ;;  %5002 = vmatpush.bf16.msra.mxu2 %v7395_v31  ;;  %v7248_v36 = vld [vmem:[#allocation5 + $0x714] sm:$0xf0]  ;;  %v7419_v25 = vor.u32 %v8403_v30, %v7416_v18  ;;  %v7119_v39 = vor.u32 %v8328_v20, %v7116_v9  ;;  %v7656_v30 = vld [vmem:[#allocation5 + $0xa44] sm:$0xf0]  ;;  %v8487_v18 = vld [vmem:[#allocation5 + $0xafc] sm:$0xf] }
 0x1d4   :  { %4945 = vmatmul.bf16.vlgmr.msrb.gmra.mxu1 %v8780_v43  ;;  %4971 = vmatmul.bf16.vlgmr.msrb.gmra.mxu3 %v8784_v55  ;;  %v7344_v31 = vld [vmem:[#allocation5 + $0x7d4] sm:$0xf0]  ;;  %v7251_v48 = vor.u32 %v8361_v10, %v7248_v36  ;;  %v7308_v10 = vld [vmem:[#allocation5 + $0x78c] sm:$0xf0]  ;;  %v8511_v20 = vld [vmem:[#allocation5 + $0xbbc] sm:$0xf] }
 0x1d5   :  { %4989 = vmatpush.bf16.msra.mxu1 %v7299_v27  ;;  %5015 = vmatpush.bf16.msra.mxu3 %v7491_v41  ;;  %v8385_v27 = vld [vmem:[#allocation5 + $0x7cc] sm:$0xf]  ;;  %v4751_v53 = vpop.f32.mrf.mxu2  ;;  %v7848_v9 = vld [vmem:[#allocation5 + $0xbc4] sm:$0xf0] }
 0x1d6   :  { %v7347_v41 = vor.u32 %v8385_v27, %v7344_v31  ;;  %v4752_v59 = vadd.f32 %v4751_v53, %v4739_v29  ;;  %v8400_v29 = vld [vmem:[#allocation5 + $0x844] sm:$0xf]  ;;  %v8445_v27 = vld [vmem:[#allocation5 + $0x9ac] sm:$0xf]  ;;  %v7584_v31 = vld [vmem:[#allocation5 + $0x9b4] sm:$0xf0] }
 0x1d7   :  { %4977 = vmatpush.bf16.msra.mxu0 %v7191_v56  ;;  %5003 = vmatpush.bf16.msra.mxu2 %v7383_v58  ;;  %v7236_v56 = vld [vmem:[#allocation5 + $0x6fc] sm:$0xf0]  ;;  %v4764_v60 = vpop.f32.mrf.mxu3  ;;  %v4727_v61 = vpop.f32.mrf.mxu0 }
 0x1d8   :  { %v7332_v58 = vld [vmem:[#allocation5 + $0x7bc] sm:$0xf0]  ;;  %v8839_v33 = vadd.f32 %v4764_v60, %v4752_v59  ;;  %v7239_v4 = vor.u32 %v8358_v47, %v7236_v56  ;;  %v8517_v47 = vld [vmem:[#allocation5 + $0xbec] sm:$0xf]  ;;  %v7587_v56 = vor.u32 %v8445_v27, %v7584_v31  ;;  %v8442_v59 = vld [vmem:[#allocation5 + $0x994] sm:$0xf] }
 0x1d9   :  { %4990 = vmatpush.bf16.msra.mxu1 %v7287_v57  ;;  %5016 = vmatpush.bf16.msra.mxu3 %v7479_v63  ;;  %v8382_v57 = vld [vmem:[#allocation5 + $0x7b4] sm:$0xf]  ;;  %v4740_v23 = vpop.f32.mrf.mxu1  ;;  %v7572_v60 = vld [vmem:[#allocation5 + $0x99c] sm:$0xf0]  ;;  %v8508_v27 = vld [vmem:[#allocation5 + $0xba4] sm:$0xf] }
 0x1da   :  { %v8406_v63 = vld [vmem:[#allocation5 + $0x874] sm:$0xf]  ;;  %v7836_v31 = vld [vmem:[#allocation5 + $0xbac] sm:$0xf0] }
 0x1db   :  { %4978 = vmatpush.bf16.msra.mxu0 %v7179_v6  ;;  %5004 = vmatpush.bf16.msra.mxu2 %v7371_v11  ;;  %v7335_v6 = vor.u32 %v8382_v57, %v7332_v58  ;;  %v7128_v11 = vld [vmem:[#allocation5 + $0x624] sm:$0xf0]  ;;  %v7431_v14 = vor.u32 %v8406_v63, %v7428_v0  ;;  %v8466_v61 = vld [vmem:[#allocation5 + $0xa54] sm:$0xf]  ;;  %v7668_v0 = vld [vmem:[#allocation5 + $0xa5c] sm:$0xf0] }
 0x1dc   :  { %v8490_v23 = vld [vmem:[#allocation5 + $0xb14] sm:$0xf] }
 0x1dd   :  { %4991 = vmatpush.bf16.msra.mxu1 %v7275_v8  ;;  %5017 = vmatpush.bf16.msra.mxu3 %v7467_v16  ;;  %v8331_v8 = vld [vmem:[#allocation5 + $0x61c] sm:$0xf]  ;;  %v4753_v28 = vpop.f32.mrf.mxu2 }
 0x1de   :  { %v8379_v16 = vld [vmem:[#allocation5 + $0x79c] sm:$0xf]  ;;  %v7131_v19 = vor.u32 %v8331_v8, %v7128_v11  ;;  %v7575_v8 = vor.u32 %v8442_v59, %v7572_v60  ;;  %v7671_v11 = vor.u32 %v8466_v61, %v7668_v0  ;;  %v7851_v28 = vor.u32 %v8511_v20, %v7848_v9  ;;  %v8505_v59 = vld [vmem:[#allocation5 + $0xb8c] sm:$0xf]  ;;  %v7824_v60 = vld [vmem:[#allocation5 + $0xb94] sm:$0xf0] }
 0x1df   :  { %4979 = vmatpush.bf16.msra.mxu0 %v7167_v22  ;;  %5005 = vmatpush.bf16.msra.mxu2 %v7359_v50  ;;  %v7323_v7 = vor.u32 %v8379_v16, %v7320_v17  ;;  %v8352_v22 = vld [vmem:[#allocation5 + $0x6c4] sm:$0xf]  ;;  %v4766_v36 = vpop.f32.mrf.mxu3  ;;  %v8463_v16 = vld [vmem:[#allocation5 + $0xa3c] sm:$0xf]  ;;  %v8430_v0 = vld [vmem:[#allocation5 + $0x934] sm:$0xf] }
 0x1e0   :  { %v8376_v50 = vld [vmem:[#allocation5 + $0x784] sm:$0xf] }
 0x1e1   :  { %4992 = vmatpush.bf16.msra.mxu1 %v7263_v24  ;;  %5018 = vmatpush.bf16.msra.mxu3 %v7455_v32  ;;  %v7212_v24 = vld [vmem:[#allocation5 + $0x6cc] sm:$0xf0]  ;;  %v7311_v44 = vor.u32 %v8376_v50, %v7308_v10 }
 0x1e2   :  { %v7404_v32 = vld [vmem:[#allocation5 + $0x84c] sm:$0xf0]  ;;  %v7215_v38 = vor.u32 %v8352_v22, %v7212_v24  ;;  %v8436_v24 = vld [vmem:[#allocation5 + $0x964] sm:$0xf] }
 0x1e3   :  { %4980 = vmatpush.bf16.msra.mxu0 %v7155_v40  ;;  %5006 = vmatpush.bf16.msra.mxu2 %v7347_v41  ;;  %v7680_v40 = vld [vmem:[#allocation5 + $0xa74] sm:$0xf0]  ;;  %v7407_v53 = vor.u32 %v8400_v29, %v7404_v32  ;;  %v7548_v50 = vld [vmem:[#allocation5 + $0x96c] sm:$0xf0]  ;;  %v8484_v29 = vld [vmem:[#allocation5 + $0xae4] sm:$0xf] }
 0x1e4   :  { %v7776_v41 = vld [vmem:[#allocation5 + $0xb34] sm:$0xf0]  ;;  %v7683_v57 = vor.u32 %v8469_v46, %v7680_v40  ;;  %v7644_v10 = vld [vmem:[#allocation5 + $0xa2c] sm:$0xf0]  ;;  %v7551_v40 = vor.u32 %v8436_v24, %v7548_v50  ;;  %v8451_v24 = vld [vmem:[#allocation5 + $0x9dc] sm:$0xf] }
 0x1e5   :  { %4993 = vmatpush.bf16.msra.mxu1 %v7251_v48  ;;  %5019 = vmatpush.bf16.msra.mxu3 %v7443_v52  ;;  %v8493_v48 = vld [vmem:[#allocation5 + $0xb2c] sm:$0xf]  ;;  %v7872_v52 = vld [vmem:[#allocation5 + $0xbf4] sm:$0xf0]  ;;  %v7740_v32 = vld [vmem:[#allocation5 + $0xaec] sm:$0xf0] }
 0x1e6   :  { %v7779_v58 = vor.u32 %v8493_v48, %v7776_v41  ;;  %v7875_v63 = vor.u32 %v8517_v47, %v7872_v52  ;;  %v7743_v41 = vor.u32 %v8484_v29, %v7740_v32  ;;  %v8457_v47 = vld [vmem:[#allocation5 + $0xa0c] sm:$0xf]  ;;  %v8499_v29 = vld [vmem:[#allocation5 + $0xb5c] sm:$0xf]  ;;  %v7800_v32 = vld [vmem:[#allocation5 + $0xb64] sm:$0xf0] }
 0x1e7   :  { %4981 = vmatpush.bf16.msra.mxu0 %v7143_v3  ;;  %5007 = vmatpush.bf16.msra.mxu2 %v7335_v6  ;;  %v7764_v3 = vld [vmem:[#allocation5 + $0xb1c] sm:$0xf0] }
 0x1e8   :  { %v7860_v6 = vld [vmem:[#allocation5 + $0xbdc] sm:$0xf0]  ;;  %v7767_v12 = vor.u32 %v8490_v23, %v7764_v3  ;;  %v8454_v3 = vld [vmem:[#allocation5 + $0x9f4] sm:$0xf] }
 0x1e9   :  { %4994 = vmatpush.bf16.msra.mxu1 %v7239_v4  ;;  %5020 = vmatpush.bf16.msra.mxu3 %v7431_v14  ;;  %v8514_v4 = vld [vmem:[#allocation5 + $0xbd4] sm:$0xf]  ;;  %v8439_v14 = vld [vmem:[#allocation5 + $0x97c] sm:$0xf]  ;;  %v7524_v23 = vld [vmem:[#allocation5 + $0x93c] sm:$0xf0] }
 0x1ea   :  { %v7863_v17 = vor.u32 %v8514_v4, %v7860_v6  ;;  %v7827_v4 = vor.u32 %v8505_v59, %v7824_v60 }
 0x1eb   :  { %4982 = vmatpush.bf16.msra.mxu0 %v7131_v19  ;;  %5008 = vmatpush.bf16.msra.mxu2 %v7323_v7  ;;  %v7752_v19 = vld [vmem:[#allocation5 + $0xb04] sm:$0xf0]  ;;  %v7659_v7 = vor.u32 %v8463_v16, %v7656_v30  ;;  %v7812_v30 = vld [vmem:[#allocation5 + $0xb7c] sm:$0xf0] }
 0x1ec   :  { %v7755_v22 = vor.u32 %v8487_v18, %v7752_v19  ;;  %v7527_v19 = vor.u32 %v8430_v0, %v7524_v23 }
 0x1ed   :  { %4995 = vmatpush.bf16.msra.mxu1 %v7227_v21  ;;  %5021 = vmatpush.bf16.msra.mxu3 %v7419_v25  ;;  %v7563_v21 = vor.u32 %v8439_v14, %v7560_v15  ;;  %v8460_v25 = vld [vmem:[#allocation5 + $0xa24] sm:$0xf] }
 0x1ee   :  { %v7647_v48 = vor.u32 %v8460_v25, %v7644_v10  ;;  %v7608_v25 = vld [vmem:[#allocation5 + $0x9e4] sm:$0xf0] }
 0x1ef   :  { %4983 = vmatpush.bf16.msra.mxu0 %v7119_v39  ;;  %5009 = vmatpush.bf16.msra.mxu2 %v7311_v44  ;;  %v4777_v36 = vpop.f32.mrf.mxu0  ;;  %v7536_v44 = vld [vmem:[#allocation5 + $0x954] sm:$0xf0]  ;;  %v7704_v10 = vld [vmem:[#allocation5 + $0xaa4] sm:$0xf0] }
 0x1f0   :  { %v4778_v46 = vadd.f32 %v4777_v36, %v8839_v33 }
 0x1f1   :  { %4996 = vmatpush.bf16.msra.mxu1 %v7215_v38  ;;  %5022 = vmatpush.bf16.msra.mxu3 %v7407_v53  ;;  %v4790_v39 = vpop.f32.mrf.mxu1  ;;  %v8433_v38 = vld [vmem:[#allocation5 + $0x94c] sm:$0xf]  ;;  %v7839_v53 = vor.u32 %v8508_v27, %v7836_v31  ;;  %v8424_v27 = vld [vmem:[#allocation5 + $0x904] sm:$0xf]  ;;  %v7500_v31 = vld [vmem:[#allocation5 + $0x90c] sm:$0xf0] }
 0x1f2   :  { %4984 = vmatmul.bf16.vlgmr.msra.gmra.mxu0 %v8802_v5  ;;  %5010 = vmatmul.bf16.vlgmr.msra.gmra.mxu2 %v8800_v62  ;;  %v4791_v52 = vadd.f32 %v4790_v39, %v4778_v46  ;;  %v7539_v61 = vor.u32 %v8433_v38, %v7536_v44  ;;  %v7611_v46 = vor.u32 %v8451_v24, %v7608_v25  ;;  %v7692_v44 = vld [vmem:[#allocation5 + $0xa8c] sm:$0xf0]  ;;  %v8153_v25 = vld [vmem:[#allocation5 + $0x88] sm:$0xf0] }
 0x1f3   :  { %5028 = vmatpush.bf16.msrb.mxu0 %v7587_v56  ;;  %5054 = vmatpush.bf16.msrb.mxu2 %v7779_v58  ;;  %v7632_v56 = vld [vmem:[#allocation5 + $0xa14] sm:$0xf0]  ;;  %v7803_v38 = vor.u32 %v8499_v29, %v7800_v32  ;;  %v7503_v60 = vor.u32 %v8424_v27, %v7500_v31  ;;  %v8177_v29 = vld [vmem:[#allocation5 + $0x148] sm:$0xf0]  ;;  %v6606_v32 = vld [vmem:[#allocation5 + $0x200] sm:$0xf] }
 0x1f4   :  { %4997 = vmatmul.bf16.vlgmr.msra.gmra.mxu1 %v8806_v2  ;;  %5023 = vmatmul.bf16.vlgmr.msra.gmra.mxu3 %v8804_v1  ;;  %v7728_v58 = vld [vmem:[#allocation5 + $0xad4] sm:$0xf0]  ;;  %v7635_v33 = vor.u32 %v8457_v47, %v7632_v56  ;;  %v8496_v47 = vld [vmem:[#allocation5 + $0xb44] sm:$0xf]  ;;  %v6438_v56 = vld [vmem:[#allocation5 + $0xb0] sm:$0xf] }
 0x1f5   :  { %5041 = vmatpush.bf16.msrb.mxu1 %v7683_v57  ;;  %5067 = vmatpush.bf16.msrb.mxu3 %v7875_v63  ;;  %v8481_v57 = vld [vmem:[#allocation5 + $0xacc] sm:$0xf]  ;;  %v4803_v6 = vpop.f32.mrf.mxu2  ;;  %v6702_v27 = vld [vmem:[#allocation5 + $0x2c0] sm:$0xf] }
 0x1f6   :  { %v7731_v63 = vor.u32 %v8481_v57, %v7728_v58  ;;  %v4804_v14 = vadd.f32 %v4803_v6, %v4791_v52  ;;  %v7788_v52 = vld [vmem:[#allocation5 + $0xb4c] sm:$0xf0]  ;;  %v8159_v57 = vld [vmem:[#allocation5 + $0xb8] sm:$0xf0]  ;;  %v8225_v31 = vld [vmem:[#allocation5 + $0x2c8] sm:$0xf0] }
 0x1f7   :  { %5029 = vmatpush.bf16.msrb.mxu0 %v7575_v8  ;;  %5055 = vmatpush.bf16.msrb.mxu2 %v7767_v12  ;;  %v7620_v8 = vld [vmem:[#allocation5 + $0x9fc] sm:$0xf0]  ;;  %v4779_v15 = vpop.f32.mrf.mxu0  ;;  %v4816_v16 = vpop.f32.mrf.mxu3  ;;  %v6534_v58 = vld [vmem:[#allocation5 + $0x170] sm:$0xf]  ;;  %v7791_v6 = vor.u32 %v8496_v47, %v7788_v52  ;;  %v8174_v47 = vld [vmem:[#allocation5 + $0x130] sm:$0xf0] }
 0x1f8   :  { %v7716_v12 = vld [vmem:[#allocation5 + $0xabc] sm:$0xf0]  ;;  %v8846_v20 = vadd.f32 %v4816_v16, %v4804_v14  ;;  %v7623_v9 = vor.u32 %v8454_v3, %v7620_v8  ;;  %v6726_v3 = vld [vmem:[#allocation5 + $0x2f0] sm:$0xf]  ;;  %v6439_v8 = vor.u32 %v8159_v57, %v6438_v56  ;;  %v6426_v14 = vld [vmem:[#allocation5 + $0x98] sm:$0xf] }
 0x1f9   :  { %5042 = vmatpush.bf16.msrb.mxu1 %v7671_v11  ;;  %5068 = vmatpush.bf16.msrb.mxu3 %v7863_v17  ;;  %v8478_v11 = vld [vmem:[#allocation5 + $0xab4] sm:$0xf]  ;;  %v4792_v18 = vpop.f32.mrf.mxu1  ;;  %v8156_v15 = vld [vmem:[#allocation5 + $0xa0] sm:$0xf0]  ;;  %v6522_v16 = vld [vmem:[#allocation5 + $0x158] sm:$0xf] }
 0x1fa   :  { %v8502_v17 = vld [vmem:[#allocation5 + $0xb74] sm:$0xf]  ;;  %v6618_v18 = vld [vmem:[#allocation5 + $0x218] sm:$0xf]  ;;  %v6594_v52 = vld [vmem:[#allocation5 + $0x1e8] sm:$0xf] }
 0x1fb   :  { %5030 = vmatpush.bf16.msrb.mxu0 %v7563_v21  ;;  %5056 = vmatpush.bf16.msrb.mxu2 %v7755_v22  ;;  %v7719_v21 = vor.u32 %v8478_v11, %v7716_v12  ;;  %v7512_v22 = vld [vmem:[#allocation5 + $0x924] sm:$0xf0]  ;;  %v7815_v50 = vor.u32 %v8502_v17, %v7812_v30  ;;  %v8180_v30 = vld [vmem:[#allocation5 + $0x160] sm:$0xf0] }
 0x1fc   :  { %v6690_v57 = vld [vmem:[#allocation5 + $0x2a8] sm:$0xf] }
 0x1fd   :  { %5043 = vmatpush.bf16.msrb.mxu1 %v7659_v7  ;;  %5069 = vmatpush.bf16.msrb.mxu3 %v7851_v28  ;;  %v8427_v7 = vld [vmem:[#allocation5 + $0x91c] sm:$0xf] }
 0x1fe   :  { %v8475_v28 = vld [vmem:[#allocation5 + $0xa9c] sm:$0xf]  ;;  %v7515_v36 = vor.u32 %v8427_v7, %v7512_v22  ;;  %v6427_v7 = vor.u32 %v8156_v15, %v6426_v14  ;;  %v6523_v22 = vor.u32 %v8180_v30, %v6522_v16  ;;  %v6678_v14 = vld [vmem:[#allocation5 + $0x290] sm:$0xf]  ;;  %v6378_v30 = vld [vmem:[#allocation5 + $0x38] sm:$0xf] }
 0x1ff   :  { %5031 = vmatpush.bf16.msrb.mxu0 %v7551_v40  ;;  %5057 = vmatpush.bf16.msrb.mxu2 %v7743_v41  ;;  %v7707_v39 = vor.u32 %v8475_v28, %v7704_v10  ;;  %v8448_v40 = vld [vmem:[#allocation5 + $0x9c4] sm:$0xf]  ;;  %v4818_v59 = vpop.f32.mrf.mxu3  ;;  %v6510_v28 = vld [vmem:[#allocation5 + $0x140] sm:$0xf]  ;;  %v8219_v15 = vld [vmem:[#allocation5 + $0x298] sm:$0xf0] }
 0x200   :  { %v8472_v41 = vld [vmem:[#allocation5 + $0xa84] sm:$0xf] }
 0x201   :  { %5044 = vmatpush.bf16.msrb.mxu1 %v7647_v48  ;;  %5070 = vmatpush.bf16.msrb.mxu3 %v7839_v53  ;;  %v7596_v48 = vld [vmem:[#allocation5 + $0x9cc] sm:$0xf0]  ;;  %v4805_v53 = vpop.f32.mrf.mxu2  ;;  %v7695_v23 = vor.u32 %v8472_v41, %v7692_v44  ;;  %v8150_v41 = vld [vmem:[#allocation5 + $0x70] sm:$0xf0]  ;;  %v6703_v44 = vor.u32 %v8225_v31, %v6702_v27  ;;  %v8141_v27 = vld [vmem:[#allocation5 + $0x28] sm:$0xf0] }
 0x202   :  { %v7599_v0 = vor.u32 %v8448_v40, %v7596_v48  ;;  %v6402_v48 = vld [vmem:[#allocation5 + $0x68] sm:$0xf]  ;;  %v8198_v53 = vld [vmem:[#allocation5 + $0x1f0] sm:$0xf0]  ;;  %v6462_v31 = vld [vmem:[#allocation5 + $0xe0] sm:$0xf] }
 0x203   :  { %5032 = vmatpush.bf16.msrb.mxu0 %v7539_v61  ;;  %5058 = vmatpush.bf16.msrb.mxu2 %v7731_v63  ;;  %v8183_v61 = vld [vmem:[#allocation5 + $0x178] sm:$0xf0] }
 0x204   :  { %v8207_v63 = vld [vmem:[#allocation5 + $0x238] sm:$0xf0]  ;;  %v6535_v11 = vor.u32 %v8183_v61, %v6534_v58  ;;  %v8222_v58 = vld [vmem:[#allocation5 + $0x2b0] sm:$0xf0] }
 0x205   :  { %5045 = vmatpush.bf16.msrb.mxu1 %v7635_v33  ;;  %5071 = vmatpush.bf16.msrb.mxu3 %v7827_v4  ;;  %v6630_v33 = vld [vmem:[#allocation5 + $0x230] sm:$0xf]  ;;  %v8231_v4 = vld [vmem:[#allocation5 + $0x2f8] sm:$0xf0] }
 0x206   :  { %v6631_v12 = vor.u32 %v8207_v63, %v6630_v33  ;;  %v6727_v17 = vor.u32 %v8231_v4, %v6726_v3  ;;  %v6595_v63 = vor.u32 %v8198_v53, %v6594_v52  ;;  %v6486_v3 = vld [vmem:[#allocation5 + $0x110] sm:$0xf]  ;;  %v6691_v4 = vor.u32 %v8222_v58, %v6690_v57  ;;  %v8138_v52 = vld [vmem:[#allocation5 + $0x10] sm:$0xf0]  ;;  %v6450_v57 = vld [vmem:[#allocation5 + $0xc8] sm:$0xf] }
 0x207   :  { %5033 = vmatpush.bf16.msrb.mxu0 %v7527_v19  ;;  %5059 = vmatpush.bf16.msrb.mxu2 %v7719_v21  ;;  %v8204_v19 = vld [vmem:[#allocation5 + $0x220] sm:$0xf0]  ;;  %v8162_v58 = vld [vmem:[#allocation5 + $0xd0] sm:$0xf0] }
 0x208   :  { %v8228_v21 = vld [vmem:[#allocation5 + $0x2e0] sm:$0xf0]  ;;  %v6619_v24 = vor.u32 %v8204_v19, %v6618_v18  ;;  %v6474_v19 = vld [vmem:[#allocation5 + $0xf8] sm:$0xf] }
 0x209   :  { %5046 = vmatpush.bf16.msrb.mxu1 %v7623_v9  ;;  %5072 = vmatpush.bf16.msrb.mxu3 %v7815_v50  ;;  %v6714_v9 = vld [vmem:[#allocation5 + $0x2d8] sm:$0xf]  ;;  %v6414_v50 = vld [vmem:[#allocation5 + $0x80] sm:$0xf]  ;;  %v8144_v18 = vld [vmem:[#allocation5 + $0x40] sm:$0xf0] }
 0x20a   :  { %v6715_v10 = vor.u32 %v8228_v21, %v6714_v9  ;;  %v6679_v9 = vor.u32 %v8219_v15, %v6678_v14  ;;  %v8168_v21 = vld [vmem:[#allocation5 + $0x100] sm:$0xf0]  ;;  %v6451_v14 = vor.u32 %v8162_v58, %v6450_v57 }
 0x20b   :  { %5034 = vmatpush.bf16.msrb.mxu0 %v7515_v36  ;;  %5060 = vmatpush.bf16.msrb.mxu2 %v7707_v39  ;;  %v8201_v36 = vld [vmem:[#allocation5 + $0x208] sm:$0xf0]  ;;  %v6511_v39 = vor.u32 %v8177_v29, %v6510_v28  ;;  %v6379_v28 = vor.u32 %v8144_v18, %v6378_v30  ;;  %v6475_v29 = vor.u32 %v8168_v21, %v6474_v19  ;;  %v8252_v21 = vld [vmem:[#allocation5 + $0x3a0] sm:$0xf0] }
 0x20c   :  { %v6607_v40 = vor.u32 %v8201_v36, %v6606_v32  ;;  %v6366_v36 = vld [vmem:[#allocation5 + $0x20] sm:$0xf] }
 0x20d   :  { %5047 = vmatpush.bf16.msrb.mxu1 %v7611_v46  ;;  %5073 = vmatpush.bf16.msrb.mxu3 %v7803_v38  ;;  %v6415_v46 = vor.u32 %v8153_v25, %v6414_v50  ;;  %v6498_v38 = vld [vmem:[#allocation5 + $0x128] sm:$0xf]  ;;  %v8216_v50 = vld [vmem:[#allocation5 + $0x280] sm:$0xf0] }
 0x20e   :  { %v6499_v33 = vor.u32 %v8174_v47, %v6498_v38  ;;  %v8213_v38 = vld [vmem:[#allocation5 + $0x268] sm:$0xf0]  ;;  %v6354_v47 = vld [vmem:[#allocation5 + $0x8] sm:$0xf] }
 0x20f   :  { %5035 = vmatpush.bf16.msrb.mxu0 %v7503_v60  ;;  %5061 = vmatpush.bf16.msrb.mxu2 %v7695_v23  ;;  %v4829_v56 = vpop.f32.mrf.mxu0  ;;  %v6403_v60 = vor.u32 %v8150_v41, %v6402_v48  ;;  %v8147_v23 = vld [vmem:[#allocation5 + $0x58] sm:$0xf0]  ;;  %v8189_v48 = vld [vmem:[#allocation5 + $0x1a8] sm:$0xf0]  ;;  %v6654_v41 = vld [vmem:[#allocation5 + $0x260] sm:$0xf] }
 0x210   :  { %v4830_v59 = vadd.f32 %v4829_v56, %v8846_v20 }
 0x211   :  { %5048 = vmatpush.bf16.msrb.mxu1 %v7599_v0  ;;  %5074 = vmatpush.bf16.msrb.mxu3 %v7791_v6  ;;  %v4842_v61 = vpop.f32.mrf.mxu1  ;;  %v6390_v0 = vld [vmem:[#allocation5 + $0x50] sm:$0xf] }
 0x212   :  { %5036 = vmatmul.bf16.vlgmr.msrb.gmra.mxu0 %v8814_v34  ;;  %5062 = vmatmul.bf16.vlgmr.msrb.gmra.mxu2 %v8822_v26  ;;  %v8853_v6 = vadd.f32 %v4842_v61, %v4830_v59  ;;  %v6391_v20 = vor.u32 %v8147_v23, %v6390_v0  ;;  %v6546_v59 = vld [vmem:[#allocation5 + $0x188] sm:$0xf]  ;;  %v8186_v61 = vld [vmem:[#allocation5 + $0x190] sm:$0xf0]  ;;  %v6822_v0 = vld [vmem:[#allocation5 + $0x3b0] sm:$0xf] }
 0x213   :  { %5080 = vmatpush.bf16.msra.mxu0 %v6439_v8  ;;  %5106 = vmatpush.bf16.msra.mxu2 %v6631_v12  ;;  %v8171_v8 = vld [vmem:[#allocation5 + $0x118] sm:$0xf0]  ;;  %v6547_v15 = vor.u32 %v8186_v61, %v6546_v59 }
 0x214   :  { %5049 = vmatmul.bf16.vlgmr.msrb.gmra.mxu1 %v8816_v13  ;;  %5075 = vmatmul.bf16.vlgmr.msrb.gmra.mxu3 %v8825_v49  ;;  %v8195_v12 = vld [vmem:[#allocation5 + $0x1d8] sm:$0xf0]  ;;  %v6487_v16 = vor.u32 %v8171_v8, %v6486_v3  ;;  %v6918_v3 = vld [vmem:[#allocation5 + $0x470] sm:$0xf] }
 0x215   :  { %5093 = vmatpush.bf16.msra.mxu1 %v6535_v11  ;;  %5119 = vmatpush.bf16.msra.mxu3 %v6727_v17  ;;  %v6582_v11 = vld [vmem:[#allocation5 + $0x1d0] sm:$0xf]  ;;  %v8255_v23 = vld [vmem:[#allocation5 + $0x3b8] sm:$0xf0] }
 0x216   :  { %v6583_v17 = vor.u32 %v8195_v12, %v6582_v11  ;;  %v8279_v8 = vld [vmem:[#allocation5 + $0x478] sm:$0xf0]  ;;  %v7014_v11 = vld [vmem:[#allocation5 + $0x530] sm:$0xf]  ;;  %v6823_v30 = vor.u32 %v8255_v23, %v6822_v0  ;;  %v8294_v0 = vld [vmem:[#allocation5 + $0x4f0] sm:$0xf0] }
 0x217   :  { %5081 = vmatpush.bf16.msra.mxu0 %v6427_v7  ;;  %5107 = vmatpush.bf16.msra.mxu2 %v6619_v24  ;;  %v6570_v7 = vld [vmem:[#allocation5 + $0x1b8] sm:$0xf]  ;;  %v4831_v25 = vpop.f32.mrf.mxu0  ;;  %v8303_v12 = vld [vmem:[#allocation5 + $0x538] sm:$0xf0]  ;;  %v6919_v18 = vor.u32 %v8279_v8, %v6918_v3  ;;  %v7074_v3 = vld [vmem:[#allocation5 + $0x5a8] sm:$0xf] }
 0x218   :  { %v6666_v24 = vld [vmem:[#allocation5 + $0x278] sm:$0xf]  ;;  %v7015_v19 = vor.u32 %v8303_v12, %v7014_v11 }
 0x219   :  { %5094 = vmatpush.bf16.msra.mxu1 %v6523_v22  ;;  %5120 = vmatpush.bf16.msra.mxu3 %v6715_v10  ;;  %v8192_v22 = vld [vmem:[#allocation5 + $0x1c0] sm:$0xf0]  ;;  %v4844_v10 = vpop.f32.mrf.mxu1  ;;  %v7002_v25 = vld [vmem:[#allocation5 + $0x518] sm:$0xf] }
 0x21a   :  { %v6571_v32 = vor.u32 %v8192_v22, %v6570_v7  ;;  %v6906_v7 = vld [vmem:[#allocation5 + $0x458] sm:$0xf] }
 0x21b   :  { %5082 = vmatpush.bf16.msra.mxu0 %v6415_v46  ;;  %5108 = vmatpush.bf16.msra.mxu2 %v6607_v40  ;;  %v6667_v46 = vor.u32 %v8216_v50, %v6666_v24  ;;  %v6558_v40 = vld [vmem:[#allocation5 + $0x1a0] sm:$0xf]  ;;  %v8276_v50 = vld [vmem:[#allocation5 + $0x460] sm:$0xf0] }
 0x21c   :  { %v6559_v56 = vor.u32 %v8189_v48, %v6558_v40  ;;  %v6894_v40 = vld [vmem:[#allocation5 + $0x440] sm:$0xf] }
 0x21d   :  { %5095 = vmatpush.bf16.msra.mxu1 %v6511_v39  ;;  %5121 = vmatpush.bf16.msra.mxu3 %v6703_v44  ;;  %v8165_v39 = vld [vmem:[#allocation5 + $0xe8] sm:$0xf0]  ;;  %v6367_v44 = vor.u32 %v8141_v27, %v6366_v36  ;;  %v4855_v22 = vpop.f32.mrf.mxu2  ;;  %v6907_v27 = vor.u32 %v8276_v50, %v6906_v7  ;;  %v7062_v7 = vld [vmem:[#allocation5 + $0x590] sm:$0xf] }
 0x21e   :  { %v6463_v53 = vor.u32 %v8165_v39, %v6462_v31  ;;  %v4856_v10 = vadd.f32 %v4855_v22, %v8853_v6  ;;  %v8249_v39 = vld [vmem:[#allocation5 + $0x388] sm:$0xf0]  ;;  %v6990_v6 = vld [vmem:[#allocation5 + $0x500] sm:$0xf]  ;;  %v8315_v22 = vld [vmem:[#allocation5 + $0x598] sm:$0xf0] }
 0x21f   :  { %5083 = vmatpush.bf16.msra.mxu0 %v6403_v60  ;;  %5109 = vmatpush.bf16.msra.mxu2 %v6595_v63  ;;  %v6655_v60 = vor.u32 %v8213_v38, %v6654_v41  ;;  %v8210_v63 = vld [vmem:[#allocation5 + $0x250] sm:$0xf0]  ;;  %v8273_v41 = vld [vmem:[#allocation5 + $0x448] sm:$0xf0] }
 0x220   :  { %v8297_v38 = vld [vmem:[#allocation5 + $0x508] sm:$0xf0] }
 0x221   :  { %5096 = vmatpush.bf16.msra.mxu1 %v6499_v33  ;;  %5122 = vmatpush.bf16.msra.mxu3 %v6691_v4  ;;  %v6642_v33 = vld [vmem:[#allocation5 + $0x248] sm:$0xf]  ;;  %v6355_v4 = vor.u32 %v8138_v52, %v6354_v47  ;;  %v8321_v47 = vld [vmem:[#allocation5 + $0x5c8] sm:$0xf0]  ;;  %v6991_v58 = vor.u32 %v8297_v38, %v6990_v6 }
 0x223   :  { %5084 = vmatpush.bf16.msra.mxu0 %v6391_v20  ;;  %5110 = vmatpush.bf16.msra.mxu2 %v6583_v17  ;;  %v7110_v20 = vld [vmem:[#allocation5 + $0x5f0] sm:$0xf]  ;;  %v6643_v17 = vor.u32 %v8210_v63, %v6642_v33  ;;  %v6978_v63 = vld [vmem:[#allocation5 + $0x4e8] sm:$0xf] }
 0x225   :  { %5097 = vmatpush.bf16.msra.mxu1 %v6487_v16  ;;  %5123 = vmatpush.bf16.msra.mxu3 %v6679_v9  ;;  %v8327_v16 = vld [vmem:[#allocation5 + $0x5f8] sm:$0xf0]  ;;  %v6810_v9 = vld [vmem:[#allocation5 + $0x398] sm:$0xf]  ;;  %v4857_v61 = vpop.f32.mrf.mxu2 }
 0x226   :  { %v7111_v24 = vor.u32 %v8327_v16, %v7110_v20  ;;  %v6811_v36 = vor.u32 %v8252_v21, %v6810_v9  ;;  %v6774_v20 = vld [vmem:[#allocation5 + $0x350] sm:$0xf]  ;;  %v8243_v16 = vld [vmem:[#allocation5 + $0x358] sm:$0xf0]  ;;  %v7038_v61 = vld [vmem:[#allocation5 + $0x560] sm:$0xf] }
 0x227   :  { %5085 = vmatpush.bf16.msra.mxu0 %v6379_v28  ;;  %5111 = vmatpush.bf16.msra.mxu2 %v6571_v32  ;;  %v8300_v28 = vld [vmem:[#allocation5 + $0x520] sm:$0xf0]  ;;  %v4868_v57 = vpop.f32.mrf.mxu3  ;;  %v6966_v9 = vld [vmem:[#allocation5 + $0x4d0] sm:$0xf]  ;;  %v8291_v21 = vld [vmem:[#allocation5 + $0x4d8] sm:$0xf0] }
 0x228   :  { %v8324_v32 = vld [vmem:[#allocation5 + $0x5e0] sm:$0xf0]  ;;  %v7003_v31 = vor.u32 %v8300_v28, %v7002_v25  ;;  %v8863_v59 = vadd.f32 %v4868_v57, %v4856_v10  ;;  %v6967_v28 = vor.u32 %v8291_v21, %v6966_v9  ;;  %v6762_v10 = vld [vmem:[#allocation5 + $0x338] sm:$0xf]  ;;  %v8237_v57 = vld [vmem:[#allocation5 + $0x328] sm:$0xf0] }
 0x229   :  { %5098 = vmatpush.bf16.msra.mxu1 %v6475_v29  ;;  %5124 = vmatpush.bf16.msra.mxu3 %v6667_v46  ;;  %v7098_v29 = vld [vmem:[#allocation5 + $0x5d8] sm:$0xf]  ;;  %v6798_v46 = vld [vmem:[#allocation5 + $0x380] sm:$0xf]  ;;  %v8375_v21 = vld [vmem:[#allocation5 + $0x778] sm:$0xf0] }
 0x22a   :  { %v7099_v48 = vor.u32 %v8324_v32, %v7098_v29  ;;  %v6799_v52 = vor.u32 %v8249_v39, %v6798_v46  ;;  %v8240_v29 = vld [vmem:[#allocation5 + $0x340] sm:$0xf0]  ;;  %v6858_v32 = vld [vmem:[#allocation5 + $0x3f8] sm:$0xf] }
 0x22b   :  { %5086 = vmatpush.bf16.msra.mxu0 %v6367_v44  ;;  %5112 = vmatpush.bf16.msra.mxu2 %v6559_v56  ;;  %v7086_v44 = vld [vmem:[#allocation5 + $0x5c0] sm:$0xf]  ;;  %v8288_v46 = vld [vmem:[#allocation5 + $0x4c0] sm:$0xf0] }
 0x22c   :  { %v7087_v33 = vor.u32 %v8321_v47, %v7086_v44  ;;  %v6763_v44 = vor.u32 %v8240_v29, %v6762_v10 }
 0x22d   :  { %5099 = vmatpush.bf16.msra.mxu1 %v6463_v53  ;;  %5125 = vmatpush.bf16.msra.mxu3 %v6655_v60  ;;  %v8860_v53 = vld [vmem:[#allocation7 + $0x1] ss:$2 sm:$0x7]  ;;  %v8246_v60 = vld [vmem:[#allocation5 + $0x370] sm:$0xf0] }
 0x22e   :  { %v2611_v56 = vperm.slane %v8860_v53, 1 }
 0x22f   :  { %5087 = vmatpush.bf16.msra.mxu0 %v6355_v4  ;;  %5113 = vmatpush.bf16.msra.mxu2 %v6547_v15  ;;  %v4881_v23 = vpop.f32.mrf.mxu0  ;;  %v8318_v4 = vld [vmem:[#allocation5 + $0x5b0] sm:$0xf0]  ;;  %v6979_v15 = vor.u32 %v8294_v0, %v6978_v63  ;;  %v4870_v50 = vpop.f32.mrf.mxu3  ;;  %v6738_v63 = vld [vmem:[#allocation5 + $0x308] sm:$0xf] }
 0x230   :  { %v4882_v8 = vadd.f32 %v4881_v23, %v2611_v56  ;;  %v6750_v56 = vld [vmem:[#allocation5 + $0x320] sm:$0xf]  ;;  %v8234_v0 = vld [vmem:[#allocation5 + $0x310] sm:$0xf0] }
 0x231   :  { %5100 = vmatpush.bf16.msra.mxu1 %v6451_v14  ;;  %5126 = vmatpush.bf16.msra.mxu3 %v6643_v17  ;;  %v4894_v11 = vpop.f32.mrf.mxu1  ;;  %v6870_v17 = vld [vmem:[#allocation5 + $0x410] sm:$0xf]  ;;  %v6739_v9 = vor.u32 %v8234_v0, %v6738_v63  ;;  %v8417_v63 = vld [vmem:[#allocation5 + $0x8c8] sm:$0xf0] }
 0x232   :  { %5088 = vmatmul.bf16.vlgmr.msra.gmra.mxu0 %v8752_v35  ;;  %5114 = vmatmul.bf16.vlgmr.msra.gmra.mxu2 %v8756_v37  ;;  %v6895_v35 = vor.u32 %v8273_v41, %v6894_v40  ;;  %v6882_v37 = vld [vmem:[#allocation5 + $0x428] sm:$0xf]  ;;  %v8312_v41 = vld [vmem:[#allocation5 + $0x580] sm:$0xf0] }
 0x233   :  { %5132 = vmatpush.bf16.msrb.mxu0 %v6823_v30  ;;  %5158 = vmatpush.bf16.msrb.mxu2 %v7015_v19  ;;  %v4895_v30 = vadd.f32 %v4894_v11, %v4882_v8  ;;  %v8267_v19 = vld [vmem:[#allocation5 + $0x418] sm:$0xf0]  ;;  %v8258_v8 = vld [vmem:[#allocation5 + $0x3d0] sm:$0xf0]  ;;  %v6930_v11 = vld [vmem:[#allocation5 + $0x488] sm:$0xf] }
 0x234   :  { %5101 = vmatmul.bf16.vlgmr.msra.gmra.mxu1 %v8754_v54  ;;  %5127 = vmatmul.bf16.vlgmr.msra.gmra.mxu3 %v8758_v42  ;;  %v6786_v54 = vld [vmem:[#allocation5 + $0x368] sm:$0xf]  ;;  %v8270_v42 = vld [vmem:[#allocation5 + $0x430] sm:$0xf0]  ;;  %v6871_v25 = vor.u32 %v8267_v19, %v6870_v17  ;;  %v7302_v19 = vld [vmem:[#allocation5 + $0x770] sm:$0xf] }
 0x235   :  { %5145 = vmatpush.bf16.msrb.mxu1 %v6919_v18  ;;  %5171 = vmatpush.bf16.msrb.mxu3 %v7111_v24  ;;  %v6787_v12 = vor.u32 %v8246_v60, %v6786_v54  ;;  %v6883_v14 = vor.u32 %v8270_v42, %v6882_v37  ;;  %v7075_v18 = vor.u32 %v8318_v4, %v7074_v3  ;;  %v4907_v39 = vpop.f32.mrf.mxu2  ;;  %v8261_v54 = vld [vmem:[#allocation5 + $0x3e8] sm:$0xf0]  ;;  %v6942_v60 = vld [vmem:[#allocation5 + $0x4a0] sm:$0xf]  ;;  %v6834_v4 = vld [vmem:[#allocation5 + $0x3c8] sm:$0xf] }
 0x236   :  { %v6775_v24 = vor.u32 %v8243_v16, %v6774_v20  ;;  %v8865_v6 = vadd.f32 %v4907_v39, %v4895_v30  ;;  %v8285_v37 = vld [vmem:[#allocation5 + $0x4a8] sm:$0xf0]  ;;  %v6751_v42 = vor.u32 %v8237_v57, %v6750_v56  ;;  %v7026_v20 = vld [vmem:[#allocation5 + $0x548] sm:$0xf]  ;;  %v8306_v16 = vld [vmem:[#allocation5 + $0x550] sm:$0xf0] }
 0x237   :  { %5133 = vmatpush.bf16.msrb.mxu0 %v6811_v36  ;;  %5159 = vmatpush.bf16.msrb.mxu2 %v7003_v31  ;;  %v7063_v36 = vor.u32 %v8315_v22, %v7062_v7  ;;  %v6954_v31 = vld [vmem:[#allocation5 + $0x4b8] sm:$0xf]  ;;  %v4883_v40 = vpop.f32.mrf.mxu0  ;;  %v6943_v3 = vor.u32 %v8285_v37, %v6942_v60  ;;  %v7206_v30 = vld [vmem:[#allocation5 + $0x6b0] sm:$0xf]  ;;  %v8399_v22 = vld [vmem:[#allocation5 + $0x838] sm:$0xf0]  ;;  %v7027_v10 = vor.u32 %v8306_v16, %v7026_v20 }
 0x238   :  { %v7398_v7 = vld [vmem:[#allocation5 + $0x830] sm:$0xf]  ;;  %v8372_v40 = vld [vmem:[#allocation5 + $0x760] sm:$0xf0]  ;;  %v8369_v37 = vld [vmem:[#allocation5 + $0x748] sm:$0xf0] }
 0x239   :  { %5146 = vmatpush.bf16.msrb.mxu1 %v6907_v27  ;;  %5172 = vmatpush.bf16.msrb.mxu3 %v7099_v48  ;;  %v8264_v27 = vld [vmem:[#allocation5 + $0x400] sm:$0xf0]  ;;  %v7050_v48 = vld [vmem:[#allocation5 + $0x578] sm:$0xf]  ;;  %v4896_v38 = vpop.f32.mrf.mxu1  ;;  %v8414_v16 = vld [vmem:[#allocation5 + $0x8b0] sm:$0xf0] }
 0x23a   :  { %v6859_v47 = vor.u32 %v8264_v27, %v6858_v32  ;;  %v7303_v32 = vor.u32 %v8375_v21, %v7302_v19  ;;  %v7194_v27 = vld [vmem:[#allocation5 + $0x698] sm:$0xf]  ;;  %v7158_v19 = vld [vmem:[#allocation5 + $0x650] sm:$0xf] }
 0x23b   :  { %5134 = vmatpush.bf16.msrb.mxu0 %v6799_v52  ;;  %5160 = vmatpush.bf16.msrb.mxu2 %v6991_v58  ;;  %v6955_v52 = vor.u32 %v8288_v46, %v6954_v31  ;;  %v7051_v58 = vor.u32 %v8312_v41, %v7050_v48  ;;  %v8348_v31 = vld [vmem:[#allocation5 + $0x6a0] sm:$0xf0]  ;;  %v7290_v46 = vld [vmem:[#allocation5 + $0x758] sm:$0xf]  ;;  %v7254_v21 = vld [vmem:[#allocation5 + $0x710] sm:$0xf] }
 0x23c   :  { %v7386_v48 = vld [vmem:[#allocation5 + $0x818] sm:$0xf]  ;;  %v8396_v41 = vld [vmem:[#allocation5 + $0x820] sm:$0xf0]  ;;  %v7291_v56 = vor.u32 %v8372_v40, %v7290_v46 }
 0x23d   :  { %5147 = vmatpush.bf16.msrb.mxu1 %v6895_v35  ;;  %5173 = vmatpush.bf16.msrb.mxu3 %v7087_v33  ;;  %v6846_v35 = vld [vmem:[#allocation5 + $0x3e0] sm:$0xf]  ;;  %v8309_v33 = vld [vmem:[#allocation5 + $0x568] sm:$0xf0]  ;;  %v4909_v17 = vpop.f32.mrf.mxu2  ;;  %v7482_v38 = vld [vmem:[#allocation5 + $0x8d8] sm:$0xf]  ;;  %v7387_v57 = vor.u32 %v8396_v41, %v7386_v48 }
 0x23e   :  { %v6847_v23 = vor.u32 %v8261_v54, %v6846_v35  ;;  %v7182_v35 = vld [vmem:[#allocation5 + $0x680] sm:$0xf]  ;;  %v8360_v40 = vld [vmem:[#allocation5 + $0x700] sm:$0xf0]  ;;  %v7338_v48 = vld [vmem:[#allocation5 + $0x7b8] sm:$0xf] }
 0x23f   :  { %5135 = vmatpush.bf16.msrb.mxu0 %v6787_v12  ;;  %5161 = vmatpush.bf16.msrb.mxu2 %v6979_v15  ;;  %v7039_v12 = vor.u32 %v8309_v33, %v7038_v61  ;;  %v8282_v15 = vld [vmem:[#allocation5 + $0x490] sm:$0xf0]  ;;  %v7278_v54 = vld [vmem:[#allocation5 + $0x740] sm:$0xf]  ;;  %v8393_v33 = vld [vmem:[#allocation5 + $0x808] sm:$0xf0] }
 0x240   :  { %v6931_v50 = vor.u32 %v8282_v15, %v6930_v11  ;;  %v7374_v61 = vld [vmem:[#allocation5 + $0x800] sm:$0xf]  ;;  %v7362_v15 = vld [vmem:[#allocation5 + $0x7e8] sm:$0xf]  ;;  %v8384_v41 = vld [vmem:[#allocation5 + $0x7c0] sm:$0xf0] }
 0x241   :  { %5148 = vmatpush.bf16.msrb.mxu1 %v6883_v14  ;;  %5174 = vmatpush.bf16.msrb.mxu3 %v7075_v18  ;;  %v8867_v14 = vpop.f32.mrf.mxu3  ;;  %v8351_v18 = vld [vmem:[#allocation5 + $0x6b8] sm:$0xf0] }
 0x242   :  { %v7207_v29 = vor.u32 %v8351_v18, %v7206_v30 }
 0x243   :  { %5136 = vmatpush.bf16.msrb.mxu0 %v6775_v24  ;;  %5162 = vmatpush.bf16.msrb.mxu2 %v6967_v28  ;;  %v6835_v24 = vor.u32 %v8258_v8, %v6834_v4  ;;  %v8423_v28 = vld [vmem:[#allocation5 + $0x8f8] sm:$0xf0]  ;;  %v7170_v4 = vld [vmem:[#allocation5 + $0x668] sm:$0xf] }
 0x244   :  { %v7266_v8 = vld [vmem:[#allocation5 + $0x728] sm:$0xf] }
 0x245   :  { %5149 = vmatpush.bf16.msrb.mxu1 %v6871_v25  ;;  %5175 = vmatpush.bf16.msrb.mxu3 %v7063_v36  ;;  %v7494_v25 = vld [vmem:[#allocation5 + $0x8f0] sm:$0xf]  ;;  %v7399_v36 = vor.u32 %v8399_v22, %v7398_v7  ;;  %v8363_v22 = vld [vmem:[#allocation5 + $0x718] sm:$0xf0] }
 0x246   :  { %v7495_v39 = vor.u32 %v8423_v28, %v7494_v25  ;;  %v7446_v25 = vld [vmem:[#allocation5 + $0x890] sm:$0xf]  ;;  %v8411_v28 = vld [vmem:[#allocation5 + $0x898] sm:$0xf0] }
 0x247   :  { %5137 = vmatpush.bf16.msrb.mxu0 %v6763_v44  ;;  %5163 = vmatpush.bf16.msrb.mxu2 %v6955_v52  ;;  %v8420_v44 = vld [vmem:[#allocation5 + $0x8e0] sm:$0xf0]  ;;  %v7447_v46 = vor.u32 %v8411_v28, %v7446_v25  ;;  %v8495_v25 = vld [vmem:[#allocation5 + $0xb38] sm:$0xf0] }
 0x248   :  { %v7483_v60 = vor.u32 %v8420_v44, %v7482_v38 }
 0x249   :  { %5150 = vmatpush.bf16.msrb.mxu1 %v6859_v47  ;;  %5176 = vmatpush.bf16.msrb.mxu3 %v7051_v58  ;;  %v7195_v47 = vor.u32 %v8348_v31, %v7194_v27  ;;  %v4922_v52 = vpop.f32.mrf.mxu3  ;;  %v8345_v58 = vld [vmem:[#allocation5 + $0x688] sm:$0xf0]  ;;  %v8336_v27 = vld [vmem:[#allocation5 + $0x640] sm:$0xf0]  ;;  %v7242_v31 = vld [vmem:[#allocation5 + $0x6f8] sm:$0xf] }
 0x24a   :  { %v7183_v0 = vor.u32 %v8345_v58, %v7182_v35  ;;  %v8408_v52 = vld [vmem:[#allocation5 + $0x880] sm:$0xf0]  ;;  %v7243_v35 = vor.u32 %v8360_v40, %v7242_v31  ;;  %v7339_v58 = vor.u32 %v8384_v41, %v7338_v48  ;;  %v7578_v40 = vld [vmem:[#allocation5 + $0x998] sm:$0xf] }
 0x24b   :  { %5138 = vmatpush.bf16.msrb.mxu0 %v6751_v42  ;;  %5164 = vmatpush.bf16.msrb.mxu2 %v6943_v3  ;;  %v7470_v42 = vld [vmem:[#allocation5 + $0x8c0] sm:$0xf]  ;;  %v7375_v3 = vor.u32 %v8393_v33, %v7374_v61  ;;  %v8357_v33 = vld [vmem:[#allocation5 + $0x6e8] sm:$0xf0]  ;;  %v8444_v48 = vld [vmem:[#allocation5 + $0x9a0] sm:$0xf0] }
 0x24c   :  { %v7471_v11 = vor.u32 %v8417_v63, %v7470_v42  ;;  %v7326_v42 = vld [vmem:[#allocation5 + $0x7a0] sm:$0xf]  ;;  %v8381_v63 = vld [vmem:[#allocation5 + $0x7a8] sm:$0xf0]  ;;  %v7674_v41 = vld [vmem:[#allocation5 + $0xa58] sm:$0xf] }
 0x24d   :  { %5151 = vmatpush.bf16.msrb.mxu1 %v6847_v23  ;;  %5177 = vmatpush.bf16.msrb.mxu3 %v7039_v12  ;;  %v7279_v23 = vor.u32 %v8369_v37, %v7278_v54  ;;  %v8366_v12 = vld [vmem:[#allocation5 + $0x730] sm:$0xf0]  ;;  %v7134_v54 = vld [vmem:[#allocation5 + $0x620] sm:$0xf] }
 0x24e   :  { %v7267_v30 = vor.u32 %v8366_v12, %v7266_v8  ;;  %v7230_v37 = vld [vmem:[#allocation5 + $0x6e0] sm:$0xf]  ;;  %v7218_v12 = vld [vmem:[#allocation5 + $0x6c8] sm:$0xf] }
 0x24f   :  { %5139 = vmatpush.bf16.msrb.mxu0 %v6739_v9  ;;  %5165 = vmatpush.bf16.msrb.mxu2 %v6931_v50  ;;  %v8873_v20 = vpop.f32.mrf.mxu0  ;;  %v8339_v9 = vld [vmem:[#allocation5 + $0x658] sm:$0xf0]  ;;  %v7231_v8 = vor.u32 %v8357_v33, %v7230_v37  ;;  %v7566_v37 = vld [vmem:[#allocation5 + $0x980] sm:$0xf] }
 0x250   :  { %v8387_v50 = vld [vmem:[#allocation5 + $0x7d8] sm:$0xf0]  ;;  %v7662_v33 = vld [vmem:[#allocation5 + $0xa40] sm:$0xf] }
 0x251   :  { %5152 = vmatpush.bf16.msrb.mxu1 %v6835_v24  ;;  %5178 = vmatpush.bf16.msrb.mxu3 %v7027_v10  ;;  %v7350_v24 = vld [vmem:[#allocation5 + $0x7d0] sm:$0xf]  ;;  %v7159_v10 = vor.u32 %v8339_v9, %v7158_v19 }
 0x252   :  { %5140 = vmatmul.bf16.vlgmr.msrb.gmra.mxu0 %v8778_v51  ;;  %5166 = vmatmul.bf16.vlgmr.msrb.gmra.mxu2 %v8782_v45  ;;  %v8342_v51 = vld [vmem:[#allocation5 + $0x670] sm:$0xf0]  ;;  %v7458_v45 = vld [vmem:[#allocation5 + $0x8a8] sm:$0xf]  ;;  %v7590_v9 = vld [vmem:[#allocation5 + $0x9b0] sm:$0xf] }
 0x253   :  { %5184 = vmatpush.bf16.msra.mxu0 %v7207_v29  ;;  %5210 = vmatpush.bf16.msra.mxu2 %v7399_v36  ;;  %v7171_v17 = vor.u32 %v8342_v51, %v7170_v4  ;;  %v7459_v7 = vor.u32 %v8414_v16, %v7458_v45  ;;  %v7255_v29 = vor.u32 %v8363_v22, %v7254_v21  ;;  %v7146_v36 = vld [vmem:[#allocation5 + $0x638] sm:$0xf]  ;;  %v7122_v4 = vld [vmem:[#allocation5 + $0x608] sm:$0xf]  ;;  %v8330_v51 = vld [vmem:[#allocation5 + $0x610] sm:$0xf0] }
 0x254   :  { %5153 = vmatmul.bf16.vlgmr.msrb.gmra.mxu1 %v8780_v43  ;;  %5179 = vmatmul.bf16.vlgmr.msrb.gmra.mxu3 %v8784_v55  ;;  %v8390_v43 = vld [vmem:[#allocation5 + $0x7f0] sm:$0xf0]  ;;  %v8875_v55 = vpop.f32.mrf.mxu1  ;;  %v8447_v21 = vld [vmem:[#allocation5 + $0x9b8] sm:$0xf0]  ;;  %v7123_v22 = vor.u32 %v8330_v51, %v7122_v4  ;;  %v8513_v4 = vld [vmem:[#allocation5 + $0xbc8] sm:$0xf0] }
 0x255   :  { %5197 = vmatpush.bf16.msra.mxu1 %v7303_v32  ;;  %5223 = vmatpush.bf16.msra.mxu3 %v7495_v39  ;;  %v7363_v18 = vor.u32 %v8390_v43, %v7362_v15  ;;  %v7351_v32 = vor.u32 %v8387_v50, %v7350_v24  ;;  %v8877_v39 = vpop.f32.mrf.mxu2  ;;  %v8354_v15 = vld [vmem:[#allocation5 + $0x6d0] sm:$0xf0]  ;;  %v7314_v43 = vld [vmem:[#allocation5 + $0x788] sm:$0xf]  ;;  %v8471_v24 = vld [vmem:[#allocation5 + $0xa78] sm:$0xf0] }
 0x256   :  { %v7782_v50 = vld [vmem:[#allocation5 + $0xb30] sm:$0xf]  ;;  %v7219_v28 = vor.u32 %v8354_v15, %v7218_v12  ;;  %v7554_v12 = vld [vmem:[#allocation5 + $0x968] sm:$0xf] }
 0x257   :  { %5185 = vmatpush.bf16.msra.mxu0 %v7195_v47  ;;  %5211 = vmatpush.bf16.msra.mxu2 %v7387_v57  ;;  %v8879_v38 = vpop.f32.mrf.mxu3  ;;  %v4935_v44 = vpop.f32.mrf.mxu0  ;;  %v7434_v47 = vld [vmem:[#allocation5 + $0x878] sm:$0xf]  ;;  %v7147_v57 = vor.u32 %v8336_v27, %v7146_v36  ;;  %v7591_v27 = vor.u32 %v8447_v21, %v7590_v9  ;;  %v7650_v15 = vld [vmem:[#allocation5 + $0xa28] sm:$0xf]  ;;  %v7542_v21 = vld [vmem:[#allocation5 + $0x950] sm:$0xf] }
 0x258   :  { %v7435_v61 = vor.u32 %v8408_v52, %v7434_v47  ;;  %v8468_v47 = vld [vmem:[#allocation5 + $0xa60] sm:$0xf0]  ;;  %v7770_v52 = vld [vmem:[#allocation5 + $0xb18] sm:$0xf] }
 0x259   :  { %5198 = vmatpush.bf16.msra.mxu1 %v7291_v56  ;;  %5224 = vmatpush.bf16.msra.mxu3 %v7483_v60  ;;  %v8333_v60 = vld [vmem:[#allocation5 + $0x628] sm:$0xf0] }
 0x25b   :  { %5186 = vmatpush.bf16.msra.mxu0 %v7183_v0  ;;  %5212 = vmatpush.bf16.msra.mxu2 %v7375_v3  ;;  %v7422_v0 = vld [vmem:[#allocation5 + $0x860] sm:$0xf]  ;;  %v7135_v3 = vor.u32 %v8333_v60, %v7134_v54  ;;  %v7675_v54 = vor.u32 %v8468_v47, %v7674_v41  ;;  %v8456_v47 = vld [vmem:[#allocation5 + $0xa00] sm:$0xf0] }
 0x25c   :  { %v4948_v56 = vpop.f32.mrf.mxu1 }
 0x25d   :  { %5199 = vmatpush.bf16.msra.mxu1 %v7279_v23  ;;  %5225 = vmatpush.bf16.msra.mxu3 %v7471_v11  ;;  %v8405_v23 = vld [vmem:[#allocation5 + $0x868] sm:$0xf0]  ;;  %v7327_v11 = vor.u32 %v8381_v63, %v7326_v42  ;;  %v4961_v16 = vpop.f32.mrf.mxu2  ;;  %v8492_v56 = vld [vmem:[#allocation5 + $0xb20] sm:$0xf0] }
 0x25e   :  { %v7423_v45 = vor.u32 %v8405_v23, %v7422_v0  ;;  %v7771_v60 = vor.u32 %v8492_v56, %v7770_v52  ;;  %v8465_v63 = vld [vmem:[#allocation5 + $0xa48] sm:$0xf0]  ;;  %v7758_v0 = vld [vmem:[#allocation5 + $0xb00] sm:$0xf]  ;;  %v7746_v16 = vld [vmem:[#allocation5 + $0xae8] sm:$0xf] }
 0x25f   :  { %5187 = vmatpush.bf16.msra.mxu0 %v7171_v17  ;;  %5213 = vmatpush.bf16.msra.mxu2 %v7363_v18  ;;  %v8378_v17 = vld [vmem:[#allocation5 + $0x790] sm:$0xf0]  ;;  %v4974_v19 = vpop.f32.mrf.mxu3  ;;  %v8489_v23 = vld [vmem:[#allocation5 + $0xb08] sm:$0xf0]  ;;  %v7722_v52 = vld [vmem:[#allocation5 + $0xab8] sm:$0xf] }
 0x260   :  { %v8402_v18 = vld [vmem:[#allocation5 + $0x850] sm:$0xf0]  ;;  %v8480_v56 = vld [vmem:[#allocation5 + $0xac0] sm:$0xf0] }
 0x261   :  { %5200 = vmatpush.bf16.msra.mxu1 %v7267_v30  ;;  %5226 = vmatpush.bf16.msra.mxu3 %v7459_v7  ;;  %v7410_v30 = vld [vmem:[#allocation5 + $0x848] sm:$0xf]  ;;  %v7686_v7 = vld [vmem:[#allocation5 + $0xa70] sm:$0xf] }
 0x262   :  { %v7411_v36 = vor.u32 %v8402_v18, %v7410_v30  ;;  %v7687_v31 = vor.u32 %v8471_v24, %v7686_v7  ;;  %v8510_v30 = vld [vmem:[#allocation5 + $0xbb0] sm:$0xf0]  ;;  %v8435_v7 = vld [vmem:[#allocation5 + $0x958] sm:$0xf0] }
 0x263   :  { %5188 = vmatpush.bf16.msra.mxu0 %v7159_v10  ;;  %5214 = vmatpush.bf16.msra.mxu2 %v7351_v32  ;;  %v7315_v10 = vor.u32 %v8378_v17, %v7314_v43  ;;  %v8519_v32 = vld [vmem:[#allocation5 + $0xbf8] sm:$0xf0] }
 0x265   :  { %5201 = vmatpush.bf16.msra.mxu1 %v7255_v29  ;;  %5227 = vmatpush.bf16.msra.mxu3 %v7447_v46  ;;  %v7878_v29 = vld [vmem:[#allocation5 + $0xbf0] sm:$0xf]  ;;  %v7783_v46 = vor.u32 %v8495_v25, %v7782_v50  ;;  %v8459_v50 = vld [vmem:[#allocation5 + $0xa18] sm:$0xf0] }
 0x266   :  { %v7879_v44 = vor.u32 %v8519_v32, %v7878_v29  ;;  %v7734_v25 = vld [vmem:[#allocation5 + $0xad0] sm:$0xf]  ;;  %v8507_v29 = vld [vmem:[#allocation5 + $0xb98] sm:$0xf0]  ;;  %v7543_v32 = vor.u32 %v8435_v7, %v7542_v21  ;;  %v8498_v21 = vld [vmem:[#allocation5 + $0xb50] sm:$0xf0] }
 0x267   :  { %5189 = vmatpush.bf16.msra.mxu0 %v7147_v57  ;;  %5215 = vmatpush.bf16.msra.mxu2 %v7339_v58  ;;  %v7866_v57 = vld [vmem:[#allocation5 + $0xbd8] sm:$0xf]  ;;  %v7579_v58 = vor.u32 %v8444_v48, %v7578_v40  ;;  %v8432_v40 = vld [vmem:[#allocation5 + $0x940] sm:$0xf0] }
 0x268   :  { %v7626_v48 = vld [vmem:[#allocation5 + $0x9f8] sm:$0xf] }
 0x269   :  { %5202 = vmatpush.bf16.msra.mxu1 %v7243_v35  ;;  %5228 = vmatpush.bf16.msra.mxu3 %v7435_v61  ;;  %v8516_v35 = vld [vmem:[#allocation5 + $0xbe0] sm:$0xf0]  ;;  %v8441_v61 = vld [vmem:[#allocation5 + $0x988] sm:$0xf0] }
 0x26a   :  { %v7867_v42 = vor.u32 %v8516_v35, %v7866_v57  ;;  %v7567_v51 = vor.u32 %v8441_v61, %v7566_v37  ;;  %v7627_v37 = vor.u32 %v8456_v47, %v7626_v48  ;;  %v7723_v61 = vor.u32 %v8480_v56, %v7722_v52 }
 0x26b   :  { %5190 = vmatpush.bf16.msra.mxu0 %v7135_v3  ;;  %5216 = vmatpush.bf16.msra.mxu2 %v7327_v11  ;;  %v7854_v3 = vld [vmem:[#allocation5 + $0xbc0] sm:$0xf]  ;;  %v7759_v11 = vor.u32 %v8489_v23, %v7758_v0  ;;  %v8453_v23 = vld [vmem:[#allocation5 + $0x9e8] sm:$0xf0] }
 0x26c   :  { %v7855_v43 = vor.u32 %v8513_v4, %v7854_v3  ;;  %v7710_v3 = vld [vmem:[#allocation5 + $0xaa0] sm:$0xf]  ;;  %v8477_v4 = vld [vmem:[#allocation5 + $0xaa8] sm:$0xf0] }
 0x26d   :  { %5203 = vmatpush.bf16.msra.mxu1 %v7231_v8  ;;  %5229 = vmatpush.bf16.msra.mxu3 %v7423_v45  ;;  %v7663_v8 = vor.u32 %v8465_v63, %v7662_v33  ;;  %v8462_v45 = vld [vmem:[#allocation5 + $0xa30] sm:$0xf0]  ;;  %v7518_v33 = vld [vmem:[#allocation5 + $0x920] sm:$0xf] }
 0x26e   :  { %v7651_v19 = vor.u32 %v8462_v45, %v7650_v15  ;;  %v7614_v63 = vld [vmem:[#allocation5 + $0x9e0] sm:$0xf]  ;;  %v7711_v15 = vor.u32 %v8477_v4, %v7710_v3  ;;  %v8426_v45 = vld [vmem:[#allocation5 + $0x910] sm:$0xf0] }
 0x26f   :  { %5191 = vmatpush.bf16.msra.mxu0 %v7123_v22  ;;  %5217 = vmatpush.bf16.msra.mxu2 %v7315_v10  ;;  %v8885_v17 = vpop.f32.mrf.mxu0  ;;  %v7638_v22 = vld [vmem:[#allocation5 + $0xa10] sm:$0xf] }
 0x270   :  { %v7830_v10 = vld [vmem:[#allocation5 + $0xb90] sm:$0xf] }
 0x271   :  { %5204 = vmatpush.bf16.msra.mxu1 %v7219_v28  ;;  %5230 = vmatpush.bf16.msra.mxu3 %v7411_v36  ;;  %v8483_v28 = vld [vmem:[#allocation5 + $0xad8] sm:$0xf0]  ;;  %v4921_v36 = vadd.f32 %v8867_v14, %v8865_v6  ;;  %v7831_v41 = vor.u32 %v8507_v29, %v7830_v10  ;;  %v8504_v6 = vld [vmem:[#allocation5 + $0xb80] sm:$0xf0] }
 0x272   :  { %5192 = vmatmul.bf16.vlgmr.msra.gmra.mxu0 %v8802_v5  ;;  %5218 = vmatmul.bf16.vlgmr.msra.gmra.mxu2 %v8800_v62  ;;  %v8438_v5 = vld [vmem:[#allocation5 + $0x970] sm:$0xf0]  ;;  %v7842_v62 = vld [vmem:[#allocation5 + $0xba8] sm:$0xf] }
 0x273   :  { %5236 = vmatpush.bf16.msrb.mxu0 %v7591_v27  ;;  %5262 = vmatpush.bf16.msrb.mxu2 %v7783_v46  ;;  %v7555_v18 = vor.u32 %v8438_v5, %v7554_v12  ;;  %v7843_v24 = vor.u32 %v8510_v30, %v7842_v62  ;;  %v7639_v27 = vor.u32 %v8459_v50, %v7638_v22  ;;  %v7530_v46 = vld [vmem:[#allocation5 + $0x938] sm:$0xf]  ;;  %v8450_v30 = vld [vmem:[#allocation5 + $0x9d0] sm:$0xf0] }
 0x274   :  { %5205 = vmatmul.bf16.vlgmr.msra.gmra.mxu1 %v8806_v2  ;;  %5231 = vmatmul.bf16.vlgmr.msra.gmra.mxu3 %v8804_v1  ;;  %v8486_v2 = vld [vmem:[#allocation5 + $0xaf0] sm:$0xf0]  ;;  %v8887_v1 = vpop.f32.mrf.mxu1  ;;  %v4934_v57 = vadd.f32 %v8873_v20, %v4921_v36  ;;  %v7615_v5 = vor.u32 %v8453_v23, %v7614_v63 }
 0x275   :  { %5249 = vmatpush.bf16.msrb.mxu1 %v7687_v31  ;;  %5275 = vmatpush.bf16.msrb.mxu3 %v7879_v44  ;;  %v7747_v9 = vor.u32 %v8486_v2, %v7746_v16  ;;  %v7735_v31 = vor.u32 %v8483_v28, %v7734_v25  ;;  %v8891_v44 = vpop.f32.mrf.mxu2  ;;  %v7602_v16 = vld [vmem:[#allocation5 + $0x9c8] sm:$0xf] }
 0x276   :  { %v4947_v20 = vadd.f32 %v8875_v55, %v4934_v57  ;;  %v7603_v22 = vor.u32 %v8450_v30, %v7602_v16 }
 0x277   :  { %5237 = vmatpush.bf16.msrb.mxu0 %v7579_v58  ;;  %5263 = vmatpush.bf16.msrb.mxu2 %v7771_v60  ;;  %v5024_v35 = vpop.f32.mrf.mxu3  ;;  %v4987_v58 = vpop.f32.mrf.mxu0  ;;  %v7531_v60 = vor.u32 %v8432_v40, %v7530_v46 }
 0x278   :  { %v4960_v12 = vadd.f32 %v8877_v39, %v4947_v20 }
 0x279   :  { %5250 = vmatpush.bf16.msrb.mxu1 %v7675_v54  ;;  %5276 = vmatpush.bf16.msrb.mxu3 %v7867_v42  ;;  %v7818_v54 = vld [vmem:[#allocation5 + $0xb78] sm:$0xf]  ;;  %v8429_v42 = vld [vmem:[#allocation5 + $0x928] sm:$0xf0] }
 0x27a   :  { %v7819_v0 = vor.u32 %v8504_v6, %v7818_v54  ;;  %v4973_v39 = vadd.f32 %v8879_v38, %v4960_v12 }
 0x27b   :  { %5238 = vmatpush.bf16.msrb.mxu0 %v7567_v51  ;;  %5264 = vmatpush.bf16.msrb.mxu2 %v7759_v11  ;;  %v7806_v51 = vld [vmem:[#allocation5 + $0xb60] sm:$0xf]  ;;  %v7519_v11 = vor.u32 %v8429_v42, %v7518_v33 }
 0x27c   :  { %v5000_v14 = vpop.f32.mrf.mxu1  ;;  %v4986_v25 = vadd.f32 %v8885_v17, %v4973_v39 }
 0x27d   :  { %5251 = vmatpush.bf16.msrb.mxu1 %v7663_v8  ;;  %5277 = vmatpush.bf16.msrb.mxu3 %v7855_v43  ;;  %v8501_v8 = vld [vmem:[#allocation5 + $0xb68] sm:$0xf0]  ;;  %v7506_v43 = vld [vmem:[#allocation5 + $0x908] sm:$0xf]  ;;  %v5013_v62 = vpop.f32.mrf.mxu2 }
 0x27e   :  { %v7807_v2 = vor.u32 %v8501_v8, %v7806_v51  ;;  %v7507_v7 = vor.u32 %v8426_v45, %v7506_v43  ;;  %v4999_v28 = vadd.f32 %v8887_v1, %v4986_v25 }
 0x27f   :  { %5239 = vmatpush.bf16.msrb.mxu0 %v7555_v18  ;;  %5265 = vmatpush.bf16.msrb.mxu2 %v7747_v9  ;;  %v7698_v18 = vld [vmem:[#allocation5 + $0xa88] sm:$0xf]  ;;  %v5026_v55 = vpop.f32.mrf.mxu3 }
 0x280   :  { %v7794_v9 = vld [vmem:[#allocation5 + $0xb48] sm:$0xf]  ;;  %v5012_v38 = vadd.f32 %v8891_v44, %v4999_v28 }
 0x281   :  { %5252 = vmatpush.bf16.msrb.mxu1 %v7651_v19  ;;  %5278 = vmatpush.bf16.msrb.mxu3 %v7843_v24  ;;  %v8474_v19 = vld [vmem:[#allocation5 + $0xa90] sm:$0xf0]  ;;  %v7795_v50 = vor.u32 %v8498_v21, %v7794_v9 }
 0x282   :  { %v7699_v24 = vor.u32 %v8474_v19, %v7698_v18  ;;  %v5025_v10 = vadd.f32 %v5024_v35, %v5012_v38 }
 0x283   :  { %5240 = vmatpush.bf16.msrb.mxu0 %v7543_v32  ;;  %5266 = vmatpush.bf16.msrb.mxu2 %v7735_v31 }
 0x285   :  { %5253 = vmatpush.bf16.msrb.mxu1 %v7639_v27  ;;  %5279 = vmatpush.bf16.msrb.mxu3 %v7831_v41  ;;  %v2612_v41 = vperm.slane %v8860_v53, 2 }
 0x287   :  { %5241 = vmatpush.bf16.msrb.mxu0 %v7531_v60  ;;  %5267 = vmatpush.bf16.msrb.mxu2 %v7723_v61 }
 0x289   :  { %5254 = vmatpush.bf16.msrb.mxu1 %v7627_v37  ;;  %5280 = vmatpush.bf16.msrb.mxu3 %v7819_v0 }
 0x28b   :  { %5242 = vmatpush.bf16.msrb.mxu0 %v7519_v11  ;;  %5268 = vmatpush.bf16.msrb.mxu2 %v7711_v15 }
 0x28d   :  { %5255 = vmatpush.bf16.msrb.mxu1 %v7615_v5  ;;  %5281 = vmatpush.bf16.msrb.mxu3 %v7807_v2 }
 0x28f   :  { %5243 = vmatpush.bf16.msrb.mxu0 %v7507_v7  ;;  %5269 = vmatpush.bf16.msrb.mxu2 %v7699_v24  ;;  %v5037_v29 = vpop.f32.mrf.mxu0 }
 0x290   :  { %v5038_v17 = vadd.f32 %v5037_v29, %v5025_v10 }
 0x291   :  { %5256 = vmatpush.bf16.msrb.mxu1 %v7603_v22  ;;  %5282 = vmatpush.bf16.msrb.mxu3 %v7795_v50  ;;  %v5050_v32 = vpop.f32.mrf.mxu1 }
 0x292   :  { %5244 = vmatmul.bf16.vlgmr.msrb.gmra.mxu0 %v8814_v34  ;;  %5270 = vmatmul.bf16.vlgmr.msrb.gmra.mxu2 %v8822_v26  ;;  %v5051_v36 = vadd.f32 %v5050_v32, %v5038_v17 }
 0x294   :  { %5257 = vmatmul.bf16.vlgmr.msrb.gmra.mxu1 %v8816_v13  ;;  %5283 = vmatmul.bf16.vlgmr.msrb.gmra.mxu3 %v8825_v49 }
 0x295   :  { %v5063_v27 = vpop.f32.mrf.mxu2 }
 0x296   :  { %v5064_v31 = vadd.f32 %v5063_v27, %v5051_v36 }
 0x297   :  { %v5076_v46 = vpop.f32.mrf.mxu3  ;;  %v5039_v40 = vpop.f32.mrf.mxu0 }
 0x298   :  { %v5077_v48 = vadd.f32 %v5076_v46, %v5064_v31 }
 0x299   :  { %v5052_v1 = vpop.f32.mrf.mxu1 }
 0x29a   :  { %v5290_v34 = vrot.slane %v5077_v48, 6 }
 0x29c   :  { %v5292_v13 = vsel %vm5291_vm0, %v8863_v59, %v5290_v34 }
 0x29d   :  { %v5065_v26 = vpop.f32.mrf.mxu2  ;;  %5294 = vst [vmem:[#allocation8] sm:$0xf] %v5292_v13 }
 0x29e   :  { %5308 = dma.vmem_to_hbm [thread:$0]  %s5304_s11, 64, %s5306_s14, [#allocation4]  }
 0x29f   :  { %v5078_v49 = vpop.f32.mrf.mxu3 }
 0x2af   :  { %v5089_v44 = vpop.f32.mrf.mxu0 }
 0x2b0   :  { %v5090_v47 = vadd.f32 %v5089_v44, %v2612_v41 }
 0x2b1   :  { %v5102_v52 = vpop.f32.mrf.mxu1 }
 0x2b2   :  { %v5103_v56 = vadd.f32 %v5102_v52, %v5090_v47 }
 0x2b5   :  { %v5115_v57 = vpop.f32.mrf.mxu2 }
 0x2b6   :  { %v5116_v35 = vadd.f32 %v5115_v57, %v5103_v56 }
 0x2b7   :  { %v5128_v58 = vpop.f32.mrf.mxu3  ;;  %v5091_v54 = vpop.f32.mrf.mxu0 }
 0x2b8   :  { %v5129_v14 = vadd.f32 %v5128_v58, %v5116_v35 }
 0x2b9   :  { %v5104_v6 = vpop.f32.mrf.mxu1 }
 0x2bd   :  { %v5117_v60 = vpop.f32.mrf.mxu2 }
 0x2bf   :  { %v5130_v37 = vpop.f32.mrf.mxu3 }
 0x2cf   :  { %v5141_v61 = vpop.f32.mrf.mxu0 }
 0x2d0   :  { %v5142_v20 = vadd.f32 %v5141_v61, %v5129_v14 }
 0x2d1   :  { %v5154_v59 = vpop.f32.mrf.mxu1 }
 0x2d2   :  { %v5155_v5 = vadd.f32 %v5154_v59, %v5142_v20 }
 0x2d5   :  { %v5167_v33 = vpop.f32.mrf.mxu2 }
 0x2d6   :  { %v5168_v15 = vadd.f32 %v5167_v33, %v5155_v5 }
 0x2d7   :  { %v5180_v42 = vpop.f32.mrf.mxu3  ;;  %v5143_v63 = vpop.f32.mrf.mxu0 }
 0x2d8   :  { %v5181_v16 = vadd.f32 %v5180_v42, %v5168_v15 }
 0x2d9   :  { %v5156_v0 = vpop.f32.mrf.mxu1 }
 0x2dd   :  { %v5169_v23 = vpop.f32.mrf.mxu2 }
 0x2df   :  { %v5182_v53 = vpop.f32.mrf.mxu3 }
 0x2ef   :  { %v5193_v3 = vpop.f32.mrf.mxu0 }
 0x2f0   :  { %v5194_v2 = vadd.f32 %v5193_v3, %v5181_v16 }
 0x2f1   :  { %v5206_v4 = vpop.f32.mrf.mxu1 }
 0x2f2   :  { %v5207_v62 = vadd.f32 %v5206_v4, %v5194_v2 }
 0x2f5   :  { %v5219_v51 = vpop.f32.mrf.mxu2 }
 0x2f6   :  { %v5220_v30 = vadd.f32 %v5219_v51, %v5207_v62 }
 0x2f7   :  { %v5232_v8 = vpop.f32.mrf.mxu3  ;;  %v5195_v11 = vpop.f32.mrf.mxu0 }
 0x2f8   :  { %v5233_v18 = vadd.f32 %v5232_v8, %v5220_v30 }
 0x2f9   :  { %v5208_v12 = vpop.f32.mrf.mxu1 }
 0x2fd   :  { %v5221_v43 = vpop.f32.mrf.mxu2 }
 0x2ff   :  { %v5234_v45 = vpop.f32.mrf.mxu3 }
 0x30f   :  { %v5245_v19 = vpop.f32.mrf.mxu0 }
 0x310   :  { %v5246_v9 = vadd.f32 %v5245_v19, %v5233_v18 }
 0x311   :  { %v5258_v55 = vpop.f32.mrf.mxu1 }
 0x312   :  { %v5259_v21 = vadd.f32 %v5258_v55, %v5246_v9 }
 0x315   :  { %v5271_v7 = vpop.f32.mrf.mxu2 }
 0x316   :  { %v5272_v39 = vadd.f32 %v5271_v7, %v5259_v21 }
 0x317   :  { %v5284_v22 = vpop.f32.mrf.mxu3  ;;  %v5247_v24 = vpop.f32.mrf.mxu0 }
 0x318   :  { %v5285_v25 = vadd.f32 %v5284_v22, %v5272_v39 }
 0x319   :  { %v5260_v50 = vpop.f32.mrf.mxu1 }
 0x31a   :  { %8528 = vtanh.f32 %v5285_v25 }
 0x31d   :  { %v5273_v28 = vpop.f32.mrf.mxu2 }
 0x31f   :  { %v5286_v38 = vpop.f32.mrf.mxu3 }
 0x320   :  { %v8529_v10 = vpop.eup %8528 }
 0x321   :  { %5297 = vst.msk [vmem:[%s8917_s5] sm:$0x3] %vm5296_vm1, %v8529_v10 }
 0x322   :  { %8632 = dma.done.wait [#allocation4], 64  }
 0x323   :  { %8633 = vsyncadd [#allocation4], 4294967232 }
 0x324   :  { %5317 = vsyncpa [#allocation3], 1 }
 0x325   :  { %5318 = vsyncpa [#allocation6], 1 }
 0x326   :  { %5319 = vsyncpa [#allocation4], 1 }

</bundles_post_ra>
